<compile_context>
chip_gen: v6e
topology: v6e:2x2x1
jax: 0.10.0
libtpu: 0.0.40
codegen_flags: <defaults>
</compile_context>

<pallas_src>
import jax
import jax.numpy as jnp
from jax.experimental import pallas as pl
from jax.experimental.pallas import tpu as pltpu

# Scaled-down hyperparameters (module defaults are 773 / 2048 / 10).
INPUT_SIZE = 773        # BITBOARD_SIZE (real feature count)
FEAT_PAD = 896          # 7 * 128, lane-aligned padded feature axis
HIDDEN_SIZE = 256       # scaled down from HIDDEN_LAYER_SIZE = 2048
NUM_LAYERS = 4          # scaled down from HIDDEN_LAYERS_COUNT = 10
OUT_PAD = 128           # padded output width for lane-dense stores
NEG_SLOPE = 0.01        # F.leaky_relu default negative_slope
BN_EPS = 1e-5           # nn.BatchNorm1d default eps


def _leaky_relu(x):
    return jnp.where(x > 0, x, NEG_SLOPE * x)


def chess_eval_kernel(x_ref, w_in_ref, b_in_ref,
                      w_h_ref, shift_ref,
                      w_out_ref, b_out_ref,
                      o_ref):
    # Input layer (bf16 MXU matmul, f32 accumulation) + bias + leaky ReLU in f32.
    h = jnp.dot(x_ref[...], w_in_ref[...],
                preferred_element_type=jnp.float32) + b_in_ref[...]
    h = _leaky_relu(h)

    # Residual hidden blocks. BN (eval) + bias are pre-folded on the host:
    #   z = h @ (W_l * s_l) + shift_l, s_l = gamma*rsqrt(var+eps),
    #   shift_l = (b_l - mean) * s_l + beta.
    for l in range(NUM_LAYERS):            # small static trip count; unrolled
        residual = h
        z = jnp.dot(h.astype(jnp.bfloat16), w_h_ref[l],
                    preferred_element_type=jnp.float32) + shift_ref[l]
        z = _leaky_relu(z)
        # dropout is identity in eval mode
        h = z + residual

    # Output head against zero-padded (H, 128) weights -> lane-dense store.
    o_ref[...] = jnp.dot(h.astype(jnp.bfloat16), w_out_ref[...],
                         preferred_element_type=jnp.float32) + b_out_ref[...]


def chess_eval_net(x, params, *, tb=128):
    """Full ChessEvalNet eval-mode forward pass via one pallas_call.

    Grid iterates over batch tiles (parallel -> megacore-shardable); all
    weights fit comfortably in VMEM at these scaled-down sizes and are
    presented as full-array resident blocks.
    """
    B, F = x.shape
    H = HIDDEN_SIZE
    L = NUM_LAYERS
    assert F == INPUT_SIZE
    assert B % tb == 0, "batch must be a multiple of the batch tile"

    # ---- host-side parameter preparation (folding / padding / casting) ----
    f32 = jnp.float32
    bf16 = jnp.bfloat16

    # Zero-pad feature axis: x columns and W_in rows (padded rows are zero,
    # so the first matmul is unchanged).
    x_p = jnp.pad(x, ((0, 0), (0, FEAT_PAD - F))).astype(bf16)
    w_in = jnp.pad(params["w_in"], ((0, FEAT_PAD - F), (0, 0))).astype(bf16)
    b_in = params["b_in"].astype(f32)

    # Fold BatchNorm (eval) + hidden bias into weights / shift, in f32,
    # then cast weights to bf16.
    scale = params["gamma"] * jax.lax.rsqrt(params["var"] + BN_EPS)   # (L,1,H)
    w_h = (params["w_h"] * scale).astype(bf16)                        # (L,H,H)
    shift = ((params["b_h"] - params["mean"]) * scale
             + params["beta"]).astype(f32)                            # (L,1,H)

    # Pad output head to 128 lanes (column 0 is the real head).
    w_out = jnp.pad(params["w_out"], ((0, 0), (0, OUT_PAD - 1))).astype(bf16)
    b_out = jnp.broadcast_to(params["b_out"].astype(f32), (1, OUT_PAD))

    rep2 = lambda i: (0, 0)
    rep3 = lambda i: (0, 0, 0)

    in_specs = [
        pl.BlockSpec((tb, FEAT_PAD), lambda i: (i, 0)),   # x tile (bf16)
        pl.BlockSpec((FEAT_PAD, H), rep2),                # W_in (bf16)
        pl.BlockSpec((1, H), rep2),                       # b_in (f32)
        pl.BlockSpec((L, H, H), rep3),                    # folded hidden weights (bf16)
        pl.BlockSpec((L, 1, H), rep3),                    # folded per-layer shift (f32)
        pl.BlockSpec((H, OUT_PAD), rep2),                 # padded W_out (bf16)
        pl.BlockSpec((1, OUT_PAD), rep2),                 # padded b_out (f32)
    ]
    out_specs = pl.BlockSpec((tb, OUT_PAD), lambda i: (i, 0))

    out_padded = pl.pallas_call(
        chess_eval_kernel,
        out_shape=jax.ShapeDtypeStruct((B, OUT_PAD), jnp.float32),
        grid=(B // tb,),
        in_specs=in_specs,
        out_specs=out_specs,
        compiler_params=pltpu.CompilerParams(
            dimension_semantics=("parallel",)),
    )(x_p, w_in, b_in, w_h, shift, w_out, b_out)

    return out_padded[:, :1]


def init_params(key, input_size=INPUT_SIZE, hidden=HIDDEN_SIZE, layers=NUM_LAYERS):
    """Deterministic synthetic parameter init (PyTorch-like uniform scales)."""
    ks = jax.random.split(key, 10)

    def u(k, shape, scale):
        return jax.random.uniform(k, shape, jnp.float32, -scale, scale)

    s_in = 1.0 / float(input_size) ** 0.5
    s_h = 1.0 / float(hidden) ** 0.5
    return {
        "w_in": u(ks[0], (input_size, hidden), s_in),
        "b_in": u(ks[1], (1, hidden), s_in),
        "w_h": u(ks[2], (layers, hidden, hidden), s_h),
        "b_h": u(ks[3], (layers, 1, hidden), s_h),
        "gamma": 1.0 + 0.1 * jax.random.normal(ks[4], (layers, 1, hidden), jnp.float32),
        "beta": 0.1 * jax.random.normal(ks[5], (layers, 1, hidden), jnp.float32),
        "mean": 0.1 * jax.random.normal(ks[6], (layers, 1, hidden), jnp.float32),
        "var": jax.random.uniform(ks[7], (layers, 1, hidden), jnp.float32, 0.5, 1.5),
        "w_out": u(ks[8], (hidden, 1), s_h),
        "b_out": u(ks[9], (1, 1), s_h),
    }


def reference_forward(x, p):
    """Plain-JAX f32 reference of the same eval-mode forward pass (unfolded)."""
    h = _leaky_relu(x @ p["w_in"] + p["b_in"])
    for l in range(NUM_LAYERS):
        r = h
        z = h @ p["w_h"][l] + p["b_h"][l]
        z = (z - p["mean"][l]) * jax.lax.rsqrt(p["var"][l] + BN_EPS) * p["gamma"][l] + p["beta"][l]
        h = _leaky_relu(z) + r
    return h @ p["w_out"] + p["b_out"]


if __name__ == "__main__":
    key = jax.random.PRNGKey(0)
    k_x, k_p = jax.random.split(key)

    # Bitboard-like binary features as float32, shape (B, 773).
    # B=1024 with tb=128 gives an 8-step grid (even -> shards across both
    # TensorCores on v7x) while staying tiny in memory (~3 MB of input).
    B = 1024
    x = jax.random.bernoulli(k_x, 0.5, (B, INPUT_SIZE)).astype(jnp.float32)
    params = init_params(k_p)

    out = jax.block_until_ready(chess_eval_net(x, params, tb=128))
    ref = jax.block_until_ready(reference_forward(x, params))

    assert out.shape == (B, 1)
    max_err = float(jnp.max(jnp.abs(out - ref)))
    # bf16 matmul operands (f32 accumulation) -> loose-but-safe tolerance.
    assert jnp.allclose(out, ref, rtol=2e-2, atol=2e-2), \
        f"Pallas output mismatch vs JAX reference (max abs err {max_err})"

    print("KERNEL_OK")
</pallas_src>

<mosaic_0001>
module attributes {stable_mosaic.version = 11 : i64} {
  func.func @chess_eval_kernel(%arg0: i32, %arg1: memref<128x896xbf16, #tpu.memory_space<vmem>>, %arg2: memref<896x256xbf16, #tpu.memory_space<vmem>>, %arg3: memref<1x256xf32, #tpu.memory_space<vmem>>, %arg4: memref<4x256x256xbf16, #tpu.memory_space<vmem>>, %arg5: memref<4x1x256xf32, #tpu.memory_space<vmem>>, %arg6: memref<256x128xbf16, #tpu.memory_space<vmem>>, %arg7: memref<1x128xf32, #tpu.memory_space<vmem>>, %arg8: memref<128x128xf32, #tpu.memory_space<vmem>>) attributes {dimension_semantics = [#tpu.dimension_semantics<parallel>], iteration_bounds = array<i64: 8>, scalar_prefetch = 0 : i64, scratch_operands = 0 : i64, tpu.core_type = #tpu.core_type<tc>, window_params = [{transform_indices = @transform_0, window_bounds = array<i64: 128, 896>}, {pipeline_mode = #tpu.pipeline_mode<synchronous>, transform_indices = @transform_1, window_bounds = array<i64: 896, 256>}, {pipeline_mode = #tpu.pipeline_mode<synchronous>, transform_indices = @transform_2, window_bounds = array<i64: 1, 256>}, {pipeline_mode = #tpu.pipeline_mode<synchronous>, transform_indices = @transform_3, window_bounds = array<i64: 4, 256, 256>}, {pipeline_mode = #tpu.pipeline_mode<synchronous>, transform_indices = @transform_4, window_bounds = array<i64: 4, 1, 256>}, {pipeline_mode = #tpu.pipeline_mode<synchronous>, transform_indices = @transform_5, window_bounds = array<i64: 256, 128>}, {pipeline_mode = #tpu.pipeline_mode<synchronous>, transform_indices = @transform_6, window_bounds = array<i64: 1, 128>}, {transform_indices = @transform_7, window_bounds = array<i64: 128, 128>}]} {
    %c0 = arith.constant 0 : index
    %c0_0 = arith.constant 0 : index
    %0 = vector.load %arg1[%c0, %c0_0] : memref<128x896xbf16, #tpu.memory_space<vmem>>, vector<128x896xbf16>
    %c0_1 = arith.constant 0 : index
    %c0_2 = arith.constant 0 : index
    %1 = vector.load %arg2[%c0_1, %c0_2] : memref<896x256xbf16, #tpu.memory_space<vmem>>, vector<896x256xbf16>
    %cst = arith.constant dense<0.000000e+00> : vector<128x256xf32>
    %2 = tpu.matmul %0, %1, %cst {dimension_numbers = #tpu.dot_dimension_numbers<[1], [0], [0], [1], [0, 0, 1, 1], [], []>} : vector<128x896xbf16>, vector<896x256xbf16>, vector<128x256xf32> -> vector<128x256xf32>
    %c0_3 = arith.constant 0 : index
    %c0_4 = arith.constant 0 : index
    %3 = vector.load %arg3[%c0_3, %c0_4] : memref<1x256xf32, #tpu.memory_space<vmem>>, vector<1x256xf32>
    %4 = vector.broadcast %3 : vector<1x256xf32> to vector<128x256xf32>
    %5 = arith.addf %2, %4 : vector<128x256xf32>
    %cst_5 = arith.constant 0.000000e+00 : f32
    %6 = vector.broadcast %cst_5 : f32 to vector<128x256xf32>
    %7 = arith.cmpf ogt, %5, %6 : vector<128x256xf32>
    %cst_6 = arith.constant 0.00999999977 : f32
    %8 = vector.broadcast %cst_6 : f32 to vector<128x256xf32>
    %9 = arith.mulf %8, %5 : vector<128x256xf32>
    %10 = arith.select %7, %5, %9 : vector<128x256xi1>, vector<128x256xf32>
    %11 = arith.truncf %10 : vector<128x256xf32> to vector<128x256xbf16>
    %c0_7 = arith.constant 0 : index
    %c0_8 = arith.constant 0 : index
    %c0_9 = arith.constant 0 : index
    %12 = vector.load %arg4[%c0_7, %c0_8, %c0_9] : memref<4x256x256xbf16, #tpu.memory_space<vmem>>, vector<1x256x256xbf16>
    %13 = vector.shape_cast %12 : vector<1x256x256xbf16> to vector<256x256xbf16>
    %cst_10 = arith.constant dense<0.000000e+00> : vector<128x256xf32>
    %14 = tpu.matmul %11, %13, %cst_10 {dimension_numbers = #tpu.dot_dimension_numbers<[1], [0], [0], [1], [0, 0, 1, 1], [], []>} : vector<128x256xbf16>, vector<256x256xbf16>, vector<128x256xf32> -> vector<128x256xf32>
    %c0_11 = arith.constant 0 : index
    %c0_12 = arith.constant 0 : index
    %c0_13 = arith.constant 0 : index
    %15 = vector.load %arg5[%c0_11, %c0_12, %c0_13] : memref<4x1x256xf32, #tpu.memory_space<vmem>>, vector<1x1x256xf32>
    %16 = vector.shape_cast %15 : vector<1x1x256xf32> to vector<1x256xf32>
    %17 = vector.broadcast %16 : vector<1x256xf32> to vector<128x256xf32>
    %18 = arith.addf %14, %17 : vector<128x256xf32>
    %cst_14 = arith.constant 0.000000e+00 : f32
    %19 = vector.broadcast %cst_14 : f32 to vector<128x256xf32>
    %20 = arith.cmpf ogt, %18, %19 : vector<128x256xf32>
    %cst_15 = arith.constant 0.00999999977 : f32
    %21 = vector.broadcast %cst_15 : f32 to vector<128x256xf32>
    %22 = arith.mulf %21, %18 : vector<128x256xf32>
    %23 = arith.select %20, %18, %22 : vector<128x256xi1>, vector<128x256xf32>
    %24 = arith.addf %23, %10 : vector<128x256xf32>
    %25 = arith.truncf %24 : vector<128x256xf32> to vector<128x256xbf16>
    %c1 = arith.constant 1 : index
    %c0_16 = arith.constant 0 : index
    %c0_17 = arith.constant 0 : index
    %26 = vector.load %arg4[%c1, %c0_16, %c0_17] : memref<4x256x256xbf16, #tpu.memory_space<vmem>>, vector<1x256x256xbf16>
    %27 = vector.shape_cast %26 : vector<1x256x256xbf16> to vector<256x256xbf16>
    %cst_18 = arith.constant dense<0.000000e+00> : vector<128x256xf32>
    %28 = tpu.matmul %25, %27, %cst_18 {dimension_numbers = #tpu.dot_dimension_numbers<[1], [0], [0], [1], [0, 0, 1, 1], [], []>} : vector<128x256xbf16>, vector<256x256xbf16>, vector<128x256xf32> -> vector<128x256xf32>
    %c1_19 = arith.constant 1 : index
    %c0_20 = arith.constant 0 : index
    %c0_21 = arith.constant 0 : index
    %29 = vector.load %arg5[%c1_19, %c0_20, %c0_21] : memref<4x1x256xf32, #tpu.memory_space<vmem>>, vector<1x1x256xf32>
    %30 = vector.shape_cast %29 : vector<1x1x256xf32> to vector<1x256xf32>
    %31 = vector.broadcast %30 : vector<1x256xf32> to vector<128x256xf32>
    %32 = arith.addf %28, %31 : vector<128x256xf32>
    %cst_22 = arith.constant 0.000000e+00 : f32
    %33 = vector.broadcast %cst_22 : f32 to vector<128x256xf32>
    %34 = arith.cmpf ogt, %32, %33 : vector<128x256xf32>
    %cst_23 = arith.constant 0.00999999977 : f32
    %35 = vector.broadcast %cst_23 : f32 to vector<128x256xf32>
    %36 = arith.mulf %35, %32 : vector<128x256xf32>
    %37 = arith.select %34, %32, %36 : vector<128x256xi1>, vector<128x256xf32>
    %38 = arith.addf %37, %24 : vector<128x256xf32>
    %39 = arith.truncf %38 : vector<128x256xf32> to vector<128x256xbf16>
    %c2 = arith.constant 2 : index
    %c0_24 = arith.constant 0 : index
    %c0_25 = arith.constant 0 : index
    %40 = vector.load %arg4[%c2, %c0_24, %c0_25] : memref<4x256x256xbf16, #tpu.memory_space<vmem>>, vector<1x256x256xbf16>
    %41 = vector.shape_cast %40 : vector<1x256x256xbf16> to vector<256x256xbf16>
    %cst_26 = arith.constant dense<0.000000e+00> : vector<128x256xf32>
    %42 = tpu.matmul %39, %41, %cst_26 {dimension_numbers = #tpu.dot_dimension_numbers<[1], [0], [0], [1], [0, 0, 1, 1], [], []>} : vector<128x256xbf16>, vector<256x256xbf16>, vector<128x256xf32> -> vector<128x256xf32>
    %c2_27 = arith.constant 2 : index
    %c0_28 = arith.constant 0 : index
    %c0_29 = arith.constant 0 : index
    %43 = vector.load %arg5[%c2_27, %c0_28, %c0_29] : memref<4x1x256xf32, #tpu.memory_space<vmem>>, vector<1x1x256xf32>
    %44 = vector.shape_cast %43 : vector<1x1x256xf32> to vector<1x256xf32>
    %45 = vector.broadcast %44 : vector<1x256xf32> to vector<128x256xf32>
    %46 = arith.addf %42, %45 : vector<128x256xf32>
    %cst_30 = arith.constant 0.000000e+00 : f32
    %47 = vector.broadcast %cst_30 : f32 to vector<128x256xf32>
    %48 = arith.cmpf ogt, %46, %47 : vector<128x256xf32>
    %cst_31 = arith.constant 0.00999999977 : f32
    %49 = vector.broadcast %cst_31 : f32 to vector<128x256xf32>
    %50 = arith.mulf %49, %46 : vector<128x256xf32>
    %51 = arith.select %48, %46, %50 : vector<128x256xi1>, vector<128x256xf32>
    %52 = arith.addf %51, %38 : vector<128x256xf32>
    %53 = arith.truncf %52 : vector<128x256xf32> to vector<128x256xbf16>
    %c3 = arith.constant 3 : index
    %c0_32 = arith.constant 0 : index
    %c0_33 = arith.constant 0 : index
    %54 = vector.load %arg4[%c3, %c0_32, %c0_33] : memref<4x256x256xbf16, #tpu.memory_space<vmem>>, vector<1x256x256xbf16>
    %55 = vector.shape_cast %54 : vector<1x256x256xbf16> to vector<256x256xbf16>
    %cst_34 = arith.constant dense<0.000000e+00> : vector<128x256xf32>
    %56 = tpu.matmul %53, %55, %cst_34 {dimension_numbers = #tpu.dot_dimension_numbers<[1], [0], [0], [1], [0, 0, 1, 1], [], []>} : vector<128x256xbf16>, vector<256x256xbf16>, vector<128x256xf32> -> vector<128x256xf32>
    %c3_35 = arith.constant 3 : index
    %c0_36 = arith.constant 0 : index
    %c0_37 = arith.constant 0 : index
    %57 = vector.load %arg5[%c3_35, %c0_36, %c0_37] : memref<4x1x256xf32, #tpu.memory_space<vmem>>, vector<1x1x256xf32>
    %58 = vector.shape_cast %57 : vector<1x1x256xf32> to vector<1x256xf32>
    %59 = vector.broadcast %58 : vector<1x256xf32> to vector<128x256xf32>
    %60 = arith.addf %56, %59 : vector<128x256xf32>
    %cst_38 = arith.constant 0.000000e+00 : f32
    %61 = vector.broadcast %cst_38 : f32 to vector<128x256xf32>
    %62 = arith.cmpf ogt, %60, %61 : vector<128x256xf32>
    %cst_39 = arith.constant 0.00999999977 : f32
    %63 = vector.broadcast %cst_39 : f32 to vector<128x256xf32>
    %64 = arith.mulf %63, %60 : vector<128x256xf32>
    %65 = arith.select %62, %60, %64 : vector<128x256xi1>, vector<128x256xf32>
    %66 = arith.addf %65, %52 : vector<128x256xf32>
    %67 = arith.truncf %66 : vector<128x256xf32> to vector<128x256xbf16>
    %c0_40 = arith.constant 0 : index
    %c0_41 = arith.constant 0 : index
    %68 = vector.load %arg6[%c0_40, %c0_41] : memref<256x128xbf16, #tpu.memory_space<vmem>>, vector<256x128xbf16>
    %cst_42 = arith.constant dense<0.000000e+00> : vector<128x128xf32>
    %69 = tpu.matmul %67, %68, %cst_42 {dimension_numbers = #tpu.dot_dimension_numbers<[1], [0], [0], [1], [0, 0, 1, 1], [], []>} : vector<128x256xbf16>, vector<256x128xbf16>, vector<128x128xf32> -> vector<128x128xf32>
    %c0_43 = arith.constant 0 : index
    %c0_44 = arith.constant 0 : index
    %70 = vector.load %arg7[%c0_43, %c0_44] : memref<1x128xf32, #tpu.memory_space<vmem>>, vector<1x128xf32>
    %71 = vector.broadcast %70 : vector<1x128xf32> to vector<128x128xf32>
    %72 = arith.addf %69, %71 : vector<128x128xf32>
    %c0_45 = arith.constant 0 : index
    %c0_46 = arith.constant 0 : index
    %73 = vector.load %arg8[%c0_45, %c0_46] : memref<128x128xf32, #tpu.memory_space<vmem>>, vector<128x128xf32>
    tpu.vector_store %arg8[%c0_45, %c0_46], %72 {strides = array<i32>} : memref<128x128xf32, #tpu.memory_space<vmem>>, vector<128x128xf32>,
    return
  }
  func.func @transform_0(%arg0: i32) -> (i32, i32) {
    %c0_i32 = arith.constant 0 : i32
    %c0_i32_0 = arith.constant 0 : i32
    return %arg0, %c0_i32 : i32, i32
  }
  func.func @transform_1(%arg0: i32) -> (i32, i32) {
    %c0_i32 = arith.constant 0 : i32
    %c0_i32_0 = arith.constant 0 : i32
    %c0_i32_1 = arith.constant 0 : i32
    return %c0_i32, %c0_i32_0 : i32, i32
  }
  func.func @transform_2(%arg0: i32) -> (i32, i32) {
    %c0_i32 = arith.constant 0 : i32
    %c0_i32_0 = arith.constant 0 : i32
    %c0_i32_1 = arith.constant 0 : i32
    return %c0_i32, %c0_i32_0 : i32, i32
  }
  func.func @transform_3(%arg0: i32) -> (i32, i32, i32) {
    %c0_i32 = arith.constant 0 : i32
    %c0_i32_0 = arith.constant 0 : i32
    %c0_i32_1 = arith.constant 0 : i32
    %c0_i32_2 = arith.constant 0 : i32
    return %c0_i32, %c0_i32_0, %c0_i32_1 : i32, i32, i32
  }
  func.func @transform_4(%arg0: i32) -> (i32, i32, i32) {
    %c0_i32 = arith.constant 0 : i32
    %c0_i32_0 = arith.constant 0 : i32
    %c0_i32_1 = arith.constant 0 : i32
    %c0_i32_2 = arith.constant 0 : i32
    return %c0_i32, %c0_i32_0, %c0_i32_1 : i32, i32, i32
  }
  func.func @transform_5(%arg0: i32) -> (i32, i32) {
    %c0_i32 = arith.constant 0 : i32
    %c0_i32_0 = arith.constant 0 : i32
    %c0_i32_1 = arith.constant 0 : i32
    return %c0_i32, %c0_i32_0 : i32, i32
  }
  func.func @transform_6(%arg0: i32) -> (i32, i32) {
    %c0_i32 = arith.constant 0 : i32
    %c0_i32_0 = arith.constant 0 : i32
    %c0_i32_1 = arith.constant 0 : i32
    return %c0_i32, %c0_i32_0 : i32, i32
  }
  func.func @transform_7(%arg0: i32) -> (i32, i32) {
    %c0_i32 = arith.constant 0 : i32
    %c0_i32_0 = arith.constant 0 : i32
    return %arg0, %c0_i32 : i32, i32
  }
}

</mosaic_0001>

<bundles_post_ra>
// kernel: tpu_custom_call.1
= control target key start
LH: loop header
LB: loop body
LE: loop exit
PB: predicated region body
PF: predicated region fallthrough
CT: control target
= control target key end

     0   :  { %s6768_s0 = inlined_call_operand.hbm [shape: bf16[1024,896], index: 0, kind: input, shape index: {}]   ;;  %s6769_s1 = inlined_call_operand.hbm [shape: bf16[896,256], index: 1, kind: input, shape index: {}]   ;;  %s6770_s2 = inlined_call_operand.hbm [shape: f32[1,256], index: 2, kind: input, shape index: {}]   ;;  %s6771_s3 = inlined_call_operand.hbm [shape: bf16[4,256,256], index: 3, kind: input, shape index: {}]   ;;  %s6772_s4 = inlined_call_operand.hbm [shape: f32[4,1,256], index: 4, kind: input, shape index: {}]   ;;  %s6773_s5 = inlined_call_operand.hbm [shape: bf16[256,128], index: 5, kind: input, shape index: {}]   ;;  %s6774_s6 = inlined_call_operand.hbm [shape: f32[1,128], index: 6, kind: input, shape index: {}]   ;;  %s6775_s7 = inlined_call_operand.hbm [shape: f32[1024,128], index: 7, kind: output, shape index: {}]  }
   0x1   :  { %6780 = sst [smem:[#allocation20_spill]] %s6769_s1 }
   0x2   :  { %12 = vsyncpa [#allocation3], 0 }
   0x3   :  { %14 = vsyncpa [#allocation3 + $0x1], 0 }
   0x4   :  { %15 = vsyncpa [#allocation6], 0 }
   0x5   :  { %16 = vsyncpa [#allocation9], 0 }
   0x6   :  { %17 = vsyncpa [#allocation12], 0 }
   0x7   :  { %18 = vsyncpa [#allocation4], 0 }
   0x8   :  { %20 = vsyncpa [#allocation4 + $0x1], 0  ;;  %s5543_s24 = smov 0   ;;  %s5545_s25 = smov 0  }
   0x9   :  { %s5547_s26 = smov 0   ;;  %s5549_s27 = smov 0  }
   0xa LB: > { %s5484_s28 = smov [#allocation5]   ;;  %s5564_s30 = sadd.s32 4294967295, %s5482_s27   ;;  %s5482_s27 = sphi %s5549_s27, %s6803_s27   ;;  %s5478_s26 = sphi %s5547_s26, %s6802_s26   ;;  %s5474_s25 = sphi %s5545_s25, %s6801_s25   ;;  %s5470_s24 = sphi %s5543_s24, %s6800_s24  }
   0xb   : > { %s221_s29 = sshll.u32 %s5484_s28, 4  ;;  %p4227_p0 = scmp.ge.s32.totalorder %s5482_s27, 1  ;;  %s222_s29 = int_to_ptr.vmem [resolvable:$true] %s221_s29 }
   0xc   : > { %p6776_p1 = scmp.eq.s32.totalorder %s5564_s30, 0  ;;  %p209_p2 = scmp.lt.s32.totalorder %s5482_s27, 9 }
   0xd   : > { %s5485_s9 = smov [#allocation8]   ;;  %s5486_s12 = smov [#allocation11]  }
   0xe   : > { %p5569_p3 = pnand %p4227_p0, %p209_p2  ;;  %s245_s10 = sshll.u32 %s5485_s9, 4  ;;  %s5581_s10 = int_to_ptr.vmem [resolvable:$true] %s245_s10 }
   0xf   : > { %s271_s13 = sshll.u32 %s5486_s12, 4  ;;  %s5233_s15 = scalar_lea.vmem %s222_s29, 14336  ;;  %s5583_s13 = int_to_ptr.vmem [resolvable:$true] %s271_s13 }
  0x10   : > { %s6781_s8 = scalar_select %p5569_p3, 1, 0 }
  0x11   : > { %p4676_p4 = pneg %p5569_p3  ;;  %p5234_p7 = scmp.ne.s32.totalorder %s222_s29, %s5233_s15 }
  0x12   : > { %p5241_p10 = scmp.lt.s32.totalorder %s222_s29, %s222_s29  ;;  %p5242_p11 = scmp.lt.s32.totalorder %s5233_s15, %s5233_s15 }
  0x13   : > { %p5577_p5 = pnand %p4676_p4, %p6776_p1 }
  0x14   : > { %p5243_p12 = por %p5242_p11, %p5241_p10 }
  0x15   : > { %p5587_p6 = pneg %p5577_p5 }
  0x17   : > { %p5236_p8 = pnand %p5234_p7, %p5587_p6 }
  0x19   : > { %p5237_p9 = pneg %p5236_p8 }
  0x1b   : > { %p5244_p13 = pnand %p5243_p12, %p5237_p9 }
  0x1d   : > { %5247 = shalt.err (!%p5244_p13)
}
  0x1e   : > { %s5487_s16 = smov 128   ;;  %s5488_s17 = smov 8  }
  0x1f   : > { %s6784_s1 = sld [smem:[#allocation20_spill]]  ;;  %s5259_s20 = scalar_lea.vmem %s5581_s10, 16384 }
  0x20   : > { %p5260_p0 = scmp.ne.s32.totalorder %s5581_s10, %s5259_s20  ;;  %p5267_p7 = scmp.lt.s32.totalorder %s5581_s10, %s5581_s10 }
  0x21   : > { %p5268_p8 = scmp.lt.s32.totalorder %s5259_s20, %s5259_s20 }
  0x22   : > { %p5262_p2 = pnand %p5260_p0, %p5587_p6 }
  0x23   : > { %p5269_p9 = por %p5268_p8, %p5267_p7 }
  0x24   : > { %p5263_p4 = pneg %p5262_p2 }
  0x25   : > { %4679 = dma.hbm_to_vmem [thread:$0]  (!%p5577_p5), %s6784_s1, 14336, %s222_s29, [#allocation6], %s5487_s16, %s5487_s16, %s5488_s17  }
  0x26   : > { %p5270_p10 = pnand %p5269_p9, %p5263_p4 }
  0x28   : > { %5273 = shalt.err (!%p5270_p10)
}
  0x29   : > { %4685 = dma.hbm_to_vmem [thread:$0]  (!%p5577_p5), %s6771_s3, 16384, %s5581_s10, [#allocation9], %s5487_s16, %s5487_s16, %s5488_s17  }
  0x2a   : > { %s5285_s23 = scalar_lea.vmem %s5583_s13, 2048  ;;  %p5293_p0 = scmp.lt.s32.totalorder %s5583_s13, %s5583_s13 }
  0x2b   : > { %p5286_p11 = scmp.ne.s32.totalorder %s5583_s13, %s5285_s23  ;;  %p5294_p2 = scmp.lt.s32.totalorder %s5285_s23, %s5285_s23 }
  0x2d   : > { %p5288_p12 = pnand %p5286_p11, %p5587_p6  ;;  %p5295_p4 = por %p5294_p2, %p5293_p0 }
  0x2f   : > { %p5289_p13 = pneg %p5288_p12 }
  0x31   : > { %p5296_p7 = pnand %p5295_p4, %p5289_p13 }
  0x33   : > { %5299 = shalt.err (!%p5296_p7)
}
  0x34   : > { %s5489_s28 = smov 64   ;;  %s5490_s29 = smov 4  }
  0x35   : > { %4691 = dma.hbm_to_vmem [thread:$0]  (!%p5577_p5), %s6773_s5, 2048, %s5583_s13, [#allocation12], %s5489_s28, %s5489_s28, %s5490_s29  }
  0x36   : > { %s5491_s10 = smov [#allocation7]   ;;  %s5492_s16 = smov [#allocation10]  }
  0x37   : > { %s235_s15 = sshll.u32 %s5491_s10, 4  ;;  %s258_s17 = sshll.u32 %s5492_s16, 4  ;;  %s236_s15 = int_to_ptr.vmem [resolvable:$true] %s235_s15  ;;  %s259_s17 = int_to_ptr.vmem [resolvable:$true] %s258_s17 }
  0x38   : > { %s5311_s18 = scalar_lea.vmem %s236_s15, 32  ;;  %p5319_p11 = scmp.lt.s32.totalorder %s236_s15, %s236_s15 }
  0x39   : > { %p5312_p8 = scmp.ne.s32.totalorder %s236_s15, %s5311_s18  ;;  %p5320_p12 = scmp.lt.s32.totalorder %s5311_s18, %s5311_s18 }
  0x3b   : > { %p5314_p9 = pnand %p5312_p8, %p5587_p6  ;;  %p5321_p13 = por %p5320_p12, %p5319_p11 }
  0x3d   : > { %p5315_p10 = pneg %p5314_p9 }
  0x3f   : > { %p5322_p0 = pnand %p5321_p13, %p5315_p10 }
  0x41   : > { %5325 = shalt.err (!%p5322_p0)
}
  0x42   : > { %4682 = dma.hbm_to_vmem [thread:$0]  (!%p5577_p5), %s6770_s2, 32, %s236_s15, [#allocation6]  }
  0x43   : > { %s5337_s13 = scalar_lea.vmem %s259_s17, 128  ;;  %p5345_p8 = scmp.lt.s32.totalorder %s259_s17, %s259_s17 }
  0x44   : > { %p5338_p2 = scmp.ne.s32.totalorder %s259_s17, %s5337_s13  ;;  %p5346_p9 = scmp.lt.s32.totalorder %s5337_s13, %s5337_s13 }
  0x46   : > { %p5340_p4 = pnand %p5338_p2, %p5587_p6  ;;  %p5347_p1 = por %p5346_p9, %p5345_p8 }
  0x48   : > { %p5341_p7 = pneg %p5340_p4 }
  0x4a   : > { %p5348_p3 = pnand %p5347_p1, %p5341_p7 }
  0x4c   : > { %5351 = shalt.err (!%p5348_p3)
}
  0x4d   : > { %s5493_s21 = smov 32   ;;  %s5494_s22 = smov 2  }
  0x4e   : > { %4688 = dma.hbm_to_vmem [thread:$0]  (!%p5577_p5), %s6772_s4, 128, %s259_s17, [#allocation9], %s5493_s21, %s5493_s21, %s5494_s22  }
  0x4f   : > { %s5495_s29 = smov [#allocation13]  }
  0x50   : > { %s285_s9 = sshll.u32 %s5495_s29, 4  ;;  %s286_s9 = int_to_ptr.vmem [resolvable:$true] %s285_s9 }
  0x51   : > { %s5363_s12 = scalar_lea.vmem %s286_s9, 16  ;;  %s5370_s10 = scalar_lea.vmem %s286_s9, 32 }
  0x52   : > { %p5364_p10 = scmp.ne.s32.totalorder %s286_s9, %s5363_s12  ;;  %p5371_p1 = scmp.lt.s32.totalorder %s286_s9, %s286_s9 }
  0x53   : > { %p5372_p3 = scmp.lt.s32.totalorder %s5370_s10, %s5363_s12 }
  0x54   : > { %p5366_p11 = pnand %p5364_p10, %p5587_p6 }
  0x55   : > { %p5373_p13 = por %p5372_p3, %p5371_p1 }
  0x56   : > { %p5367_p12 = pneg %p5366_p11 }
  0x58   : > { %p5374_p0 = pnand %p5373_p13, %p5367_p12 }
  0x5a   : > { %5377 = shalt.err (!%p5374_p0)
}
  0x5b   : > { %4694 = dma.hbm_to_vmem [thread:$0]  (!%p5577_p5), %s6774_s6, 16, %s286_s9, [#allocation12]  }
  0x5c   : > { %s4226_s14 = sadd.s32 4294967294, %s5482_s27   ;;  %s5645_s11 = sadd.s32 1, %s5482_s27  }
  0x5d   : > { %s30_s17 = ssub.s32 %s5482_s27, %s5645_s11  ;;  %s33_s18 = sadd.s32 1, %s5478_s26 }
  0x5e   : > { %p31_p6 = scmp.eq.s32.totalorder %s30_s17, 0  ;;  %p40_p2 = scmp.ne.s32.totalorder %s5478_s26, %s5474_s25 }
  0x5f   : > { %p41_p4 = scmp.eq.s32.totalorder %s5482_s27, 0  ;;  %p46_p7 = scmp.ne.s32.totalorder %s5474_s25, %s5470_s24 }
  0x60   : > { %s5656_s19 = scalar_select %p31_p6, %s5478_s26, %s33_s18  }
  0x61   : > { %p42_p8 = por %p41_p4, %p40_p2  ;;  %p6785_p9 = scmp.eq.s32.totalorder %s5564_s30, 0 }
  0x62   : > { %p196_p5 = scmp.eq.s32.totalorder %s5564_s30, 7  ;;  %p202_p11 = scmp.eq.s32.totalorder %s4226_s14, 7 }
  0x63   : > { %p5660_p10 = por %p6785_p9, %p46_p7  ;;  %p4709_p12 = scmp.lt.s32.totalorder %s5482_s27, 8 }
  0x64   : > { %s296_s13 = sand.u32 1, %s5478_s26   ;;  %p5667_p1 = por %p196_p5, %p40_p2 }
  0x65   : > { %s6786_s20 = scalar_select %p5660_p10, 1, 0 }
  0x66   : > { %s6787_s21 = scalar_select %p5667_p1, 1, 0 }
  0x67   : > { %p5671_p3 = por %p202_p11, %p46_p7  ;;  %s4645_s23 = smul.u32 448, %s296_s13 }
  0x68   : > { %s4646_s28 = smul.u32 7168, %s5482_s27  ;;  %p5676_p13 = pnand %p4709_p12, %p42_p8 }
  0x69   : > { %s6788_s22 = scalar_select %p5671_p3, 1, 0 }
  0x6a   : > { %s5683_s10 = scalar_lea.hbm %s6768_s0, %s4646_s28  ;;  %s300_s15 = scalar_lea.vmem [#allocation2], %s4645_s23 }
  0x6b   : > { %s308_s16 = sshll.u32 %s300_s15, 4  ;;  %s5687_s14 = scalar_lea.sflag [#allocation3], %s296_s13  ;;  %s5685_s16 = int_to_ptr.vmem [resolvable:$true] %s308_s16 }
  0x6c   : > { %s5378_s17 = scalar_lea.hbm %s5683_s10, 7168  ;;  %p5380_p6 = pneg %p5676_p13 }
  0x6d   : > { %p5379_p0 = scmp.ne.s32.totalorder %s5683_s10, %s5378_s17  ;;  %s5383_s28 = scalar_lea.hbm %s6768_s0, 57344 }
  0x6e   : > { %p5384_p7 = scmp.lt.s32.totalorder %s5683_s10, %s6768_s0  ;;  %p5385_p8 = scmp.lt.s32.totalorder %s5383_s28, %s5378_s17 }
  0x6f   : > { %p5381_p2 = pnand %p5380_p6, %p5379_p0 }
  0x70   : > { %p5386_p9 = por %p5385_p8, %p5384_p7 }
  0x71   : > { %p5382_p4 = pneg %p5381_p2 }
  0x73   : > { %p5387_p5 = pnand %p5386_p9, %p5382_p4 }
  0x75   : > { %5390 = shalt.err (!%p5387_p5)
}
  0x76   : > { %s5391_s13 = scalar_lea.vmem %s5685_s16, 7168  ;;  %s5496_s23 = smov [#allocation2]  }
  0x77   : > { %p5392_p11 = scmp.ne.s32.totalorder %s5685_s16, %s5391_s13  ;;  %s5396_s15 = sshll.u32 %s5496_s23, 4  ;;  %s5397_s15 = int_to_ptr.vmem [resolvable:$false] %s5396_s15 }
  0x78   : > { %s5398_s18 = scalar_lea.vmem %s5397_s15, 14336  ;;  %p5399_p2 = scmp.lt.s32.totalorder %s5685_s16, %s5397_s15 }
  0x79   : > { %p5394_p12 = pnand %p5392_p11, %p5380_p6  ;;  %p5400_p3 = scmp.lt.s32.totalorder %s5398_s18, %s5391_s13 }
  0x7b   : > { %p5395_p0 = pneg %p5394_p12  ;;  %p5401_p1 = por %p5400_p3, %p5399_p2 }
  0x7d   : > { %p5402_p10 = pnand %p5401_p1, %p5395_p0 }
  0x7f   : > { %5405 = shalt.err (!%p5402_p10)
}
  0x80   : > { %s5497_s1 = smov 448   ;;  %s5498_s17 = smov 28  }
  0x81   : > { %4698 = dma.hbm_to_vmem [thread:$0]  (!%p5676_p13), %s5683_s10, 7168, %s5685_s16, %s5687_s14, %s5497_s1, %s5497_s1, %s5498_s17  }
  0x82   : > { %p6790_p6 = scmp.ne.s32.totalorder %s6781_s8, 0 }
  0x83   : > { %s5711_s9 = sand.u32 (!%p6790_p6), 1, %s5474_s25   ;;  %p6791_p10 = scmp.ne.s32.totalorder (!%p6790_p6), %s6786_s20, 0 }
  0x84   : > { %320 = sbr.rel (%p6790_p6) target bundleno = 1594 (0x63a), region = 48  ;;  %s323_s12 = scalar_lea.sflag (!%p6790_p6), [#allocation3], %s5711_s9 }
  0x85   : > { %s4647_s28 = smul.u32 (!%p6790_p6), 448, %s5711_s9 }
  0x87   : > { %s5715_s13 = scalar_lea.vmem (!%p6790_p6), [#allocation2], %s4647_s28 }
  0x89   : > { %5449 = dma.done.wait (%p6791_p10), %s323_s12, 7168  }
  0x8a   : > { %5451 = vsyncadd (%p6791_p10), %s323_s12, 4294960128  ;;  %p6792_p1 = scmp.eq.s32.totalorder %s5564_s30, 0 }
  0x8c   : > { %5453 = dma.done.wait (%p6792_p1), [#allocation6], 14368   ;;  %p6793_p3 = pmov %p6792_p1 }
  0x8d   : > { %p6794_p13 = pmov %p6792_p1 }
  0x8e   : > { %5455 = vsyncadd (%p6793_p3), [#allocation6], 4294952928 }
  0x8f   : > { %5457 = dma.done.wait (%p6794_p13), [#allocation9], 16512   ;;  %p6795_p4 = pmov %p6792_p1 }
  0x90   : > { %p6796_p7 = pmov %p6792_p1 }
  0x91   : > { %5459 = vsyncadd (%p6795_p4), [#allocation9], 4294950784 }
  0x92   : > { %5461 = dma.done.wait (%p6796_p7), [#allocation12], 2064   ;;  %p6797_p8 = pmov %p6792_p1 }
  0x93   : > { %v4766_v0 = vld [vmem:[#allocation5 + $0x74] ss:$8 sps:$4 sm:$0xff]   ;;  %v4770_v2 = vld [vmem:[#allocation5 + $0x70] ss:$8 sps:$4 sm:$0xff]   ;;  %v4772_v4 = vld [vmem:[#allocation5 + $0x64] ss:$8 sps:$4 sm:$0xff]  }
  0x94   : > { %5463 = vsyncadd (%p6797_p8), [#allocation12], 4294965232  ;;  %v4768_v1 = vld [vmem:[#allocation5 + $0x174] ss:$8 sps:$4 sm:$0xff]   ;;  %1420 = vmatprep.subr.bf16.mxu0 %v4766_v0  ;;  %v4771_v3 = vld [vmem:[#allocation5 + $0x170] ss:$8 sps:$4 sm:$0xff]  }
  0x95   : > { %1533 = vmatprep.subr.bf16.mxu1 %v4768_v1  ;;  %1421 = vmatpush1.bf16.msra.mxu0 %v4770_v2  ;;  %v4774_v5 = vld [vmem:[#allocation5 + $0x164] ss:$8 sps:$4 sm:$0xff]   ;;  %v4776_v6 = vld [vmem:[#allocation5 + $0x60] ss:$8 sps:$4 sm:$0xff]   ;;  %v4778_v8 = vld [vmem:[#allocation5 + $0x54] ss:$8 sps:$4 sm:$0xff]  }
  0x96   : > { %1534 = vmatpush1.bf16.msra.mxu1 %v4771_v3  ;;  %1422 = vmatprep.subr.bf16.mxu0 %v4772_v4  ;;  %v4777_v7 = vld [vmem:[#allocation5 + $0x160] ss:$8 sps:$4 sm:$0xff]   ;;  %v4780_v9 = vld [vmem:[#allocation5 + $0x154] ss:$8 sps:$4 sm:$0xff]   ;;  %v4782_v10 = vld [vmem:[#allocation5 + $0x50] ss:$8 sps:$4 sm:$0xff]  }
  0x97   : > { %1535 = vmatprep.subr.bf16.mxu1 %v4774_v5  ;;  %v4783_v11 = vld [vmem:[#allocation5 + $0x150] ss:$8 sps:$4 sm:$0xff]   ;;  %v4784_v12 = vld [vmem:[#allocation5 + $0x44] ss:$8 sps:$4 sm:$0xff]   ;;  %v4788_v14 = vld [vmem:[#allocation5 + $0x40] ss:$8 sps:$4 sm:$0xff]  }
  0x98   : > { %v4786_v13 = vld [vmem:[#allocation5 + $0x144] ss:$8 sps:$4 sm:$0xff]   ;;  %v4789_v15 = vld [vmem:[#allocation5 + $0x140] ss:$8 sps:$4 sm:$0xff]   ;;  %v4790_v16 = vld [vmem:[#allocation5 + $0x34] ss:$8 sps:$4 sm:$0xff]  }
  0x99   : > { %1423 = vmatpush1.bf16.msra.mxu0 %v4776_v6  ;;  %v4792_v17 = vld [vmem:[#allocation5 + $0x134] ss:$8 sps:$4 sm:$0xff]   ;;  %v4794_v18 = vld [vmem:[#allocation5 + $0x30] ss:$8 sps:$4 sm:$0xff]   ;;  %v4796_v20 = vld [vmem:[#allocation5 + $0x24] ss:$8 sps:$4 sm:$0xff]  }
  0x9a   : > { %1536 = vmatpush1.bf16.msra.mxu1 %v4777_v7  ;;  %1424 = vmatprep.subr.bf16.mxu0 %v4778_v8  ;;  %v4795_v19 = vld [vmem:[#allocation5 + $0x130] ss:$8 sps:$4 sm:$0xff]   ;;  %v4798_v21 = vld [vmem:[#allocation5 + $0x124] ss:$8 sps:$4 sm:$0xff]   ;;  %v4800_v22 = vld [vmem:[#allocation5 + $0x20] ss:$8 sps:$4 sm:$0xff]  }
  0x9b   : > { %1537 = vmatprep.subr.bf16.mxu1 %v4780_v9  ;;  %v4801_v23 = vld [vmem:[#allocation5 + $0x120] ss:$8 sps:$4 sm:$0xff]   ;;  %v4802_v24 = vld [vmem:[#allocation5 + $0x14] ss:$8 sps:$4 sm:$0xff]   ;;  %v4806_v26 = vld [vmem:[#allocation5 + $0x10] ss:$8 sps:$4 sm:$0xff]  }
  0x9c   : > { %v4804_v25 = vld [vmem:[#allocation5 + $0x114] ss:$8 sps:$4 sm:$0xff]   ;;  %v4807_v27 = vld [vmem:[#allocation5 + $0x110] ss:$8 sps:$4 sm:$0xff]   ;;  %v4808_v28 = vld [vmem:[#allocation5 + $0x4] ss:$8 sps:$4 sm:$0xff]  }
  0x9d   : > { %1425 = vmatpush1.bf16.msra.mxu0 %v4782_v10  ;;  %v4810_v29 = vld [vmem:[#allocation5 + $0x104] ss:$8 sps:$4 sm:$0xff]   ;;  %v4812_v30 = vld [vmem:[#allocation5] ss:$8 sps:$4 sm:$0xff]   ;;  %v4814_v32 = vld [vmem:[#allocation5 + $0xf4] ss:$8 sps:$4 sm:$0xff]  }
  0x9e   : > { %1538 = vmatpush1.bf16.msra.mxu1 %v4783_v11  ;;  %1426 = vmatprep.subr.bf16.mxu0 %v4784_v12  ;;  %v4813_v31 = vld [vmem:[#allocation5 + $0x100] ss:$8 sps:$4 sm:$0xff]   ;;  %v4816_v33 = vld [vmem:[#allocation5 + $0x1f4] ss:$8 sps:$4 sm:$0xff]   ;;  %v4818_v34 = vld [vmem:[#allocation5 + $0xf0] ss:$8 sps:$4 sm:$0xff]  }
  0x9f   : > { %1539 = vmatprep.subr.bf16.mxu1 %v4786_v13  ;;  %v4819_v35 = vld [vmem:[#allocation5 + $0x1f0] ss:$8 sps:$4 sm:$0xff]   ;;  %v4820_v36 = vld [vmem:[#allocation5 + $0xe4] ss:$8 sps:$4 sm:$0xff]   ;;  %v4824_v38 = vld [vmem:[#allocation5 + $0xe0] ss:$8 sps:$4 sm:$0xff]  }
  0xa0   : > { %v4822_v37 = vld [vmem:[#allocation5 + $0x1e4] ss:$8 sps:$4 sm:$0xff]   ;;  %v4825_v39 = vld [vmem:[#allocation5 + $0x1e0] ss:$8 sps:$4 sm:$0xff]   ;;  %v4826_v40 = vld [vmem:[#allocation5 + $0xd4] ss:$8 sps:$4 sm:$0xff]  }
  0xa1   : > { %1427 = vmatpush1.bf16.msra.mxu0 %v4788_v14  ;;  %v4828_v41 = vld [vmem:[#allocation5 + $0x1d4] ss:$8 sps:$4 sm:$0xff]   ;;  %v4830_v42 = vld [vmem:[#allocation5 + $0xd0] ss:$8 sps:$4 sm:$0xff]   ;;  %v4832_v44 = vld [vmem:[#allocation5 + $0xc4] ss:$8 sps:$4 sm:$0xff]  }
  0xa2   : > { %1540 = vmatpush1.bf16.msra.mxu1 %v4789_v15  ;;  %1428 = vmatprep.subr.bf16.mxu0 %v4790_v16  ;;  %v4831_v43 = vld [vmem:[#allocation5 + $0x1d0] ss:$8 sps:$4 sm:$0xff]   ;;  %v4834_v45 = vld [vmem:[#allocation5 + $0x1c4] ss:$8 sps:$4 sm:$0xff]   ;;  %v4836_v46 = vld [vmem:[#allocation5 + $0xc0] ss:$8 sps:$4 sm:$0xff]  }
  0xa3   : > { %1541 = vmatprep.subr.bf16.mxu1 %v4792_v17  ;;  %v4837_v47 = vld [vmem:[#allocation5 + $0x1c0] ss:$8 sps:$4 sm:$0xff]   ;;  %v4838_v48 = vld [vmem:[#allocation5 + $0xb4] ss:$8 sps:$4 sm:$0xff]   ;;  %v4842_v52 = vld [vmem:[#allocation5 + $0xb0] ss:$8 sps:$4 sm:$0xff]  }
  0xa4   : > { %v4864_v49 = vld [vmem:[%s5715_s13 + $0x4] ss:$28 sps:$4 sm:$0xff]   ;;  %v4840_v50 = vld [vmem:[#allocation5 + $0x1b4] ss:$8 sps:$4 sm:$0xff]   ;;  %v4867_v51 = vld [vmem:[%s5715_s13 + $0xc] ss:$28 sps:$4 sm:$0xff]  }
  0xa5   : > { %1429 = vmatpush1.bf16.msra.mxu0 %v4794_v18  ;;  %1452 = vmatprep.mubr.bf16.mxu0 %v4864_v49  ;;  %v4843_v53 = vld [vmem:[#allocation5 + $0x1b0] ss:$8 sps:$4 sm:$0xff]   ;;  %v4844_v54 = vld [vmem:[#allocation5 + $0xa4] ss:$8 sps:$4 sm:$0xff]   ;;  %v4848_v56 = vld [vmem:[#allocation5 + $0xa0] ss:$8 sps:$4 sm:$0xff]  }
  0xa6   : > { %1542 = vmatpush1.bf16.msra.mxu1 %v4795_v19  ;;  %1430 = vmatprep.subr.bf16.mxu0 %v4796_v20  ;;  %v4846_v55 = vld [vmem:[#allocation5 + $0x1a4] ss:$8 sps:$4 sm:$0xff]   ;;  %v4849_v57 = vld [vmem:[#allocation5 + $0x1a0] ss:$8 sps:$4 sm:$0xff]   ;;  %v4850_v58 = vld [vmem:[#allocation5 + $0x94] ss:$8 sps:$4 sm:$0xff]  }
  0xa7   : > { %1543 = vmatprep.subr.bf16.mxu1 %v4798_v21  ;;  %1565 = vmatprep.mubr.bf16.mxu1 %v4867_v51  ;;  %v4852_v59 = vld [vmem:[#allocation5 + $0x194] ss:$8 sps:$4 sm:$0xff]   ;;  %v4854_v60 = vld [vmem:[#allocation5 + $0x90] ss:$8 sps:$4 sm:$0xff]   ;;  %v4856_v62 = vld [vmem:[#allocation5 + $0x84] ss:$8 sps:$4 sm:$0xff]  }
  0xa8   : > { %v4855_v61 = vld [vmem:[#allocation5 + $0x190] ss:$8 sps:$4 sm:$0xff]   ;;  %v4858_v63 = vld [vmem:[#allocation5 + $0x184] ss:$8 sps:$4 sm:$0xff]   ;;  %v4860_v0 = vld [vmem:[#allocation5 + $0x80] ss:$8 sps:$4 sm:$0xff]  }
  0xa9   : > { %1431 = vmatpush1.bf16.msra.mxu0 %v4800_v22  ;;  %v4861_v1 = vld [vmem:[#allocation5 + $0x180] ss:$8 sps:$4 sm:$0xff]   ;;  %v4870_v2 = vld [vmem:[#allocation5 + $0x274] ss:$8 sps:$4 sm:$0xff]   ;;  %v4868_v6 = vld [vmem:[#allocation5 + $0x270] ss:$8 sps:$4 sm:$0xff]  }
  0xaa   : > { %1544 = vmatpush1.bf16.msra.mxu1 %v4801_v23  ;;  %1432 = vmatprep.subr.bf16.mxu0 %v4802_v24  ;;  %v4873_v3 = vld [vmem:[#allocation5 + $0x374] ss:$8 sps:$4 sm:$0xff]   ;;  %v4865_v5 = vld [vmem:[%s5715_s13 + $0x8] ss:$28 sps:$4 sm:$0xff]   ;;  %v4871_v7 = vld [vmem:[#allocation5 + $0x370] ss:$8 sps:$4 sm:$0xff]  }
  0xab   : > { %1545 = vmatprep.subr.bf16.mxu1 %v4804_v25  ;;  %v4862_v4 = vld [vmem:[%s5715_s13] ss:$28 sps:$4 sm:$0xff]   ;;  %v4876_v8 = vld [vmem:[#allocation5 + $0x264] ss:$8 sps:$4 sm:$0xff]   ;;  %v4881_v16 = vld [vmem:[%s5715_s13 + $0x38] ss:$28 sps:$4 sm:$0xff]  }
  0xac   : > { %v4877_v9 = vld [vmem:[%s5715_s13 + $0x3c] ss:$28 sps:$4 sm:$0xff]   ;;  %v4879_v10 = vld [vmem:[%s5715_s13 + $0x44] ss:$28 sps:$4 sm:$0xff]   ;;  %v4892_v20 = vld [vmem:[%s5715_s13 + $0x74] ss:$28 sps:$4 sm:$0xff]  }
  0xad   : > { %1433 = vmatpush1.bf16.msra.mxu0 %v4806_v26  ;;  %v4888_v11 = vld [vmem:[#allocation5 + $0x364] ss:$8 sps:$4 sm:$0xff]   ;;  %v4874_v12 = vld [vmem:[#allocation5 + $0x260] ss:$8 sps:$4 sm:$0xff]   ;;  %v4885_v13 = vld [vmem:[#allocation5 + $0x254] ss:$8 sps:$4 sm:$0xff]  }
  0xae   : > { %1546 = vmatpush1.bf16.msra.mxu1 %v4807_v27  ;;  %1434 = vmatprep.subr.bf16.mxu0 %v4808_v28  ;;  %v4886_v14 = vld [vmem:[#allocation5 + $0x360] ss:$8 sps:$4 sm:$0xff]   ;;  %v4903_v15 = vld [vmem:[#allocation5 + $0x354] ss:$8 sps:$4 sm:$0xff]   ;;  %v4883_v18 = vld [vmem:[#allocation5 + $0x250] ss:$8 sps:$4 sm:$0xff]  }
  0xaf   : > { %1547 = vmatprep.subr.bf16.mxu1 %v4810_v29  ;;  %v4882_v17 = vld [vmem:[%s5715_s13 + $0x40] ss:$28 sps:$4 sm:$0xff]   ;;  %v4891_v19 = vld [vmem:[#allocation5 + $0x244] ss:$8 sps:$4 sm:$0xff]   ;;  %v4901_v22 = vld [vmem:[#allocation5 + $0x350] ss:$8 sps:$4 sm:$0xff]  }
  0xb0   : > { %v4894_v21 = vld [vmem:[%s5715_s13 + $0x7c] ss:$28 sps:$4 sm:$0xff]   ;;  %v4918_v23 = vld [vmem:[#allocation5 + $0x344] ss:$8 sps:$4 sm:$0xff]   ;;  %v4889_v24 = vld [vmem:[#allocation5 + $0x240] ss:$8 sps:$4 sm:$0xff]  }
  0xb1   : > { %1435 = vmatpush1.bf16.msra.mxu0 %v4812_v30  ;;  %v4896_v25 = vld [vmem:[%s5715_s13 + $0x70] ss:$28 sps:$4 sm:$0xff]   ;;  %v4900_v26 = vld [vmem:[#allocation5 + $0x234] ss:$8 sps:$4 sm:$0xff]   ;;  %v4916_v28 = vld [vmem:[#allocation5 + $0x340] ss:$8 sps:$4 sm:$0xff]  }
  0xb2   : > { %1548 = vmatpush1.bf16.msra.mxu1 %v4813_v31  ;;  %1436 = vmatprep.subr.bf16.mxu0 %v4814_v32  ;;  %v4897_v27 = vld [vmem:[%s5715_s13 + $0x78] ss:$28 sps:$4 sm:$0xff]   ;;  %v4906_v30 = vld [vmem:[#allocation5 + $0x224] ss:$8 sps:$4 sm:$0xff]   ;;  %s4245_s8 = sshll.u32 %s5711_s9, 7  ;;  %s4564_s29 = sshll.u32 %s5564_s30, 11 }
  0xb3   : > { %1549 = vmatprep.subr.bf16.mxu1 %v4816_v33  ;;  %v4898_v29 = vld [vmem:[#allocation5 + $0x230] ss:$8 sps:$4 sm:$0xff]   ;;  %v4907_v31 = vld [vmem:[%s5715_s13 + $0xac] ss:$28 sps:$4 sm:$0xff]   ;;  %v4933_v33 = vld [vmem:[#allocation5 + $0x334] ss:$8 sps:$4 sm:$0xff]   ;;  %s6722_s23 = scalar_lea.hbm %s6775_s7, %s4564_s29 }
  0xb4   : > { %v4909_v32 = vld [vmem:[%s5715_s13 + $0xb4] ss:$28 sps:$4 sm:$0xff]   ;;  %v4927_v49 = vld [vmem:[%s5715_s13 + $0xe8] ss:$28 sps:$4 sm:$0xff]   ;;  %s6686_s20 = scalar_lea.vmem [#allocation14], %s4245_s8  ;;  %s4083_s15 = scalar_lea.sflag [#allocation4], %s5711_s9 }
  0xb5   : > { %1437 = vmatpush2.bf16.msra.mxu0 %v4818_v34  ;;  %v4931_v34 = vld [vmem:[#allocation5 + $0x330] ss:$8 sps:$4 sm:$0xff]   ;;  %s4096_s10 = sshll.u32 %s6686_s20, 4  ;;  %p6798_p5 = scmp.ne.s32.totalorder %s6787_s21, 0  ;;  %s6724_s10 = int_to_ptr.vmem [resolvable:$true] %s4096_s10 }
  0xb6   : > { %1550 = vmatpush2.bf16.msra.mxu1 %v4819_v35  ;;  %1438 = vmatprep.subr.bf16.mxu0 %v4820_v36  ;;  %v4904_v35 = vld [vmem:[#allocation5 + $0x220] ss:$8 sps:$4 sm:$0xff]   ;;  %v4948_v36 = vld [vmem:[#allocation5 + $0x324] ss:$8 sps:$4 sm:$0xff]   ;;  %v4928_v51 = vld [vmem:[#allocation5 + $0x2f0] ss:$8 sps:$4 sm:$0xff]  }
  0xb7   : > { %1551 = vmatprep.subr.bf16.mxu1 %v4822_v37  ;;  %v4915_v37 = vld [vmem:[#allocation5 + $0x214] ss:$8 sps:$4 sm:$0xff]   ;;  %s5406_s18 = scalar_lea.vmem %s6724_s10, 2048  ;;  %s5500_s30 = smov [#allocation14]  }
  0xb8   : > { %p5407_p9 = scmp.ne.s32.totalorder %s6724_s10, %s5406_s18  ;;  %s5410_s1 = sshll.u32 %s5500_s30, 4  ;;  %s5411_s1 = int_to_ptr.vmem [resolvable:$false] %s5410_s1 }
  0xb9   : > { %1439 = vmatpush2.bf16.msra.mxu0 %v4824_v38  ;;  %v4911_v38 = vld [vmem:[%s5715_s13 + $0xa8] ss:$28 sps:$4 sm:$0xff]   ;;  %s5412_s17 = scalar_lea.vmem %s5411_s1, 4096  ;;  %p5413_p0 = scmp.lt.s32.totalorder %s6724_s10, %s5411_s1 }
  0xba   : > { %1552 = vmatpush2.bf16.msra.mxu1 %v4825_v39  ;;  %1440 = vmatprep.subr.bf16.mxu0 %v4826_v40  ;;  %v4912_v39 = vld [vmem:[%s5715_s13 + $0xb0] ss:$28 sps:$4 sm:$0xff]   ;;  %p5408_p11 = pnand %p5407_p9, %p6798_p5  ;;  %p5414_p2 = scmp.lt.s32.totalorder %s5412_s17, %s5406_s18 }
  0xbb   : > { %1553 = vmatprep.subr.bf16.mxu1 %v4828_v41  ;;  %v4913_v40 = vld [vmem:[#allocation5 + $0x210] ss:$8 sps:$4 sm:$0xff]   ;;  %v4921_v41 = vld [vmem:[#allocation5 + $0x204] ss:$8 sps:$4 sm:$0xff]  }
  0xbc   : > { %p5409_p12 = pneg %p5408_p11  ;;  %p5415_p6 = por %p5414_p2, %p5413_p0 }
  0xbd   : > { %1441 = vmatpush2.bf16.msra.mxu0 %v4830_v42  ;;  %v4922_v42 = vld [vmem:[%s5715_s13 + $0xe4] ss:$28 sps:$4 sm:$0xff]  }
  0xbe   : > { %1554 = vmatpush2.bf16.msra.mxu1 %v4831_v43  ;;  %1442 = vmatprep.subr.bf16.mxu0 %v4832_v44  ;;  %v4924_v43 = vld [vmem:[%s5715_s13 + $0xec] ss:$28 sps:$4 sm:$0xff]   ;;  %p5416_p10 = pnand %p5415_p6, %p5409_p12 }
  0xbf   : > { %1555 = vmatprep.subr.bf16.mxu1 %v4834_v45  ;;  %v4946_v44 = vld [vmem:[#allocation5 + $0x320] ss:$8 sps:$4 sm:$0xff]   ;;  %v4963_v45 = vld [vmem:[#allocation5 + $0x314] ss:$8 sps:$4 sm:$0xff]  }
  0xc1   : > { %1443 = vmatpush2.bf16.msra.mxu0 %v4836_v46  ;;  %v4919_v46 = vld [vmem:[#allocation5 + $0x200] ss:$8 sps:$4 sm:$0xff]  }
  0xc2   : > { %1556 = vmatpush2.bf16.msra.mxu1 %v4837_v47  ;;  %1444 = vmatprep.subr.bf16.mxu0 %v4838_v48  ;;  %v4926_v47 = vld [vmem:[%s5715_s13 + $0xe0] ss:$28 sps:$4 sm:$0xff]  }
  0xc3   : > { %1557 = vmatprep.subr.bf16.mxu1 %v4840_v50  ;;  %v4930_v48 = vld [vmem:[#allocation5 + $0x2f4] ss:$8 sps:$4 sm:$0xff]   ;;  %v4961_v50 = vld [vmem:[#allocation5 + $0x310] ss:$8 sps:$4 sm:$0xff]  }
  0xc5   : > { %1445 = vmatpush2.bf16.msra.mxu0 %v4842_v52  ;;  %v4936_v52 = vld [vmem:[#allocation5 + $0x2e4] ss:$8 sps:$4 sm:$0xff]  }
  0xc6   : > { %1558 = vmatpush2.bf16.msra.mxu1 %v4843_v53  ;;  %1446 = vmatprep.subr.bf16.mxu0 %v4844_v54  ;;  %v4937_v53 = vld [vmem:[%s5715_s13 + $0x11c] ss:$28 sps:$4 sm:$0xff]   ;;  %v4939_v54 = vld [vmem:[%s5715_s13 + $0x124] ss:$28 sps:$4 sm:$0xff]  }
  0xc7   : > { %1559 = vmatprep.subr.bf16.mxu1 %v4846_v55  ;;  %v4978_v55 = vld [vmem:[#allocation5 + $0x304] ss:$8 sps:$4 sm:$0xff]  }
  0xc9   : > { %1447 = vmatpush2.bf16.msra.mxu0 %v4848_v56  ;;  %v4976_v56 = vld [vmem:[#allocation5 + $0x300] ss:$8 sps:$4 sm:$0xff]  }
  0xca   : > { %1560 = vmatpush2.bf16.msra.mxu1 %v4849_v57  ;;  %1448 = vmatprep.subr.bf16.mxu0 %v4850_v58  ;;  %v4934_v57 = vld [vmem:[#allocation5 + $0x2e0] ss:$8 sps:$4 sm:$0xff]   ;;  %v4941_v58 = vld [vmem:[%s5715_s13 + $0x118] ss:$28 sps:$4 sm:$0xff]  }
  0xcb   : > { %1561 = vmatprep.subr.bf16.mxu1 %v4852_v59  ;;  %v4942_v59 = vld [vmem:[%s5715_s13 + $0x120] ss:$28 sps:$4 sm:$0xff]  }
  0xcd   : > { %1449 = vmatpush2.bf16.msra.mxu0 %v4854_v60  ;;  %v4945_v60 = vld [vmem:[#allocation5 + $0x2d4] ss:$8 sps:$4 sm:$0xff]  }
  0xce   : > { %1562 = vmatpush2.bf16.msra.mxu1 %v4855_v61  ;;  %1450 = vmatprep.subr.bf16.mxu0 %v4856_v62  ;;  %v4943_v61 = vld [vmem:[#allocation5 + $0x2d0] ss:$8 sps:$4 sm:$0xff]   ;;  %v4951_v62 = vld [vmem:[#allocation5 + $0x2c4] ss:$8 sps:$4 sm:$0xff]  }
  0xcf   : > { %1563 = vmatprep.subr.bf16.mxu1 %v4858_v63  ;;  %v4952_v63 = vld [vmem:[%s5715_s13 + $0x154] ss:$28 sps:$4 sm:$0xff]  }
  0xd1   : > { %1451 = vmatpush2.bf16.msra.mxu0 %v4860_v0  ;;  %v4954_v0 = vld [vmem:[%s5715_s13 + $0x15c] ss:$28 sps:$4 sm:$0xff]  }
  0xd2   : > { %1564 = vmatpush2.bf16.msra.mxu1 %v4861_v1  ;;  %1646 = vmatprep.subr.bf16.mxu0 %v4870_v2  ;;  %v4949_v1 = vld [vmem:[#allocation5 + $0x2c0] ss:$8 sps:$4 sm:$0xff]   ;;  %v4956_v2 = vld [vmem:[%s5715_s13 + $0x150] ss:$28 sps:$4 sm:$0xff]  }
  0xd3   : > { %1759 = vmatprep.subr.bf16.mxu1 %v4873_v3  ;;  %v4960_v3 = vld [vmem:[#allocation5 + $0x2b4] ss:$8 sps:$4 sm:$0xff]  }
  0xd4   : > { %1453 = vmatmul.mubr.bf16.vlgmr.msra.gmra.mxu0 %v4862_v4  ;;  %v4957_v4 = vld [vmem:[%s5715_s13 + $0x158] ss:$28 sps:$4 sm:$0xff]  }
  0xd5   : > { %1566 = vmatmul.mubr.bf16.vlgmr.msra.gmra.mxu1 %v4865_v5  ;;  %1647 = vmatpush1.bf16.msra.mxu0 %v4868_v6  ;;  %v4958_v5 = vld [vmem:[#allocation5 + $0x2b0] ss:$8 sps:$4 sm:$0xff]   ;;  %v4967_v6 = vld [vmem:[%s5715_s13 + $0x18c] ss:$28 sps:$4 sm:$0xff]  }
  0xd6   : > { %1760 = vmatpush1.bf16.msra.mxu1 %v4871_v7  ;;  %1648 = vmatprep.subr.bf16.mxu0 %v4876_v8  ;;  %v4966_v7 = vld [vmem:[#allocation5 + $0x2a4] ss:$8 sps:$4 sm:$0xff]   ;;  %v4969_v8 = vld [vmem:[%s5715_s13 + $0x194] ss:$28 sps:$4 sm:$0xff]  }
  0xd7   : > { %1462 = vmatprep.mubr.bf16.mxu0 %v4877_v9  ;;  %1575 = vmatprep.mubr.bf16.mxu1 %v4879_v10  ;;  %v4964_v9 = vld [vmem:[#allocation5 + $0x2a0] ss:$8 sps:$4 sm:$0xff]   ;;  %v4975_v10 = vld [vmem:[#allocation5 + $0x294] ss:$8 sps:$4 sm:$0xff]  }
  0xd8   : > { %1761 = vmatprep.subr.bf16.mxu1 %v4888_v11  ;;  %v4971_v11 = vld [vmem:[%s5715_s13 + $0x188] ss:$28 sps:$4 sm:$0xff]  }
  0xd9   : > { %1649 = vmatpush1.bf16.msra.mxu0 %v4874_v12  ;;  %v4972_v12 = vld [vmem:[%s5715_s13 + $0x190] ss:$28 sps:$4 sm:$0xff]  }
  0xda   : > { %1762 = vmatpush1.bf16.msra.mxu1 %v4886_v14  ;;  %1650 = vmatprep.subr.bf16.mxu0 %v4885_v13  ;;  %v4973_v13 = vld [vmem:[#allocation5 + $0x290] ss:$8 sps:$4 sm:$0xff]  }
  0xdb   : > { %1763 = vmatprep.subr.bf16.mxu1 %v4903_v15  ;;  %v4984_v14 = vld [vmem:[%s5715_s13 + $0x14] ss:$28 sps:$4 sm:$0xff]   ;;  %v4981_v15 = vld [vmem:[#allocation5 + $0x284] ss:$8 sps:$4 sm:$0xff]  }
  0xdc   : > { %1463 = vmatmul.mubr.bf16.gmra.mxu0 %v4881_v16  ;;  %v4979_v16 = vld [vmem:[#allocation5 + $0x280] ss:$8 sps:$4 sm:$0xff]  }
  0xdd   : > { %1576 = vmatmul.mubr.bf16.gmra.mxu1 %v4882_v17  ;;  %1651 = vmatpush1.bf16.msra.mxu0 %v4883_v18  ;;  %v4982_v17 = vld [vmem:[%s5715_s13 + $0x10] ss:$28 sps:$4 sm:$0xff]   ;;  %v5499_v18 = vmov 0  }
  0xde   : > { %1472 = vmatprep.mubr.bf16.mxu0 %v4892_v20  ;;  %1652 = vmatprep.subr.bf16.mxu0 %v4891_v19  ;;  %v4985_v19 = vld [vmem:[%s5715_s13 + $0x18] ss:$28 sps:$4 sm:$0xff]   ;;  %v4986_v20 = vld [vmem:[%s5715_s13 + $0x4c] ss:$28 sps:$4 sm:$0xff]  }
  0xdf   : > { %1585 = vmatprep.mubr.bf16.mxu1 %v4894_v21  ;;  %1764 = vmatpush1.bf16.msra.mxu1 %v4901_v22  ;;  %v4988_v21 = vld [vmem:[%s5715_s13 + $0x48] ss:$28 sps:$4 sm:$0xff]   ;;  %v4989_v22 = vld [vmem:[%s5715_s13 + $0x50] ss:$28 sps:$4 sm:$0xff]  }
  0xe0   : > { %1765 = vmatprep.subr.bf16.mxu1 %v4918_v23  ;;  %v4990_v23 = vld [vmem:[%s5715_s13 + $0x84] ss:$28 sps:$4 sm:$0xff]  }
  0xe1   : > { %1653 = vmatpush1.bf16.msra.mxu0 %v4889_v24  ;;  %v4992_v24 = vld [vmem:[%s5715_s13 + $0x80] ss:$28 sps:$4 sm:$0xff]  }
  0xe2   : > { %1654 = vmatprep.subr.bf16.mxu0 %v4900_v26  ;;  %v4994_v26 = vld [vmem:[%s5715_s13 + $0xbc] ss:$28 sps:$4 sm:$0xff]  }
  0xe3   : > { %1766 = vmatpush1.bf16.msra.mxu1 %v4916_v28  ;;  %v5014_v28 = vld [vmem:[#allocation8 + $0x70] ss:$8 sps:$4 sm:$0xff]  }
  0xe4   : > { %1473 = vmatmul.mubr.bf16.gmra.mxu0 %v4896_v25  ;;  %1767 = vmatprep.subr.bf16.mxu1 %v4933_v33  ;;  %v4993_v25 = vld [vmem:[%s5715_s13 + $0x88] ss:$28 sps:$4 sm:$0xff]  }
  0xe5   : > { %1586 = vmatmul.mubr.bf16.gmra.mxu1 %v4897_v27  ;;  %1655 = vmatpush1.bf16.msra.mxu0 %v4898_v29  ;;  %v5016_v27 = vld [vmem:[#allocation8 + $0x74] ss:$8 sps:$4 sm:$0xff]   ;;  %v5017_v33 = vld [vmem:[#allocation8 + $0x60] ss:$8 sps:$4 sm:$0xff]  }
  0xe6   : > { %1482 = vmatprep.mubr.bf16.mxu0 %v4907_v31  ;;  %1656 = vmatprep.subr.bf16.mxu0 %v4906_v30  ;;  %v4996_v29 = vld [vmem:[%s5715_s13 + $0xb8] ss:$28 sps:$4 sm:$0xff]   ;;  %v4997_v30 = vld [vmem:[%s5715_s13 + $0xc0] ss:$28 sps:$4 sm:$0xff]  }
  0xe7   : > { %1595 = vmatprep.mubr.bf16.mxu1 %v4909_v32  ;;  %1768 = vmatpush1.bf16.msra.mxu1 %v4931_v34  ;;  %v4998_v31 = vld [vmem:[%s5715_s13 + $0xf4] ss:$28 sps:$4 sm:$0xff]  }
  0xe8   : > { %1769 = vmatprep.subr.bf16.mxu1 %v4948_v36  ;;  %v5019_v32 = vld [vmem:[#allocation8 + $0x64] ss:$8 sps:$4 sm:$0xff]   ;;  %v5022_v34 = vld [vmem:[#allocation8 + $0x54] ss:$8 sps:$4 sm:$0xff]  }
  0xe9   : > { %1657 = vmatpush1.bf16.msra.mxu0 %v4904_v35  ;;  %v5020_v35 = vld [vmem:[#allocation8 + $0x50] ss:$8 sps:$4 sm:$0xff]  }
  0xea   : > { %1658 = vmatprep.subr.bf16.mxu0 %v4915_v37  ;;  %v5000_v36 = vld [vmem:[%s5715_s13 + $0xf0] ss:$28 sps:$4 sm:$0xff]   ;;  %v5001_v37 = vld [vmem:[%s5715_s13 + $0xf8] ss:$28 sps:$4 sm:$0xff]  }
  0xeb   : > { %1770 = vmatpush1.bf16.msra.mxu1 %v4946_v44  ;;  %v5005_v44 = vld [vmem:[%s5715_s13 + $0x130] ss:$28 sps:$4 sm:$0xff]  }
  0xec   : > { %1483 = vmatmul.mubr.bf16.gmra.mxu0 %v4911_v38  ;;  %1771 = vmatprep.subr.bf16.mxu1 %v4963_v45  ;;  %v5002_v38 = vld [vmem:[%s5715_s13 + $0x12c] ss:$28 sps:$4 sm:$0xff]   ;;  %v5006_v45 = vld [vmem:[%s5715_s13 + $0x164] ss:$28 sps:$4 sm:$0xff]  }
  0xed   : > { %1596 = vmatmul.mubr.bf16.gmra.mxu1 %v4912_v39  ;;  %1659 = vmatpush1.bf16.msra.mxu0 %v4913_v40  ;;  %v5025_v39 = vld [vmem:[#allocation8 + $0x44] ss:$8 sps:$4 sm:$0xff]   ;;  %v5023_v40 = vld [vmem:[#allocation8 + $0x40] ss:$8 sps:$4 sm:$0xff]  }
  0xee   : > { %1492 = vmatprep.mubr.bf16.mxu0 %v4922_v42  ;;  %1660 = vmatprep.subr.bf16.mxu0 %v4921_v41  ;;  %v5028_v41 = vld [vmem:[#allocation8 + $0x34] ss:$8 sps:$4 sm:$0xff]   ;;  %v5026_v42 = vld [vmem:[#allocation8 + $0x30] ss:$8 sps:$4 sm:$0xff]  }
  0xef   : > { %1605 = vmatprep.mubr.bf16.mxu1 %v4924_v43  ;;  %1772 = vmatpush1.bf16.msra.mxu1 %v4961_v50  ;;  %v5004_v43 = vld [vmem:[%s5715_s13 + $0x128] ss:$28 sps:$4 sm:$0xff]  }
  0xf0   : > { %1773 = vmatprep.subr.bf16.mxu1 %v4978_v55  ;;  %v5037_v50 = vld [vmem:[#allocation8 + $0x4] ss:$8 sps:$4 sm:$0xff]   ;;  %v5040_v55 = vld [vmem:[#allocation8 + $0xf4] ss:$8 sps:$4 sm:$0xff]  }
  0xf1   : > { %1661 = vmatpush1.bf16.msra.mxu0 %v4919_v46  ;;  %v5031_v46 = vld [vmem:[#allocation8 + $0x24] ss:$8 sps:$4 sm:$0xff]  }
  0xf2   : > { %1662 = vmatprep.subr.bf16.mxu0 %v4930_v48  ;;  %v5034_v48 = vld [vmem:[#allocation8 + $0x14] ss:$8 sps:$4 sm:$0xff]  }
  0xf3   : > { %1774 = vmatpush1.bf16.msra.mxu1 %v4976_v56  ;;  %v5038_v56 = vld [vmem:[#allocation8 + $0xf0] ss:$8 sps:$4 sm:$0xff]  }
  0xf4   : > { %1493 = vmatmul.mubr.bf16.gmra.mxu0 %v4926_v47  ;;  %v5029_v47 = vld [vmem:[#allocation8 + $0x20] ss:$8 sps:$4 sm:$0xff]  }
  0xf5   : > { %1606 = vmatmul.mubr.bf16.gmra.mxu1 %v4927_v49  ;;  %1663 = vmatpush2.bf16.msra.mxu0 %v4928_v51  ;;  %v5032_v49 = vld [vmem:[#allocation8 + $0x10] ss:$8 sps:$4 sm:$0xff]  }
  0xf6   : > { %1502 = vmatprep.mubr.bf16.mxu0 %v4937_v53  ;;  %1664 = vmatprep.subr.bf16.mxu0 %v4936_v52  ;;  %v5008_v51 = vld [vmem:[%s5715_s13 + $0x160] ss:$28 sps:$4 sm:$0xff]   ;;  %v5009_v52 = vld [vmem:[%s5715_s13 + $0x168] ss:$28 sps:$4 sm:$0xff]  }
  0xf7   : > { %1615 = vmatprep.mubr.bf16.mxu1 %v4939_v54  ;;  %v5035_v53 = vld [vmem:[#allocation8] ss:$8 sps:$4 sm:$0xff]   ;;  %v5010_v54 = vld [vmem:[%s5715_s13 + $0x19c] ss:$28 sps:$4 sm:$0xff]  }
  0xf9   : > { %1665 = vmatpush2.bf16.msra.mxu0 %v4934_v57  ;;  %v5043_v57 = vld [vmem:[#allocation8 + $0xe4] ss:$8 sps:$4 sm:$0xff]  }
  0xfa   : > { %1666 = vmatprep.subr.bf16.mxu0 %v4945_v60  ;;  %v5041_v60 = vld [vmem:[#allocation8 + $0xe0] ss:$8 sps:$4 sm:$0xff]  }
  0xfc   : > { %1503 = vmatmul.mubr.bf16.gmra.mxu0 %v4941_v58  ;;  %v5012_v58 = vld [vmem:[%s5715_s13 + $0x198] ss:$28 sps:$4 sm:$0xff]  }
  0xfd   : > { %1616 = vmatmul.mubr.bf16.gmra.mxu1 %v4942_v59  ;;  %1667 = vmatpush2.bf16.msra.mxu0 %v4943_v61  ;;  %v5013_v59 = vld [vmem:[%s5715_s13 + $0x1a0] ss:$28 sps:$4 sm:$0xff]  }
  0xfe   : > { %1512 = vmatprep.mubr.bf16.mxu0 %v4952_v63  ;;  %1668 = vmatprep.subr.bf16.mxu0 %v4951_v62  ;;  %v5046_v61 = vld [vmem:[#allocation8 + $0xd4] ss:$8 sps:$4 sm:$0xff]   ;;  %v5044_v62 = vld [vmem:[#allocation8 + $0xd0] ss:$8 sps:$4 sm:$0xff]   ;;  %v5049_v63 = vld [vmem:[#allocation8 + $0xc4] ss:$8 sps:$4 sm:$0xff]  }
  0xff   : > { %1625 = vmatprep.mubr.bf16.mxu1 %v4954_v0  ;;  %v5047_v0 = vld [vmem:[#allocation8 + $0xc0] ss:$8 sps:$4 sm:$0xff]  }
 0x101   : > { %1669 = vmatpush2.bf16.msra.mxu0 %v4949_v1  ;;  %v5052_v1 = vld [vmem:[#allocation8 + $0xb4] ss:$8 sps:$4 sm:$0xff]  }
 0x102   : > { %1670 = vmatprep.subr.bf16.mxu0 %v4960_v3  ;;  %v5055_v3 = vld [vmem:[#allocation8 + $0xa4] ss:$8 sps:$4 sm:$0xff]  }
 0x104   : > { %1513 = vmatmul.mubr.bf16.gmra.mxu0 %v4956_v2  ;;  %v5050_v2 = vld [vmem:[#allocation8 + $0xb0] ss:$8 sps:$4 sm:$0xff]  }
 0x105   : > { %1626 = vmatmul.mubr.bf16.gmra.mxu1 %v4957_v4  ;;  %1671 = vmatpush2.bf16.msra.mxu0 %v4958_v5  ;;  %v5053_v4 = vld [vmem:[#allocation8 + $0xa0] ss:$8 sps:$4 sm:$0xff]   ;;  %v5058_v5 = vld [vmem:[#allocation8 + $0x94] ss:$8 sps:$4 sm:$0xff]  }
 0x106   : > { %1522 = vmatprep.mubr.bf16.mxu0 %v4967_v6  ;;  %1672 = vmatprep.subr.bf16.mxu0 %v4966_v7  ;;  %v5056_v6 = vld [vmem:[#allocation8 + $0x90] ss:$8 sps:$4 sm:$0xff]   ;;  %v5061_v7 = vld [vmem:[#allocation8 + $0x84] ss:$8 sps:$4 sm:$0xff]  }
 0x107   : > { %1635 = vmatprep.mubr.bf16.mxu1 %v4969_v8  ;;  %v5059_v8 = vld [vmem:[#allocation8 + $0x80] ss:$8 sps:$4 sm:$0xff]  }
 0x109   : > { %1673 = vmatpush2.bf16.msra.mxu0 %v4964_v9  ;;  %v562_v9 = vlaneseq }
 0x10a   : > { %1674 = vmatprep.subr.bf16.mxu0 %v4975_v10 }
 0x10b   : > { %v563_v10 = vshrl.u32 %v562_v9, 7 }
 0x10c   : > { %1523 = vmatmul.mubr.bf16.gmra.mxu0 %v4971_v11 }
 0x10d   : > { %1636 = vmatmul.mubr.bf16.gmra.mxu1 %v4972_v12  ;;  %1675 = vmatpush2.bf16.msra.mxu0 %v4973_v13  ;;  %v5797_v11 = vsub.s32 0, %v563_v10  ;;  %v560_v12 = vld [vmem:[#allocation7] sm:$0x3]  ;;  %v5799_v13 = vsub.s32 1, %v563_v10 }
 0x10e   : > { %1678 = vmatprep.mubr.bf16.mxu0 %v4984_v14  ;;  %1676 = vmatprep.subr.bf16.mxu0 %v4981_v15 }
 0x10f   : > { %1791 = vmatprep.mubr.bf16.mxu1 %v5499_v18  ;;  %v5802_v14 = vrot.slane %v560_v12, %v5797_v11  ;;  %v5805_v15 = vrot.slane %v560_v12, %v5799_v13  ;;  %v5079_v12 = vld [vmem:[#allocation8 + $0x124] ss:$8 sps:$4 sm:$0xff]  }
 0x111   : > { %1677 = vmatpush2.bf16.msra.mxu0 %v4979_v16 }
 0x112   : > { %2188 = vmatprep.subr.bf16.mxu0 %v5016_v27 }
 0x114   : > { %1679 = vmatmul.mubr.bf16.vlgmr.msra.gmra.mxu0 %v4982_v17 }
 0x115   : > { %1792 = vmatmul.mubr.bf16.vlgmr.msra.gmra.mxu1 %v4985_v19  ;;  %1688 = vmatprep.mubr.bf16.mxu0 %v4986_v20 }
 0x116   : > { %1801 = vmatprep.mubr.bf16.mxu1 %v5499_v18  ;;  %2189 = vmatpush1.bf16.msra.mxu0 %v5014_v28 }
 0x117   : > { %2190 = vmatprep.subr.bf16.mxu0 %v5019_v32 }
 0x11a   : > { %2191 = vmatpush1.bf16.msra.mxu0 %v5017_v33 }
 0x11b   : > { %2192 = vmatprep.subr.bf16.mxu0 %v5022_v34 }
 0x11c   : > { %1689 = vmatmul.mubr.bf16.gmra.mxu0 %v4988_v21 }
 0x11d   : > { %1802 = vmatmul.mubr.bf16.gmra.mxu1 %v4989_v22  ;;  %1698 = vmatprep.mubr.bf16.mxu0 %v4990_v23 }
 0x11e   : > { %1811 = vmatprep.mubr.bf16.mxu1 %v5499_v18  ;;  %2193 = vmatpush1.bf16.msra.mxu0 %v5020_v35 }
 0x11f   : > { %2194 = vmatprep.subr.bf16.mxu0 %v5025_v39 }
 0x122   : > { %2195 = vmatpush1.bf16.msra.mxu0 %v5023_v40 }
 0x123   : > { %2196 = vmatprep.subr.bf16.mxu0 %v5028_v41  ;;  %v5067_v41 = vld [vmem:[#allocation8 + $0x164] ss:$8 sps:$4 sm:$0xff]  }
 0x124   : > { %1699 = vmatmul.mubr.bf16.gmra.mxu0 %v4992_v24 }
 0x125   : > { %1812 = vmatmul.mubr.bf16.gmra.mxu1 %v4993_v25  ;;  %1708 = vmatprep.mubr.bf16.mxu0 %v4994_v26 }
 0x126   : > { %1821 = vmatprep.mubr.bf16.mxu1 %v5499_v18  ;;  %2197 = vmatpush1.bf16.msra.mxu0 %v5026_v42 }
 0x127   : > { %2198 = vmatprep.subr.bf16.mxu0 %v5031_v46  ;;  %v5065_v46 = vld [vmem:[#allocation8 + $0x160] ss:$8 sps:$4 sm:$0xff]  }
 0x12a   : > { %2199 = vmatpush1.bf16.msra.mxu0 %v5029_v47 }
 0x12b   : > { %2200 = vmatprep.subr.bf16.mxu0 %v5034_v48  ;;  %v5070_v48 = vld [vmem:[#allocation8 + $0x154] ss:$8 sps:$4 sm:$0xff]  }
 0x12c   : > { %1709 = vmatmul.mubr.bf16.gmra.mxu0 %v4996_v29 }
 0x12d   : > { %1822 = vmatmul.mubr.bf16.gmra.mxu1 %v4997_v30  ;;  %1718 = vmatprep.mubr.bf16.mxu0 %v4998_v31 }
 0x12e   : > { %1831 = vmatprep.mubr.bf16.mxu1 %v5499_v18  ;;  %2201 = vmatpush1.bf16.msra.mxu0 %v5032_v49 }
 0x12f   : > { %2202 = vmatprep.subr.bf16.mxu0 %v5037_v50 }
 0x132   : > { %2203 = vmatpush1.bf16.msra.mxu0 %v5035_v53 }
 0x133   : > { %2204 = vmatprep.subr.bf16.mxu0 %v5040_v55 }
 0x134   : > { %1719 = vmatmul.mubr.bf16.gmra.mxu0 %v5000_v36 }
 0x135   : > { %1832 = vmatmul.mubr.bf16.gmra.mxu1 %v5001_v37  ;;  %1728 = vmatprep.mubr.bf16.mxu0 %v5002_v38  ;;  %v5062_v37 = vld [vmem:[#allocation8 + $0x170] ss:$8 sps:$4 sm:$0xff]   ;;  %v5064_v38 = vld [vmem:[#allocation8 + $0x174] ss:$8 sps:$4 sm:$0xff]  }
 0x136   : > { %1841 = vmatprep.mubr.bf16.mxu1 %v5499_v18  ;;  %2205 = vmatpush2.bf16.msra.mxu0 %v5038_v56 }
 0x137   : > { %2206 = vmatprep.subr.bf16.mxu0 %v5043_v57  ;;  %2651 = vmatprep.subr.bf16.mxu1 %v5064_v38  ;;  %v5073_v57 = vld [vmem:[#allocation8 + $0x144] ss:$8 sps:$4 sm:$0xff]  }
 0x138   : > { %2652 = vmatpush1.bf16.msra.mxu1 %v5062_v37 }
 0x139   : > { %2653 = vmatprep.subr.bf16.mxu1 %v5067_v41 }
 0x13a   : > { %2207 = vmatpush2.bf16.msra.mxu0 %v5041_v60 }
 0x13b   : > { %2208 = vmatprep.subr.bf16.mxu0 %v5046_v61 }
 0x13c   : > { %1729 = vmatmul.mubr.bf16.gmra.mxu0 %v5004_v43  ;;  %2654 = vmatpush1.bf16.msra.mxu1 %v5065_v46 }
 0x13d   : > { %1842 = vmatmul.mubr.bf16.gmra.mxu1 %v5005_v44  ;;  %1738 = vmatprep.mubr.bf16.mxu0 %v5006_v45 }
 0x13e   : > { %1851 = vmatprep.mubr.bf16.mxu1 %v5499_v18  ;;  %2209 = vmatpush2.bf16.msra.mxu0 %v5044_v62 }
 0x13f   : > { %2210 = vmatprep.subr.bf16.mxu0 %v5049_v63  ;;  %2655 = vmatprep.subr.bf16.mxu1 %v5070_v48 }
 0x142   : > { %2211 = vmatpush2.bf16.msra.mxu0 %v5047_v0  ;;  %v5071_v0 = vld [vmem:[#allocation8 + $0x140] ss:$8 sps:$4 sm:$0xff]  }
 0x143   : > { %2212 = vmatprep.subr.bf16.mxu0 %v5052_v1 }
 0x144   : > { %1739 = vmatmul.mubr.bf16.gmra.mxu0 %v5008_v51 }
 0x145   : > { %1852 = vmatmul.mubr.bf16.gmra.mxu1 %v5009_v52  ;;  %1748 = vmatprep.mubr.bf16.mxu0 %v5010_v54  ;;  %v5068_v54 = vld [vmem:[#allocation8 + $0x150] ss:$8 sps:$4 sm:$0xff]  }
 0x146   : > { %1861 = vmatprep.mubr.bf16.mxu1 %v5499_v18  ;;  %2213 = vmatpush2.bf16.msra.mxu0 %v5050_v2  ;;  %v5076_v2 = vld [vmem:[#allocation8 + $0x134] ss:$8 sps:$4 sm:$0xff]  }
 0x147   : > { %2214 = vmatprep.subr.bf16.mxu0 %v5055_v3  ;;  %2656 = vmatpush1.bf16.msra.mxu1 %v5068_v54 }
 0x148   : > { %2657 = vmatprep.subr.bf16.mxu1 %v5073_v57 }
 0x14a   : > { %2215 = vmatpush2.bf16.msra.mxu0 %v5053_v4 }
 0x14b   : > { %2216 = vmatprep.subr.bf16.mxu0 %v5058_v5  ;;  %2658 = vmatpush1.bf16.msra.mxu1 %v5071_v0 }
 0x14c   : > { %1749 = vmatmul.mubr.bf16.gmra.mxu0 %v5012_v58  ;;  %2659 = vmatprep.subr.bf16.mxu1 %v5076_v2  ;;  %v5091_v2 = vld [vmem:[#allocation8 + $0x1e4] ss:$8 sps:$4 sm:$0xff]  }
 0x14d   : > { %1862 = vmatmul.mubr.bf16.gmra.mxu1 %v5013_v59 }
 0x14e   : > { %2217 = vmatpush2.bf16.msra.mxu0 %v5056_v6 }
 0x14f   : > { %2218 = vmatprep.subr.bf16.mxu0 %v5061_v7 }
 0x152   : > { %2219 = vmatpush2.bf16.msra.mxu0 %v5059_v8  ;;  %v5074_v8 = vld [vmem:[#allocation8 + $0x130] ss:$8 sps:$4 sm:$0xff]  }
 0x153   : > { %2660 = vmatpush1.bf16.msra.mxu1 %v5074_v8 }
 0x154   : > { %2661 = vmatprep.subr.bf16.mxu1 %v5079_v12 }
 0x194   : > { %v1454_v16 = vpop.f32.mrf.mxu0 }
 0x195   : > { %v1567_v17 = vpop.f32.mrf.mxu1  ;;  %v1455_v18 = vadd.f32 %v1454_v16, %v5802_v14 }
 0x196   : > { %v1456_v19 = vpop.f32.mrf.mxu0 }
 0x197   : > { %v1569_v20 = vpop.f32.mrf.mxu1  ;;  %v5808_v21 = vadd.f32 %v1567_v17, %v1455_v18  ;;  %v1457_v22 = vadd.f32 %v1456_v19, %v5805_v15 }
 0x198   : > { %v1458_v23 = vpop.f32.mrf.mxu0 }
 0x199   : > { %v1571_v24 = vpop.f32.mrf.mxu1  ;;  %v5811_v25 = vadd.f32 %v1569_v20, %v1457_v22  ;;  %v1459_v26 = vadd.f32 %v1458_v23, %v5802_v14  ;;  %v5077_v23 = vld [vmem:[#allocation8 + $0x120] ss:$8 sps:$4 sm:$0xff]  }
 0x19a   : > { %v5814_v27 = vpop.f32.mrf.mxu0  ;;  %2662 = vmatpush1.bf16.msra.mxu1 %v5077_v23 }
 0x19b   : > { %v5816_v28 = vpop.f32.mrf.mxu1  ;;  %v5818_v29 = vadd.f32 %v1571_v24, %v1459_v26  ;;  %v5082_v26 = vld [vmem:[#allocation8 + $0x114] ss:$8 sps:$4 sm:$0xff]  }
 0x19c   : > { %v1464_v30 = vpop.f32.mrf.mxu0  ;;  %2663 = vmatprep.subr.bf16.mxu1 %v5082_v26 }
 0x19d   : > { %v1577_v31 = vpop.f32.mrf.mxu1  ;;  %v1465_v32 = vadd.f32 %v1464_v30, %v5802_v14 }
 0x19e   : > { %v1466_v33 = vpop.f32.mrf.mxu0 }
 0x19f   : > { %v1579_v34 = vpop.f32.mrf.mxu1  ;;  %v5821_v35 = vadd.f32 %v1577_v31, %v1465_v32  ;;  %v1467_v36 = vadd.f32 %v1466_v33, %v5805_v15 }
 0x1a0   : > { %v1468_v39 = vpop.f32.mrf.mxu0 }
 0x1a1   : > { %v1581_v40 = vpop.f32.mrf.mxu1  ;;  %v5824_v42 = vadd.f32 %v1579_v34, %v1467_v36  ;;  %v1469_v43 = vadd.f32 %v1468_v39, %v5802_v14  ;;  %v5080_v36 = vld [vmem:[#allocation8 + $0x110] ss:$8 sps:$4 sm:$0xff]   ;;  %v5085_v39 = vld [vmem:[#allocation8 + $0x104] ss:$8 sps:$4 sm:$0xff]  }
 0x1a2   : > { %v5827_v44 = vpop.f32.mrf.mxu0  ;;  %2664 = vmatpush1.bf16.msra.mxu1 %v5080_v36 }
 0x1a3   : > { %v5829_v45 = vpop.f32.mrf.mxu1  ;;  %v5831_v47 = vadd.f32 %v1581_v40, %v1469_v43  ;;  %2665 = vmatprep.subr.bf16.mxu1 %v5085_v39 }
 0x1a4   : > { %v1474_v49 = vpop.f32.mrf.mxu0 }
 0x1a5   : > { %v1587_v50 = vpop.f32.mrf.mxu1  ;;  %v1475_v51 = vadd.f32 %v1474_v49, %v5802_v14 }
 0x1a6   : > { %v1476_v52 = vpop.f32.mrf.mxu0 }
 0x1a7   : > { %v1589_v53 = vpop.f32.mrf.mxu1  ;;  %v5834_v55 = vadd.f32 %v1587_v50, %v1475_v51  ;;  %v1477_v56 = vadd.f32 %v1476_v52, %v5805_v15  ;;  %v5083_v50 = vld [vmem:[#allocation8 + $0x100] ss:$8 sps:$4 sm:$0xff]   ;;  %v5088_v52 = vld [vmem:[#allocation8 + $0x1f4] ss:$8 sps:$4 sm:$0xff]  }
 0x1a8   : > { %v1478_v58 = vpop.f32.mrf.mxu0  ;;  %2666 = vmatpush1.bf16.msra.mxu1 %v5083_v50  ;;  %v5095_v50 = vld [vmem:[#allocation8 + $0x1c0] ss:$8 sps:$4 sm:$0xff]  }
 0x1a9   : > { %v1591_v59 = vpop.f32.mrf.mxu1  ;;  %v5837_v60 = vadd.f32 %v1589_v53, %v1477_v56  ;;  %v1479_v61 = vadd.f32 %v1478_v58, %v5802_v14  ;;  %2667 = vmatprep.subr.bf16.mxu1 %v5088_v52 }
 0x1aa   : > { %v5840_v62 = vpop.f32.mrf.mxu0 }
 0x1ab   : > { %v5842_v63 = vpop.f32.mrf.mxu1  ;;  %v5844_v1 = vadd.f32 %v1591_v59, %v1479_v61  ;;  %v5086_v59 = vld [vmem:[#allocation8 + $0x1f0] ss:$8 sps:$4 sm:$0xff]  }
 0x1ac   : > { %v1484_v3 = vpop.f32.mrf.mxu0  ;;  %2668 = vmatpush2.bf16.msra.mxu1 %v5086_v59 }
 0x1ad   : > { %v1597_v4 = vpop.f32.mrf.mxu1  ;;  %v1485_v5 = vadd.f32 %v1484_v3, %v5802_v14  ;;  %2669 = vmatprep.subr.bf16.mxu1 %v5091_v2 }
 0x1ae   : > { %v1486_v6 = vpop.f32.mrf.mxu0 }
 0x1af   : > { %v1599_v7 = vpop.f32.mrf.mxu1  ;;  %v5847_v9 = vadd.f32 %v1597_v4, %v1485_v5  ;;  %v1487_v10 = vadd.f32 %v1486_v6, %v5805_v15 }
 0x1b0   : > { %v1488_v16 = vpop.f32.mrf.mxu0 }
 0x1b1   : > { %v1601_v17 = vpop.f32.mrf.mxu1  ;;  %v5850_v18 = vadd.f32 %v1599_v7, %v1487_v10  ;;  %v1489_v19 = vadd.f32 %v1488_v16, %v5802_v14  ;;  %v5089_v10 = vld [vmem:[#allocation8 + $0x1e0] ss:$8 sps:$4 sm:$0xff]   ;;  %v5094_v16 = vld [vmem:[#allocation8 + $0x1d4] ss:$8 sps:$4 sm:$0xff]  }
 0x1b2   : > { %v5853_v20 = vpop.f32.mrf.mxu0  ;;  %2670 = vmatpush2.bf16.msra.mxu1 %v5089_v10 }
 0x1b3   : > { %v5855_v22 = vpop.f32.mrf.mxu1  ;;  %v5857_v24 = vadd.f32 %v1601_v17, %v1489_v19  ;;  %2671 = vmatprep.subr.bf16.mxu1 %v5094_v16 }
 0x1b4   : > { %v1494_v30 = vpop.f32.mrf.mxu0 }
 0x1b5   : > { %v1607_v31 = vpop.f32.mrf.mxu1  ;;  %v1495_v32 = vadd.f32 %v1494_v30, %v5802_v14 }
 0x1b6   : > { %v1496_v33 = vpop.f32.mrf.mxu0 }
 0x1b7   : > { %v1609_v34 = vpop.f32.mrf.mxu1  ;;  %v5860_v37 = vadd.f32 %v1607_v31, %v1495_v32  ;;  %v1497_v38 = vadd.f32 %v1496_v33, %v5805_v15  ;;  %v5092_v31 = vld [vmem:[#allocation8 + $0x1d0] ss:$8 sps:$4 sm:$0xff]  }
 0x1b8   : > { %v1498_v40 = vpop.f32.mrf.mxu0  ;;  %2672 = vmatpush2.bf16.msra.mxu1 %v5092_v31 }
 0x1b9   : > { %v1611_v41 = vpop.f32.mrf.mxu1  ;;  %v5863_v43 = vadd.f32 %v1609_v34, %v1497_v38  ;;  %v1499_v46 = vadd.f32 %v1498_v40, %v5802_v14  ;;  %v5097_v34 = vld [vmem:[#allocation8 + $0x1c4] ss:$8 sps:$4 sm:$0xff]  }
 0x1ba   : > { %v5866_v48 = vpop.f32.mrf.mxu0  ;;  %2673 = vmatprep.subr.bf16.mxu1 %v5097_v34 }
 0x1bb   : > { %v5868_v49 = vpop.f32.mrf.mxu1  ;;  %v5870_v51 = vadd.f32 %v1611_v41, %v1499_v46 }
 0x1bc   : > { %v1504_v53 = vpop.f32.mrf.mxu0  ;;  %2674 = vmatpush2.bf16.msra.mxu1 %v5095_v50 }
 0x1bd   : > { %v1617_v54 = vpop.f32.mrf.mxu1  ;;  %v1505_v56 = vadd.f32 %v1504_v53, %v5802_v14 }
 0x1be   : > { %v1506_v57 = vpop.f32.mrf.mxu0 }
 0x1bf   : > { %v1619_v58 = vpop.f32.mrf.mxu1  ;;  %v5873_v61 = vadd.f32 %v1617_v54, %v1505_v56  ;;  %v1507_v0 = vadd.f32 %v1506_v57, %v5805_v15 }
 0x1c0   : > { %v1508_v3 = vpop.f32.mrf.mxu0 }
 0x1c1   : > { %v1621_v4 = vpop.f32.mrf.mxu1  ;;  %v5876_v5 = vadd.f32 %v1619_v58, %v1507_v0  ;;  %v1509_v6 = vadd.f32 %v1508_v3, %v5802_v14 }
 0x1c2   : > { %v5879_v7 = vpop.f32.mrf.mxu0 }
 0x1c3   : > { %v5881_v8 = vpop.f32.mrf.mxu1  ;;  %v5883_v12 = vadd.f32 %v1621_v4, %v1509_v6 }
 0x1c4   : > { %v1514_v17 = vpop.f32.mrf.mxu0 }
 0x1c5   : > { %v1627_v19 = vpop.f32.mrf.mxu1  ;;  %v1515_v23 = vadd.f32 %v1514_v17, %v5802_v14 }
 0x1c6   : > { %v1516_v26 = vpop.f32.mrf.mxu0 }
 0x1c7   : > { %v1629_v30 = vpop.f32.mrf.mxu1  ;;  %v5886_v32 = vadd.f32 %v1627_v19, %v1515_v23  ;;  %v1517_v33 = vadd.f32 %v1516_v26, %v5805_v15  ;;  %v1461_v26 = vadd.f32 %v5814_v27, %v5805_v15 }
 0x1c8   : > { %v1518_v36 = vpop.f32.mrf.mxu0 }
 0x1c9   : > { %v1631_v38 = vpop.f32.mrf.mxu1  ;;  %v5889_v39 = vadd.f32 %v1629_v30, %v1517_v33  ;;  %v1519_v40 = vadd.f32 %v1518_v36, %v5802_v14 }
 0x1ca   : > { %v5892_v41 = vpop.f32.mrf.mxu0 }
 0x1cb   : > { %v5894_v46 = vpop.f32.mrf.mxu1  ;;  %v5896_v52 = vadd.f32 %v1631_v38, %v1519_v40  ;;  %v1574_v40 = vadd.f32 %v5816_v28, %v1461_v26 }
 0x1cc   : > { %v1524_v53 = vpop.f32.mrf.mxu0 }
 0x1cd   : > { %v1637_v54 = vpop.f32.mrf.mxu1  ;;  %v1525_v56 = vadd.f32 %v1524_v53, %v5802_v14 }
 0x1ce   : > { %v1526_v57 = vpop.f32.mrf.mxu0 }
 0x1cf   : > { %v1639_v58 = vpop.f32.mrf.mxu1  ;;  %v5899_v59 = vadd.f32 %v1637_v54, %v1525_v56  ;;  %v1527_v0 = vadd.f32 %v1526_v57, %v5805_v15 }
 0x1d0   : > { %v1528_v2 = vpop.f32.mrf.mxu0 }
 0x1d1   : > { %v1641_v3 = vpop.f32.mrf.mxu1  ;;  %v5902_v4 = vadd.f32 %v1639_v58, %v1527_v0  ;;  %v1529_v6 = vadd.f32 %v1528_v2, %v5802_v14  ;;  %v1471_v2 = vadd.f32 %v5827_v44, %v5805_v15 }
 0x1d2   : > { %v5905_v10 = vpop.f32.mrf.mxu0 }
 0x1d3   : > { %v5907_v16 = vpop.f32.mrf.mxu1  ;;  %v5909_v17 = vadd.f32 %v1641_v3, %v1529_v6 }
 0x1d4   : > { %v1680_v19 = vpop.f32.mrf.mxu0 }
 0x1d5   : > { %v1793_v23 = vpop.f32.mrf.mxu1  ;;  %v1681_v33 = vadd.f32 %v1680_v19, %v5808_v21 }
 0x1d6   : > { %v1682_v30 = vpop.f32.mrf.mxu0 }
 0x1d7   : > { %v1795_v31 = vpop.f32.mrf.mxu1  ;;  %v1683_v34 = vadd.f32 %v1682_v30, %v5811_v25  ;;  %v1794_v54 = vadd.f32 %v1793_v23, %v1681_v33  ;;  %v1584_v33 = vadd.f32 %v5829_v45, %v1471_v2 }
 0x1d8   : > { %v1684_v36 = vpop.f32.mrf.mxu0 }
 0x1d9   : > { %v1797_v38 = vpop.f32.mrf.mxu1  ;;  %v1685_v14 = vadd.f32 %v1684_v36, %v5818_v29  ;;  %v1796_v56 = vadd.f32 %v1795_v31, %v1683_v34  ;;  %v1904_v19 = vmul.f32 0.01, %v1794_v54  ;;  %vm1872_vm3 = vcmp.gt.f32.partialorder %v1794_v54, 0.0 }
 0x1da   : > { %v1686_v50 = vpop.f32.mrf.mxu0 }
 0x1db   : > { %v1799_v53 = vpop.f32.mrf.mxu1  ;;  %v1798_v57 = vadd.f32 %v1797_v38, %v1685_v14  ;;  %v1687_v58 = vadd.f32 %v1686_v50, %v1574_v40  ;;  %v1905_v30 = vmul.f32 0.01, %v1796_v56  ;;  %vm1873_vm1 = vcmp.gt.f32.partialorder %v1796_v56, 0.0 }
 0x1dc   : > { %v1690_v0 = vpop.f32.mrf.mxu0 }
 0x1dd   : > { %v1803_v27 = vpop.f32.mrf.mxu1  ;;  %v1906_v21 = vmul.f32 0.01, %v1798_v57  ;;  %v1800_v3 = vadd.f32 %v1799_v53, %v1687_v58  ;;  %vm1874_vm0 = vcmp.gt.f32.partialorder %v1798_v57, 0.0  ;;  %v1691_v23 = vadd.f32 %v1690_v0, %v5821_v35 }
 0x1de   : > { %v1692_v25 = vpop.f32.mrf.mxu0  ;;  %v5928_v53 = vsel %vm1873_vm1, %v1796_v56, %v1905_v30  ;;  %v5930_v35 = vsel %vm1872_vm3, %v1794_v54, %v1904_v19 }
 0x1df   : > { %v1805_v6 = vpop.f32.mrf.mxu1  ;;  %v1693_v28 = vadd.f32 %v1692_v25, %v5824_v42  ;;  %vm1875_vm2 = vcmp.gt.f32.partialorder %v1800_v3, 0.0  ;;  %v1907_v29 = vmul.f32 0.01, %v1800_v3  ;;  %v5923_v34 = vsel %vm1874_vm0, %v1798_v57, %v1906_v21 }
 0x1e0   : > { %v1694_v26 = vpop.f32.mrf.mxu0  ;;  %v1804_v58 = vadd.f32 %v1803_v27, %v1691_v23  ;;  %v1481_v57 = vadd.f32 %v5840_v62, %v5805_v15  ;;  %v1968_v2 = vpack.c.bf16 %v5923_v34, %v5930_v35 }
 0x1e1   : > { %v1807_v31 = vpop.f32.mrf.mxu1  ;;  %v1695_v44 = vadd.f32 %v1694_v26, %v5831_v47  ;;  %v1806_v36 = vadd.f32 %v1805_v6, %v1693_v28  ;;  %v5925_v40 = vsel %vm1875_vm2, %v1800_v3, %v1907_v29 }
 0x1e2   : > { %v1696_v38 = vpop.f32.mrf.mxu0  ;;  %v1969_v47 = vpack.c.bf16 %v5925_v40, %v5928_v53  ;;  %v1908_v19 = vmul.f32 0.01, %v1804_v58  ;;  %v1594_v29 = vadd.f32 %v5842_v63, %v1481_v57  ;;  %vm1876_vm7 = vcmp.gt.f32.partialorder %v1804_v58, 0.0 }
 0x1e3   : > { %v1809_v14 = vpop.f32.mrf.mxu1  ;;  %v1808_v42 = vadd.f32 %v1807_v31, %v1695_v44  ;;  %v1697_v50 = vadd.f32 %v1696_v38, %v1584_v33  ;;  %v1909_v3 = vmul.f32 0.01, %v1806_v36  ;;  %vm1877_vm6 = vcmp.gt.f32.partialorder %v1806_v36, 0.0 }
 0x1e4   : > { %v1700_v0 = vpop.f32.mrf.mxu0  ;;  %2220 = vmatprep.mubr.bf16.mxu0 %v1969_v47  ;;  %v5951_v57 = vsel %vm1876_vm7, %v1804_v58, %v1908_v19 }
 0x1e5   : > { %v1813_v45 = vpop.f32.mrf.mxu1  ;;  %v1810_v21 = vadd.f32 %v1809_v14, %v1697_v50  ;;  %v1910_v25 = vmul.f32 0.01, %v1808_v42  ;;  %vm1878_vm4 = vcmp.gt.f32.partialorder %v1808_v42, 0.0  ;;  %2221 = vmatmul.mubr.bf16.vlgmr.msra.gmra.mxu0 %v1968_v2  ;;  %v1701_v30 = vadd.f32 %v1700_v0, %v5834_v55 }
 0x1e6   : > { %v1702_v56 = vpop.f32.mrf.mxu0  ;;  %v5947_v50 = vsel %vm1877_vm6, %v1806_v36, %v1909_v3 }
 0x1e7   : > { %v1815_v6 = vpop.f32.mrf.mxu1  ;;  %vm1879_vm5 = vcmp.gt.f32.partialorder %v1810_v21, 0.0  ;;  %v1911_v54 = vmul.f32 0.01, %v1810_v21  ;;  %v1703_v27 = vadd.f32 %v1702_v56, %v5837_v60  ;;  %v5945_v38 = vsel %vm1878_vm4, %v1808_v42, %v1910_v25 }
 0x1e8   : > { %v1704_v62 = vpop.f32.mrf.mxu0  ;;  %v1814_v55 = vadd.f32 %v1813_v45, %v1701_v30  ;;  %v1970_v42 = vpack.c.bf16 %v5945_v38, %v5951_v57 }
 0x1e9   : > { %v1817_v28 = vpop.f32.mrf.mxu1  ;;  %v1705_v23 = vadd.f32 %v1704_v62, %v5844_v1  ;;  %v1816_v26 = vadd.f32 %v1815_v6, %v1703_v27  ;;  %v5942_v44 = vsel %vm1879_vm5, %v1810_v21, %v1911_v54  ;;  %v1491_v1 = vadd.f32 %v5853_v20, %v5805_v15 }
 0x1ea   : > { %v1706_v31 = vpop.f32.mrf.mxu0  ;;  %v1971_v63 = vpack.c.bf16 %v5942_v44, %v5947_v50  ;;  %v1912_v58 = vmul.f32 0.01, %v1814_v55  ;;  %vm1880_vm11 = vcmp.gt.f32.partialorder %v1814_v55, 0.0 }
 0x1eb   : > { %v1819_v33 = vpop.f32.mrf.mxu1  ;;  %v1818_v60 = vadd.f32 %v1817_v28, %v1705_v23  ;;  %v1707_v14 = vadd.f32 %v1706_v31, %v1594_v29  ;;  %v1913_v21 = vmul.f32 0.01, %v1816_v26  ;;  %vm1881_vm10 = vcmp.gt.f32.partialorder %v1816_v26, 0.0 }
 0x1ec   : > { %v1710_v0 = vpop.f32.mrf.mxu0  ;;  %2230 = vmatprep.mubr.bf16.mxu0 %v1971_v63  ;;  %v1604_v27 = vadd.f32 %v5855_v22, %v1491_v1  ;;  %v5970_v63 = vsel %vm1880_vm11, %v1814_v55, %v1912_v58 }
 0x1ed   : > { %v1823_v47 = vpop.f32.mrf.mxu1  ;;  %v1820_v2 = vadd.f32 %v1819_v33, %v1707_v14  ;;  %v1914_v25 = vmul.f32 0.01, %v1818_v60  ;;  %vm1882_vm8 = vcmp.gt.f32.partialorder %v1818_v60, 0.0  ;;  %2231 = vmatmul.mubr.bf16.gmra.mxu0 %v1970_v42  ;;  %v1711_v6 = vadd.f32 %v1710_v0, %v5847_v9 }
 0x1ee   : > { %v1712_v36 = vpop.f32.mrf.mxu0  ;;  %v5966_v33 = vsel %vm1881_vm10, %v1816_v26, %v1913_v21 }
 0x1ef   : > { %v1825_v3 = vpop.f32.mrf.mxu1  ;;  %vm1883_vm9 = vcmp.gt.f32.partialorder %v1820_v2, 0.0  ;;  %v1915_v45 = vmul.f32 0.01, %v1820_v2  ;;  %v1713_v56 = vadd.f32 %v1712_v36, %v5850_v18  ;;  %v5964_v23 = vsel %vm1882_vm8, %v1818_v60, %v1914_v25 }
 0x1f0   : > { %v1714_v20 = vpop.f32.mrf.mxu0  ;;  %v1824_v9 = vadd.f32 %v1823_v47, %v1711_v6  ;;  %v1972_v60 = vpack.c.bf16 %v5964_v23, %v5970_v63 }
 0x1f1   : > { %v1827_v54 = vpop.f32.mrf.mxu1  ;;  %v1715_v19 = vadd.f32 %v1714_v20, %v5857_v24  ;;  %v1826_v30 = vadd.f32 %v1825_v3, %v1713_v56  ;;  %v5961_v29 = vsel %vm1883_vm9, %v1820_v2, %v1915_v45  ;;  %v1501_v24 = vadd.f32 %v5866_v48, %v5805_v15 }
 0x1f2   : > { %v1716_v62 = vpop.f32.mrf.mxu0  ;;  %v1973_v22 = vpack.c.bf16 %v5961_v29, %v5966_v33  ;;  %v1916_v55 = vmul.f32 0.01, %v1824_v9  ;;  %vm1884_vm15 = vcmp.gt.f32.partialorder %v1824_v9, 0.0 }
 0x1f3   : > { %v1829_v28 = vpop.f32.mrf.mxu1  ;;  %v1828_v18 = vadd.f32 %v1827_v54, %v1715_v19  ;;  %v1717_v31 = vadd.f32 %v1716_v62, %v1604_v27  ;;  %v1917_v2 = vmul.f32 0.01, %v1826_v30  ;;  %vm1885_vm14 = vcmp.gt.f32.partialorder %v1826_v30, 0.0 }
 0x1f4   : > { %v1720_v14 = vpop.f32.mrf.mxu0  ;;  %2240 = vmatprep.mubr.bf16.mxu0 %v1973_v22  ;;  %v1614_v45 = vadd.f32 %v5868_v49, %v1501_v24 }
 0x1f5   : > { %v1833_v0 = vpop.f32.mrf.mxu1  ;;  %v1830_v1 = vadd.f32 %v1829_v28, %v1717_v31  ;;  %v1918_v42 = vmul.f32 0.01, %v1828_v18  ;;  %vm1886_vm12 = vcmp.gt.f32.partialorder %v1828_v18, 0.0  ;;  %2241 = vmatmul.mubr.bf16.gmra.mxu0 %v1972_v60  ;;  %v1721_v36 = vadd.f32 %v1720_v14, %v5860_v37 }
 0x1f6   : > { %v1722_v26 = vpop.f32.mrf.mxu0  ;;  %v5985_v62 = vsel %vm1885_vm14, %v1826_v30, %v1917_v2  ;;  %v5989_v14 = vsel %vm1884_vm15, %v1824_v9, %v1916_v55 }
 0x1f7   : > { %v1835_v21 = vpop.f32.mrf.mxu1  ;;  %vm1887_vm13 = vcmp.gt.f32.partialorder %v1830_v1, 0.0  ;;  %v1919_v47 = vmul.f32 0.01, %v1830_v1  ;;  %v1723_v25 = vadd.f32 %v1722_v26, %v5863_v43  ;;  %v5983_v27 = vsel %vm1886_vm12, %v1828_v18, %v1918_v42 }
 0x1f8   : > { %v1724_v48 = vpop.f32.mrf.mxu0  ;;  %v1834_v37 = vadd.f32 %v1833_v0, %v1721_v36  ;;  %v1974_v18 = vpack.c.bf16 %v5983_v27, %v5989_v14 }
 0x1f9   : > { %v1837_v3 = vpop.f32.mrf.mxu1  ;;  %v1725_v56 = vadd.f32 %v1724_v48, %v5870_v51  ;;  %v1836_v58 = vadd.f32 %v1835_v21, %v1723_v25  ;;  %v5980_v54 = vsel %vm1887_vm13, %v1830_v1, %v1919_v47  ;;  %v1511_v51 = vadd.f32 %v5879_v7, %v5805_v15 }
 0x1fa   : > { %v1726_v6 = vpop.f32.mrf.mxu0  ;;  %v1975_v49 = vpack.c.bf16 %v5980_v54, %v5985_v62  ;;  %v1920_v9 = vmul.f32 0.01, %v1834_v37  ;;  %vm1888_vm3 = vcmp.gt.f32.partialorder %v1834_v37, 0.0 }
 0x1fb   : > { %v1839_v20 = vpop.f32.mrf.mxu1  ;;  %v1838_v43 = vadd.f32 %v1837_v3, %v1725_v56  ;;  %v1727_v19 = vadd.f32 %v1726_v6, %v1614_v45  ;;  %v1921_v24 = vmul.f32 0.01, %v1836_v58  ;;  %vm1889_vm2 = vcmp.gt.f32.partialorder %v1836_v58, 0.0 }
 0x1fc   : > { %v1730_v28 = vpop.f32.mrf.mxu0  ;;  %2250 = vmatprep.mubr.bf16.mxu0 %v1975_v49  ;;  %v1624_v21 = vadd.f32 %v5881_v8, %v1511_v51 }
 0x1fd   : > { %v1843_v31 = vpop.f32.mrf.mxu1  ;;  %v1840_v22 = vadd.f32 %v1839_v20, %v1727_v19  ;;  %v1922_v1 = vmul.f32 0.01, %v1838_v43  ;;  %vm1890_vm0 = vcmp.gt.f32.partialorder %v1838_v43, 0.0  ;;  %2251 = vmatmul.mubr.bf16.gmra.mxu0 %v1974_v18  ;;  %v1731_v42 = vadd.f32 %v1730_v28, %v5873_v61 }
 0x1fe   : > { %v1732_v30 = vpop.f32.mrf.mxu0  ;;  %v6004_v56 = vsel %vm1889_vm2, %v1836_v58, %v1921_v24  ;;  %v6008_v19 = vsel %vm1888_vm3, %v1834_v37, %v1920_v9 }
 0x1ff   : > { %v1845_v60 = vpop.f32.mrf.mxu1  ;;  %vm1891_vm1 = vcmp.gt.f32.partialorder %v1840_v22, 0.0  ;;  %v1923_v0 = vmul.f32 0.01, %v1840_v22  ;;  %v1733_v2 = vadd.f32 %v1732_v30, %v5876_v5  ;;  %v6002_v3 = vsel %vm1890_vm0, %v1838_v43, %v1922_v1 }
 0x200   : > { %v1734_v7 = vpop.f32.mrf.mxu0  ;;  %v1844_v61 = vadd.f32 %v1843_v31, %v1731_v42  ;;  %v1976_v43 = vpack.c.bf16 %v6002_v3, %v6008_v19 }
 0x201   : > { %v1847_v26 = vpop.f32.mrf.mxu1  ;;  %v1735_v47 = vadd.f32 %v1734_v7, %v5883_v12  ;;  %v1846_v25 = vadd.f32 %v1845_v60, %v1733_v2  ;;  %v5999_v48 = vsel %vm1891_vm1, %v1840_v22, %v1923_v0  ;;  %v1521_v12 = vadd.f32 %v5892_v41, %v5805_v15 }
 0x202   : > { %v1736_v55 = vpop.f32.mrf.mxu0  ;;  %v1977_v8 = vpack.c.bf16 %v5999_v48, %v6004_v56  ;;  %v1924_v37 = vmul.f32 0.01, %v1844_v61  ;;  %vm1892_vm7 = vcmp.gt.f32.partialorder %v1844_v61, 0.0 }
 0x203   : > { %v1849_v36 = vpop.f32.mrf.mxu1  ;;  %v1848_v5 = vadd.f32 %v1847_v26, %v1735_v47  ;;  %v1737_v45 = vadd.f32 %v1736_v55, %v1624_v21  ;;  %v1925_v49 = vmul.f32 0.01, %v1846_v25  ;;  %vm1893_vm6 = vcmp.gt.f32.partialorder %v1846_v25, 0.0 }
 0x204   : > { %v1740_v6 = vpop.f32.mrf.mxu0  ;;  %2260 = vmatprep.mubr.bf16.mxu0 %v1977_v8  ;;  %v1634_v30 = vadd.f32 %v5894_v46, %v1521_v12 }
 0x205   : > { %v1853_v20 = vpop.f32.mrf.mxu1  ;;  %v1850_v28 = vadd.f32 %v1849_v36, %v1737_v45  ;;  %v1926_v51 = vmul.f32 0.01, %v1848_v5  ;;  %vm1894_vm4 = vcmp.gt.f32.partialorder %v1848_v5, 0.0  ;;  %2261 = vmatmul.mubr.bf16.gmra.mxu0 %v1976_v43  ;;  %v1741_v24 = vadd.f32 %v1740_v6, %v5886_v32 }
 0x206   : > { %v1742_v58 = vpop.f32.mrf.mxu0  ;;  %v6023_v21 = vsel %vm1893_vm6, %v1846_v25, %v1925_v49  ;;  %v6027_v36 = vsel %vm1892_vm7, %v1844_v61, %v1924_v37 }
 0x207   : > { %v1855_v22 = vpop.f32.mrf.mxu1  ;;  %vm1895_vm5 = vcmp.gt.f32.partialorder %v1850_v28, 0.0  ;;  %v1927_v31 = vmul.f32 0.01, %v1850_v28  ;;  %v1743_v18 = vadd.f32 %v1742_v58, %v5889_v39  ;;  %v6021_v7 = vsel %vm1894_vm4, %v1848_v5, %v1926_v51 }
 0x208   : > { %v1744_v41 = vpop.f32.mrf.mxu0  ;;  %v1854_v32 = vadd.f32 %v1853_v20, %v1741_v24  ;;  %v1978_v5 = vpack.c.bf16 %v6021_v7, %v6027_v36 }
 0x209   : > { %v1857_v1 = vpop.f32.mrf.mxu1  ;;  %v1745_v60 = vadd.f32 %v1744_v41, %v5896_v52  ;;  %v1856_v0 = vadd.f32 %v1855_v22, %v1743_v18  ;;  %v6018_v42 = vsel %vm1895_vm5, %v1850_v28, %v1927_v31  ;;  %v1531_v52 = vadd.f32 %v5905_v10, %v5805_v15 }
 0x20a   : > { %v1746_v2 = vpop.f32.mrf.mxu0  ;;  %v1979_v46 = vpack.c.bf16 %v6018_v42, %v6023_v21  ;;  %v1928_v61 = vmul.f32 0.01, %v1854_v32  ;;  %vm1896_vm11 = vcmp.gt.f32.partialorder %v1854_v32, 0.0 }
 0x20b   : > { %v1859_v9 = vpop.f32.mrf.mxu1  ;;  %v1858_v39 = vadd.f32 %v1857_v1, %v1745_v60  ;;  %v1747_v26 = vadd.f32 %v1746_v2, %v1634_v30  ;;  %v1929_v6 = vmul.f32 0.01, %v1856_v0  ;;  %vm1897_vm10 = vcmp.gt.f32.partialorder %v1856_v0, 0.0 }
 0x20c   : > { %v1750_v47 = vpop.f32.mrf.mxu0  ;;  %2270 = vmatprep.mubr.bf16.mxu0 %v1979_v46  ;;  %v1644_v49 = vadd.f32 %v5907_v16, %v1531_v52  ;;  %v6046_v16 = vsel %vm1896_vm11, %v1854_v32, %v1928_v61  ;;  %v5100_v52 = vld [vmem:[#allocation8 + $0x1b4] ss:$8 sps:$4 sm:$0xff]  }
 0x20d   : > { %v1863_v55 = vpop.f32.mrf.mxu1  ;;  %v1860_v45 = vadd.f32 %v1859_v9, %v1747_v26  ;;  %v1930_v8 = vmul.f32 0.01, %v1858_v39  ;;  %vm1898_vm8 = vcmp.gt.f32.partialorder %v1858_v39, 0.0  ;;  %2271 = vmatmul.mubr.bf16.gmra.mxu0 %v1978_v5  ;;  %v1751_v43 = vadd.f32 %v1750_v47, %v5899_v59  ;;  %2675 = vmatprep.subr.bf16.mxu1 %v5100_v52  ;;  %v5103_v5 = vld [vmem:[#allocation8 + $0x1a4] ss:$8 sps:$4 sm:$0xff]  }
 0x20e   : > { %v1752_v25 = vpop.f32.mrf.mxu0  ;;  %v6042_v24 = vsel %vm1897_vm10, %v1856_v0, %v1929_v6  ;;  %v5101_v6 = vld [vmem:[#allocation8 + $0x1a0] ss:$8 sps:$4 sm:$0xff]   ;;  %v5112_v61 = vld [vmem:[#allocation8 + $0x274] ss:$8 sps:$4 sm:$0xff]   ;;  %v5145_v52 = vld [vmem:[#allocation8 + $0x2c4] ss:$8 sps:$4 sm:$0xff]  }
 0x20f   : > { %v1865_v12 = vpop.f32.mrf.mxu1  ;;  %vm1899_vm9 = vcmp.gt.f32.partialorder %v1860_v45, 0.0  ;;  %v1931_v20 = vmul.f32 0.01, %v1860_v45  ;;  %v1753_v28 = vadd.f32 %v1752_v25, %v5902_v4  ;;  %v6040_v18 = vsel %vm1898_vm8, %v1858_v39, %v1930_v8  ;;  %v5106_v8 = vld [vmem:[#allocation8 + $0x194] ss:$8 sps:$4 sm:$0xff]   ;;  %3114 = vmatprep.subr.bf16.mxu0 %v5112_v61 }
 0x210   : > { %v1754_v15 = vpop.f32.mrf.mxu0  ;;  %v1864_v41 = vadd.f32 %v1863_v55, %v1751_v43  ;;  %v5104_v25 = vld [vmem:[#allocation8 + $0x190] ss:$8 sps:$4 sm:$0xff]   ;;  %v5115_v43 = vld [vmem:[#allocation8 + $0x264] ss:$8 sps:$4 sm:$0xff]  }
 0x211   : > { %v1867_v10 = vpop.f32.mrf.mxu1  ;;  %v1866_v51 = vadd.f32 %v1865_v12, %v1753_v28  ;;  %v1755_v58 = vadd.f32 %v1754_v15, %v5909_v17  ;;  %v6037_v31 = vsel %vm1899_vm9, %v1860_v45, %v1931_v20  ;;  %v1980_v17 = vpack.c.bf16 %v6040_v18, %v6046_v16  ;;  %v5098_v45 = vld [vmem:[#allocation8 + $0x1b0] ss:$8 sps:$4 sm:$0xff]   ;;  %v5109_v12 = vld [vmem:[#allocation8 + $0x184] ss:$8 sps:$4 sm:$0xff]   ;;  %v5107_v20 = vld [vmem:[#allocation8 + $0x180] ss:$8 sps:$4 sm:$0xff]  }
 0x212   : > { %v1756_v22 = vpop.f32.mrf.mxu0  ;;  %v1981_v1 = vpack.c.bf16 %v6037_v31, %v6042_v24  ;;  %v1932_v0 = vmul.f32 0.01, %v1864_v41  ;;  %vm1900_vm15 = vcmp.gt.f32.partialorder %v1864_v41, 0.0  ;;  %2676 = vmatpush2.bf16.msra.mxu1 %v5098_v45  ;;  %v5110_v28 = vld [vmem:[#allocation8 + $0x270] ss:$8 sps:$4 sm:$0xff]  }
 0x213   : > { %v1868_v37 = vadd.f32 %v1867_v10, %v1755_v58  ;;  %v1757_v4 = vadd.f32 %v1756_v22, %v1644_v49  ;;  %v1869_v59 = vpop.f32.mrf.mxu1  ;;  %v1933_v30 = vmul.f32 0.01, %v1866_v51  ;;  %vm1901_vm12 = vcmp.gt.f32.partialorder %v1866_v51, 0.0  ;;  %2677 = vmatprep.subr.bf16.mxu1 %v5103_v5  ;;  %3115 = vmatpush1.bf16.msra.mxu0 %v5110_v28  ;;  %v5113_v15 = vld [vmem:[#allocation8 + $0x260] ss:$8 sps:$4 sm:$0xff]  }
 0x214   : > { %2280 = vmatprep.mubr.bf16.mxu0 %v1981_v1  ;;  %v6058_v55 = vsel %vm1900_vm15, %v1864_v41, %v1932_v0  ;;  %3116 = vmatprep.subr.bf16.mxu0 %v5115_v43  ;;  %v5118_v10 = vld [vmem:[#allocation8 + $0x254] ss:$8 sps:$4 sm:$0xff]   ;;  %v5116_v49 = vld [vmem:[#allocation8 + $0x250] ss:$8 sps:$4 sm:$0xff]   ;;  %v5119_v58 = vld [vmem:[#allocation8 + $0x240] ss:$8 sps:$4 sm:$0xff]  }
 0x215   : > { %v1870_v60 = vadd.f32 %v1869_v59, %v1757_v4  ;;  %v1934_v2 = vmul.f32 0.01, %v1868_v37  ;;  %vm1902_vm13 = vcmp.gt.f32.partialorder %v1868_v37, 0.0  ;;  %2281 = vmatmul.mubr.bf16.gmra.mxu0 %v1980_v17  ;;  %v6050_v39 = vsel %vm1901_vm12, %v1866_v51, %v1933_v30  ;;  %v5121_v51 = vld [vmem:[#allocation8 + $0x244] ss:$8 sps:$4 sm:$0xff]  }
 0x216   : > { %2678 = vmatpush2.bf16.msra.mxu1 %v5101_v6  ;;  %v5124_v22 = vld [vmem:[#allocation8 + $0x234] ss:$8 sps:$4 sm:$0xff]   ;;  %v5127_v4 = vld [vmem:[#allocation8 + $0x224] ss:$8 sps:$4 sm:$0xff]   ;;  %v5125_v41 = vld [vmem:[#allocation8 + $0x220] ss:$8 sps:$4 sm:$0xff]  }
 0x217   : > { %vm1903_vm14 = vcmp.gt.f32.partialorder %v1870_v60, 0.0  ;;  %v1935_v9 = vmul.f32 0.01, %v1870_v60  ;;  %v6056_v47 = vsel %vm1902_vm13, %v1868_v37, %v1934_v2  ;;  %2679 = vmatprep.subr.bf16.mxu1 %v5106_v8  ;;  %3117 = vmatpush1.bf16.msra.mxu0 %v5113_v15  ;;  %v5122_v37 = vld [vmem:[#allocation8 + $0x230] ss:$8 sps:$4 sm:$0xff]  }
 0x218   : > { %v1982_v46 = vpack.c.bf16 %v6056_v47, %v6058_v55  ;;  %3118 = vmatprep.subr.bf16.mxu0 %v5118_v10  ;;  %v5130_v59 = vld [vmem:[#allocation8 + $0x214] ss:$8 sps:$4 sm:$0xff]   ;;  %v5128_v1 = vld [vmem:[#allocation8 + $0x210] ss:$8 sps:$4 sm:$0xff]   ;;  %v5133_v30 = vld [vmem:[#allocation8 + $0x204] ss:$8 sps:$4 sm:$0xff]  }
 0x219   : > { %v6052_v26 = vsel %vm1903_vm14, %v1870_v60, %v1935_v9  ;;  %v5131_v60 = vld [vmem:[#allocation8 + $0x200] ss:$8 sps:$4 sm:$0xff]   ;;  %v5136_v17 = vld [vmem:[#allocation8 + $0x2f4] ss:$8 sps:$4 sm:$0xff]   ;;  %v5134_v2 = vld [vmem:[#allocation8 + $0x2f0] ss:$8 sps:$4 sm:$0xff]  }
 0x21a   : > { %v1983_v32 = vpack.c.bf16 %v6052_v26, %v6050_v39  ;;  %2680 = vmatpush2.bf16.msra.mxu1 %v5104_v25  ;;  %v5139_v9 = vld [vmem:[#allocation8 + $0x2e4] ss:$8 sps:$4 sm:$0xff]   ;;  %v5137_v0 = vld [vmem:[#allocation8 + $0x2e0] ss:$8 sps:$4 sm:$0xff]  }
 0x21b   : > { %2681 = vmatprep.subr.bf16.mxu1 %v5109_v12  ;;  %3119 = vmatpush1.bf16.msra.mxu0 %v5116_v49  ;;  %v5143_v45 = vld [vmem:[#allocation8 + $0x2c0] ss:$8 sps:$4 sm:$0xff]  }
 0x21c   : > { %2290 = vmatprep.mubr.bf16.mxu0 %v1983_v32  ;;  %3120 = vmatprep.subr.bf16.mxu0 %v5121_v51  ;;  %v5142_v32 = vld [vmem:[#allocation8 + $0x2d4] ss:$8 sps:$4 sm:$0xff]   ;;  %v2016_v5 = vld [vmem:[#allocation10] sm:$0x3] }
 0x21d   : > { %2291 = vmatmul.mubr.bf16.gmra.mxu0 %v1982_v46  ;;  %v5140_v46 = vld [vmem:[#allocation8 + $0x2d0] ss:$8 sps:$4 sm:$0xff]   ;;  %v6063_v6 = vrot.slane %v2016_v5, %v5797_v11  ;;  %v6066_v8 = vrot.slane %v2016_v5, %v5799_v13 }
 0x21e   : > { %2682 = vmatpush2.bf16.msra.mxu1 %v5107_v20 }
 0x21f   : > { %3121 = vmatpush1.bf16.msra.mxu0 %v5119_v58 }
 0x220   : > { %3122 = vmatprep.subr.bf16.mxu0 %v5124_v22 }
 0x223   : > { %3123 = vmatpush1.bf16.msra.mxu0 %v5122_v37 }
 0x224   : > { %3124 = vmatprep.subr.bf16.mxu0 %v5127_v4 }
 0x227   : > { %3125 = vmatpush1.bf16.msra.mxu0 %v5125_v41 }
 0x228   : > { %3126 = vmatprep.subr.bf16.mxu0 %v5130_v59 }
 0x22b   : > { %3127 = vmatpush1.bf16.msra.mxu0 %v5128_v1 }
 0x22c   : > { %3128 = vmatprep.subr.bf16.mxu0 %v5133_v30 }
 0x22f   : > { %3129 = vmatpush1.bf16.msra.mxu0 %v5131_v60 }
 0x230   : > { %3130 = vmatprep.subr.bf16.mxu0 %v5136_v17 }
 0x233   : > { %3131 = vmatpush2.bf16.msra.mxu0 %v5134_v2 }
 0x234   : > { %3132 = vmatprep.subr.bf16.mxu0 %v5139_v9 }
 0x237   : > { %3133 = vmatpush2.bf16.msra.mxu0 %v5137_v0 }
 0x238   : > { %3134 = vmatprep.subr.bf16.mxu0 %v5142_v32 }
 0x23b   : > { %3135 = vmatpush2.bf16.msra.mxu0 %v5140_v46 }
 0x23c   : > { %3136 = vmatprep.subr.bf16.mxu0 %v5145_v52 }
 0x23f   : > { %3137 = vmatpush2.bf16.msra.mxu0 %v5143_v45 }
 0x2a5   : > { %v2222_v25 = vpop.f32.mrf.mxu0 }
 0x2a6   : > { %v2223_v12 = vadd.f32 %v2222_v25, %v6063_v6 }
 0x2a7   : > { %v2224_v20 = vpop.f32.mrf.mxu0 }
 0x2a8   : > { %v2225_v28 = vadd.f32 %v2224_v20, %v6066_v8  ;;  %v2333_v10 = vmul.f32 0.01, %v2223_v12  ;;  %vm2301_vm1 = vcmp.gt.f32.partialorder %v2223_v12, 0.0 }
 0x2a9   : > { %v2226_v61 = vpop.f32.mrf.mxu0 }
 0x2aa   : > { %v2334_v43 = vmul.f32 0.01, %v2225_v28  ;;  %v2227_v15 = vadd.f32 %v2226_v61, %v6063_v6  ;;  %vm2302_vm0 = vcmp.gt.f32.partialorder %v2225_v28, 0.0  ;;  %v2365_v59 = vsel %vm2301_vm1, %v2223_v12, %v2333_v10 }
 0x2ab   : > { %v2228_v49 = vpop.f32.mrf.mxu0  ;;  %v6084_v46 = vadd.f32 %v2365_v59, %v5930_v35 }
 0x2ac   : > { %vm2303_vm2 = vcmp.gt.f32.partialorder %v2227_v15, 0.0  ;;  %v2335_v51 = vmul.f32 0.01, %v2227_v15  ;;  %v2229_v58 = vadd.f32 %v2228_v49, %v6066_v8  ;;  %v2366_v37 = vsel %vm2302_vm0, %v2225_v28, %v2334_v43 }
 0x2ad   : > { %v2232_v22 = vpop.f32.mrf.mxu0  ;;  %v6078_v0 = vadd.f32 %v2366_v37, %v5928_v53 }
 0x2ae   : > { %v2367_v4 = vsel %vm2303_vm2, %v2227_v15, %v2335_v51  ;;  %vm2304_vm3 = vcmp.gt.f32.partialorder %v2229_v58, 0.0  ;;  %v2336_v41 = vmul.f32 0.01, %v2229_v58  ;;  %v2233_v1 = vadd.f32 %v2232_v22, %v6063_v6 }
 0x2af   : > { %v2234_v30 = vpop.f32.mrf.mxu0  ;;  %v6074_v60 = vadd.f32 %v2367_v4, %v5923_v34 }
 0x2b0   : > { %v2368_v17 = vsel %vm2304_vm3, %v2229_v58, %v2336_v41  ;;  %v2235_v2 = vadd.f32 %v2234_v30, %v6066_v8  ;;  %vm2305_vm4 = vcmp.gt.f32.partialorder %v2233_v1, 0.0  ;;  %v2337_v5 = vmul.f32 0.01, %v2233_v1 }
 0x2b1   : > { %v2236_v9 = vpop.f32.mrf.mxu0  ;;  %v6081_v32 = vadd.f32 %v2368_v17, %v5925_v40  ;;  %v2429_v53 = vpack.c.bf16 %v6074_v60, %v6084_v46 }
 0x2b2   : > { %v2338_v52 = vmul.f32 0.01, %v2235_v2  ;;  %v2237_v45 = vadd.f32 %v2236_v9, %v6063_v6  ;;  %vm2306_vm5 = vcmp.gt.f32.partialorder %v2235_v2, 0.0  ;;  %v2369_v43 = vsel %vm2305_vm4, %v2233_v1, %v2337_v5 }
 0x2b3   : > { %v2238_v34 = vpop.f32.mrf.mxu0  ;;  %v2430_v25 = vpack.c.bf16 %v6081_v32, %v6078_v0  ;;  %v6106_v1 = vadd.f32 %v2369_v43, %v5951_v57 }
 0x2b4   : > { %vm2307_vm6 = vcmp.gt.f32.partialorder %v2237_v45, 0.0  ;;  %v2339_v12 = vmul.f32 0.01, %v2237_v45  ;;  %v2239_v40 = vadd.f32 %v2238_v34, %v6066_v8  ;;  %v2370_v35 = vsel %vm2306_vm5, %v2235_v2, %v2338_v52 }
 0x2b5   : > { %v2242_v20 = vpop.f32.mrf.mxu0  ;;  %2683 = vmatprep.mubr.bf16.mxu1 %v2430_v25  ;;  %v6099_v37 = vadd.f32 %v2370_v35, %v5947_v50 }
 0x2b6   : > { %v2371_v28 = vsel %vm2307_vm6, %v2237_v45, %v2339_v12  ;;  %vm2308_vm7 = vcmp.gt.f32.partialorder %v2239_v40, 0.0  ;;  %v2340_v61 = vmul.f32 0.01, %v2239_v40  ;;  %2684 = vmatmul.mubr.bf16.vlgmr.msra.gmra.mxu1 %v2429_v53  ;;  %v2243_v15 = vadd.f32 %v2242_v20, %v6063_v6 }
 0x2b7   : > { %v2244_v10 = vpop.f32.mrf.mxu0  ;;  %v6096_v58 = vadd.f32 %v2371_v28, %v5945_v38 }
 0x2b8   : > { %v2372_v49 = vsel %vm2308_vm7, %v2239_v40, %v2340_v61  ;;  %v2245_v51 = vadd.f32 %v2244_v10, %v6066_v8  ;;  %vm2309_vm8 = vcmp.gt.f32.partialorder %v2243_v15, 0.0  ;;  %v2341_v30 = vmul.f32 0.01, %v2243_v15 }
 0x2b9   : > { %v2246_v22 = vpop.f32.mrf.mxu0  ;;  %v6102_v4 = vadd.f32 %v2372_v49, %v5942_v44  ;;  %v2431_v44 = vpack.c.bf16 %v6096_v58, %v6106_v1 }
 0x2ba   : > { %v2342_v41 = vmul.f32 0.01, %v2245_v51  ;;  %v2247_v59 = vadd.f32 %v2246_v22, %v6063_v6  ;;  %vm2310_vm9 = vcmp.gt.f32.partialorder %v2245_v51, 0.0  ;;  %v2373_v5 = vsel %vm2309_vm8, %v2243_v15, %v2341_v30 }
 0x2bb   : > { %v2248_v17 = vpop.f32.mrf.mxu0  ;;  %v2432_v38 = vpack.c.bf16 %v6102_v4, %v6099_v37  ;;  %v6127_v15 = vadd.f32 %v2373_v5, %v5970_v63 }
 0x2bc   : > { %vm2311_vm10 = vcmp.gt.f32.partialorder %v2247_v59, 0.0  ;;  %v2343_v2 = vmul.f32 0.01, %v2247_v59  ;;  %v2249_v50 = vadd.f32 %v2248_v17, %v6066_v8  ;;  %v2374_v52 = vsel %vm2310_vm9, %v2245_v51, %v2342_v41 }
 0x2bd   : > { %v2252_v9 = vpop.f32.mrf.mxu0  ;;  %2693 = vmatprep.mubr.bf16.mxu1 %v2432_v38  ;;  %v6120_v35 = vadd.f32 %v2374_v52, %v5966_v33 }
 0x2be   : > { %v2375_v45 = vsel %vm2311_vm10, %v2247_v59, %v2343_v2  ;;  %vm2312_vm11 = vcmp.gt.f32.partialorder %v2249_v50, 0.0  ;;  %v2344_v57 = vmul.f32 0.01, %v2249_v50  ;;  %2694 = vmatmul.mubr.bf16.gmra.mxu1 %v2431_v44  ;;  %v2253_v34 = vadd.f32 %v2252_v9, %v6063_v6 }
 0x2bf   : > { %v2254_v25 = vpop.f32.mrf.mxu0  ;;  %v6117_v40 = vadd.f32 %v2375_v45, %v5964_v23 }
 0x2c0   : > { %v2376_v53 = vsel %vm2312_vm11, %v2249_v50, %v2344_v57  ;;  %v2255_v12 = vadd.f32 %v2254_v25, %v6066_v8  ;;  %vm2313_vm12 = vcmp.gt.f32.partialorder %v2253_v34, 0.0  ;;  %v2345_v10 = vmul.f32 0.01, %v2253_v34 }
 0x2c1   : > { %v2256_v20 = vpop.f32.mrf.mxu0  ;;  %v6123_v28 = vadd.f32 %v2376_v53, %v5961_v29  ;;  %v2433_v29 = vpack.c.bf16 %v6117_v40, %v6127_v15 }
 0x2c2   : > { %v2346_v61 = vmul.f32 0.01, %v2255_v12  ;;  %v2257_v43 = vadd.f32 %v2256_v20, %v6063_v6  ;;  %vm2314_vm13 = vcmp.gt.f32.partialorder %v2255_v12, 0.0  ;;  %v2377_v30 = vsel %vm2313_vm12, %v2253_v34, %v2345_v10 }
 0x2c3   : > { %v2258_v49 = vpop.f32.mrf.mxu0  ;;  %v2434_v23 = vpack.c.bf16 %v6123_v28, %v6120_v35  ;;  %v6148_v34 = vadd.f32 %v2377_v30, %v5989_v14 }
 0x2c4   : > { %vm2315_vm14 = vcmp.gt.f32.partialorder %v2257_v43, 0.0  ;;  %v2347_v51 = vmul.f32 0.01, %v2257_v43  ;;  %v2259_v33 = vadd.f32 %v2258_v49, %v6066_v8  ;;  %v2378_v41 = vsel %vm2314_vm13, %v2255_v12, %v2346_v61 }
 0x2c5   : > { %v2262_v22 = vpop.f32.mrf.mxu0  ;;  %2703 = vmatprep.mubr.bf16.mxu1 %v2434_v23  ;;  %v6141_v52 = vadd.f32 %v2378_v41, %v5985_v62 }
 0x2c6   : > { %v2379_v59 = vsel %vm2315_vm14, %v2257_v43, %v2347_v51  ;;  %vm2316_vm15 = vcmp.gt.f32.partialorder %v2259_v33, 0.0  ;;  %v2348_v63 = vmul.f32 0.01, %v2259_v33  ;;  %2704 = vmatmul.mubr.bf16.gmra.mxu1 %v2433_v29  ;;  %v2263_v17 = vadd.f32 %v2262_v22, %v6063_v6 }
 0x2c7   : > { %v2264_v38 = vpop.f32.mrf.mxu0  ;;  %v6138_v44 = vadd.f32 %v2379_v59, %v5983_v27 }
 0x2c8   : > { %v2380_v2 = vsel %vm2316_vm15, %v2259_v33, %v2348_v63  ;;  %v2265_v50 = vadd.f32 %v2264_v38, %v6066_v8  ;;  %vm2317_vm0 = vcmp.gt.f32.partialorder %v2263_v17, 0.0  ;;  %v2349_v25 = vmul.f32 0.01, %v2263_v17 }
 0x2c9   : > { %v2266_v9 = vpop.f32.mrf.mxu0  ;;  %v6144_v45 = vadd.f32 %v2380_v2, %v5980_v54  ;;  %v2435_v54 = vpack.c.bf16 %v6138_v44, %v6148_v34 }
 0x2ca   : > { %v2350_v57 = vmul.f32 0.01, %v2265_v50  ;;  %v2267_v5 = vadd.f32 %v2266_v9, %v6063_v6  ;;  %vm2318_vm1 = vcmp.gt.f32.partialorder %v2265_v50, 0.0  ;;  %v2381_v10 = vsel %vm2317_vm0, %v2263_v17, %v2349_v25 }
 0x2cb   : > { %v2268_v53 = vpop.f32.mrf.mxu0  ;;  %v2436_v27 = vpack.c.bf16 %v6144_v45, %v6141_v52  ;;  %v6169_v17 = vadd.f32 %v2381_v10, %v6008_v19 }
 0x2cc   : > { %vm2319_vm2 = vcmp.gt.f32.partialorder %v2267_v5, 0.0  ;;  %v2351_v12 = vmul.f32 0.01, %v2267_v5  ;;  %v2269_v62 = vadd.f32 %v2268_v53, %v6066_v8  ;;  %v2382_v61 = vsel %vm2318_vm1, %v2265_v50, %v2350_v57 }
 0x2cd   : > { %v2272_v20 = vpop.f32.mrf.mxu0  ;;  %2713 = vmatprep.mubr.bf16.mxu1 %v2436_v27  ;;  %v6162_v41 = vadd.f32 %v2382_v61, %v6004_v56 }
 0x2ce   : > { %v2383_v43 = vsel %vm2319_vm2, %v2267_v5, %v2351_v12  ;;  %vm2320_vm3 = vcmp.gt.f32.partialorder %v2269_v62, 0.0  ;;  %v2352_v14 = vmul.f32 0.01, %v2269_v62  ;;  %2714 = vmatmul.mubr.bf16.gmra.mxu1 %v2435_v54  ;;  %v2273_v49 = vadd.f32 %v2272_v20, %v6063_v6 }
 0x2cf   : > { %v2274_v23 = vpop.f32.mrf.mxu0  ;;  %v6159_v29 = vadd.f32 %v2383_v43, %v6002_v3 }
 0x2d0   : > { %v2384_v51 = vsel %vm2320_vm3, %v2269_v62, %v2352_v14  ;;  %v2275_v33 = vadd.f32 %v2274_v23, %v6066_v8  ;;  %vm2321_vm4 = vcmp.gt.f32.partialorder %v2273_v49, 0.0  ;;  %v2353_v38 = vmul.f32 0.01, %v2273_v49 }
 0x2d1   : > { %v2276_v22 = vpop.f32.mrf.mxu0  ;;  %v6165_v59 = vadd.f32 %v2384_v51, %v5999_v48  ;;  %v2437_v48 = vpack.c.bf16 %v6159_v29, %v6169_v17 }
 0x2d2   : > { %v2354_v63 = vmul.f32 0.01, %v2275_v33  ;;  %v2277_v30 = vadd.f32 %v2276_v22, %v6063_v6  ;;  %vm2322_vm5 = vcmp.gt.f32.partialorder %v2275_v33, 0.0  ;;  %v2385_v25 = vsel %vm2321_vm4, %v2273_v49, %v2353_v38 }
 0x2d3   : > { %v2278_v2 = vpop.f32.mrf.mxu0  ;;  %v2438_v3 = vpack.c.bf16 %v6165_v59, %v6162_v41  ;;  %v6190_v49 = vadd.f32 %v2385_v25, %v6027_v36 }
 0x2d4   : > { %vm2323_vm6 = vcmp.gt.f32.partialorder %v2277_v30, 0.0  ;;  %v2355_v50 = vmul.f32 0.01, %v2277_v30  ;;  %v2279_v56 = vadd.f32 %v2278_v2, %v6066_v8  ;;  %v2386_v57 = vsel %vm2322_vm5, %v2275_v33, %v2354_v63 }
 0x2d5   : > { %v2282_v9 = vpop.f32.mrf.mxu0  ;;  %2723 = vmatprep.mubr.bf16.mxu1 %v2438_v3  ;;  %v6183_v61 = vadd.f32 %v2386_v57, %v6023_v21 }
 0x2d6   : > { %v2387_v5 = vsel %vm2323_vm6, %v2277_v30, %v2355_v50  ;;  %vm2324_vm7 = vcmp.gt.f32.partialorder %v2279_v56, 0.0  ;;  %v2356_v19 = vmul.f32 0.01, %v2279_v56  ;;  %2724 = vmatmul.mubr.bf16.gmra.mxu1 %v2437_v48  ;;  %v2283_v53 = vadd.f32 %v2282_v9, %v6063_v6 }
 0x2d7   : > { %v2284_v27 = vpop.f32.mrf.mxu0  ;;  %v6180_v54 = vadd.f32 %v2387_v5, %v6021_v7 }
 0x2d8   : > { %v2388_v12 = vsel %vm2324_vm7, %v2279_v56, %v2356_v19  ;;  %v2285_v62 = vadd.f32 %v2284_v27, %v6066_v8  ;;  %vm2325_vm8 = vcmp.gt.f32.partialorder %v2283_v53, 0.0  ;;  %v2357_v23 = vmul.f32 0.01, %v2283_v53 }
 0x2d9   : > { %v2286_v20 = vpop.f32.mrf.mxu0  ;;  %v6186_v43 = vadd.f32 %v2388_v12, %v6018_v42  ;;  %v2439_v42 = vpack.c.bf16 %v6180_v54, %v6190_v49 }
 0x2da   : > { %v2358_v14 = vmul.f32 0.01, %v2285_v62  ;;  %v2287_v10 = vadd.f32 %v2286_v20, %v6063_v6  ;;  %vm2326_vm9 = vcmp.gt.f32.partialorder %v2285_v62, 0.0  ;;  %v2389_v38 = vsel %vm2325_vm8, %v2283_v53, %v2357_v23 }
 0x2db   : > { %v2288_v51 = vpop.f32.mrf.mxu0  ;;  %v2440_v7 = vpack.c.bf16 %v6186_v43, %v6183_v61  ;;  %v6211_v53 = vadd.f32 %v2389_v38, %v6046_v16  ;;  %v5160_v38 = vld [vmem:[#allocation8 + $0x374] ss:$8 sps:$4 sm:$0xff]  }
 0x2dc   : > { %vm2327_vm10 = vcmp.gt.f32.partialorder %v2287_v10, 0.0  ;;  %v2359_v33 = vmul.f32 0.01, %v2287_v10  ;;  %v2289_v21 = vadd.f32 %v2288_v51, %v6066_v8  ;;  %v2390_v63 = vsel %vm2326_vm9, %v2285_v62, %v2358_v14  ;;  %3577 = vmatprep.subr.bf16.mxu1 %v5160_v38 }
 0x2dd   : > { %v2292_v22 = vpop.f32.mrf.mxu0  ;;  %2733 = vmatprep.mubr.bf16.mxu1 %v2440_v7  ;;  %v6204_v57 = vadd.f32 %v2390_v63, %v6042_v24  ;;  %v5152_v63 = vld [vmem:[#allocation8 + $0x290] ss:$8 sps:$4 sm:$0xff]  }
 0x2de   : > { %v2391_v30 = vsel %vm2327_vm10, %v2287_v10, %v2359_v33  ;;  %vm2328_vm11 = vcmp.gt.f32.partialorder %v2289_v21, 0.0  ;;  %v2360_v36 = vmul.f32 0.01, %v2289_v21  ;;  %2734 = vmatmul.mubr.bf16.gmra.mxu1 %v2439_v42  ;;  %v2293_v2 = vadd.f32 %v2292_v22, %v6063_v6  ;;  %v5148_v42 = vld [vmem:[#allocation8 + $0x2b4] ss:$8 sps:$4 sm:$0xff]  }
 0x2df   : > { %v2294_v3 = vpop.f32.mrf.mxu0  ;;  %v6201_v48 = vadd.f32 %v2391_v30, %v6040_v18  ;;  %3138 = vmatprep.subr.bf16.mxu0 %v5148_v42  ;;  %v5149_v22 = vld [vmem:[#allocation8 + $0x2a0] ss:$8 sps:$4 sm:$0xff]   ;;  %v5193_v42 = vld [vmem:[#allocation8 + $0x3c4] ss:$8 sps:$4 sm:$0xff]  }
 0x2e0   : > { %v2392_v50 = vsel %vm2328_vm11, %v2289_v21, %v2360_v36  ;;  %v2295_v56 = vadd.f32 %v2294_v3, %v6066_v8  ;;  %vm2329_vm12 = vcmp.gt.f32.partialorder %v2293_v2, 0.0  ;;  %v2361_v27 = vmul.f32 0.01, %v2293_v2  ;;  %v5155_v30 = vld [vmem:[#allocation8 + $0x280] ss:$8 sps:$4 sm:$0xff]  }
 0x2e1   : > { %v2296_v9 = vpop.f32.mrf.mxu0  ;;  %v6207_v5 = vadd.f32 %v2392_v50, %v6037_v31  ;;  %v2441_v31 = vpack.c.bf16 %v6201_v48, %v6211_v53  ;;  %v5158_v36 = vld [vmem:[#allocation8 + $0x370] ss:$8 sps:$4 sm:$0xff]   ;;  %v5161_v3 = vld [vmem:[#allocation8 + $0x360] ss:$8 sps:$4 sm:$0xff]   ;;  %v5166_v50 = vld [vmem:[#allocation8 + $0x354] ss:$8 sps:$4 sm:$0xff]  }
 0x2e2   : > { %v2362_v19 = vmul.f32 0.01, %v2295_v56  ;;  %v2297_v25 = vadd.f32 %v2296_v9, %v6063_v6  ;;  %vm2330_vm13 = vcmp.gt.f32.partialorder %v2295_v56, 0.0  ;;  %v2393_v14 = vsel %vm2329_vm12, %v2293_v2, %v2361_v27  ;;  %v5163_v2 = vld [vmem:[#allocation8 + $0x364] ss:$8 sps:$4 sm:$0xff]   ;;  %3578 = vmatpush1.bf16.msra.mxu1 %v5158_v36 }
 0x2e3   : > { %v2298_v12 = vpop.f32.mrf.mxu0  ;;  %v2442_v18 = vpack.c.bf16 %v6207_v5, %v6204_v57  ;;  %3579 = vmatprep.subr.bf16.mxu1 %v5163_v2  ;;  %v5169_v9 = vld [vmem:[#allocation8 + $0x344] ss:$8 sps:$4 sm:$0xff]   ;;  %v5170_v27 = vld [vmem:[#allocation8 + $0x330] ss:$8 sps:$4 sm:$0xff]  }
 0x2e4   : > { %vm2331_vm14 = vcmp.gt.f32.partialorder %v2297_v25, 0.0  ;;  %v2363_v62 = vmul.f32 0.01, %v2297_v25  ;;  %v2299_v24 = vadd.f32 %v2298_v12, %v6066_v8  ;;  %v2394_v20 = vsel %vm2330_vm13, %v2295_v56, %v2362_v19  ;;  %v5164_v56 = vld [vmem:[#allocation8 + $0x350] ss:$8 sps:$4 sm:$0xff]  }
 0x2e5   : > { %2743 = vmatprep.mubr.bf16.mxu1 %v2442_v18  ;;  %v6222_v51 = vadd.f32 %v2394_v20, %v6050_v39  ;;  %v6228_v8 = vadd.f32 %v2393_v14, %v6058_v55  ;;  %v5151_v39 = vld [vmem:[#allocation8 + $0x2a4] ss:$8 sps:$4 sm:$0xff]   ;;  %v5167_v19 = vld [vmem:[#allocation8 + $0x340] ss:$8 sps:$4 sm:$0xff]  }
 0x2e6   : > { %v2395_v6 = vsel %vm2331_vm14, %v2297_v25, %v2363_v62  ;;  %vm2332_vm15 = vcmp.gt.f32.partialorder %v2299_v24, 0.0  ;;  %v2364_v16 = vmul.f32 0.01, %v2299_v24  ;;  %2744 = vmatmul.mubr.bf16.gmra.mxu1 %v2441_v31  ;;  %v5157_v55 = vld [vmem:[#allocation8 + $0x284] ss:$8 sps:$4 sm:$0xff]  }
 0x2e7   : > { %v6219_v23 = vadd.f32 %v2395_v6, %v6056_v47  ;;  %v5146_v47 = vld [vmem:[#allocation8 + $0x2b0] ss:$8 sps:$4 sm:$0xff]   ;;  %3580 = vmatpush1.bf16.msra.mxu1 %v5161_v3  ;;  %v5172_v25 = vld [vmem:[#allocation8 + $0x334] ss:$8 sps:$4 sm:$0xff]   ;;  %v5175_v12 = vld [vmem:[#allocation8 + $0x324] ss:$8 sps:$4 sm:$0xff]  }
 0x2e8   : > { %v2396_v10 = vsel %vm2332_vm15, %v2299_v24, %v2364_v16  ;;  %3139 = vmatpush2.bf16.msra.mxu0 %v5146_v47  ;;  %3581 = vmatprep.subr.bf16.mxu1 %v5166_v50  ;;  %v5173_v18 = vld [vmem:[#allocation8 + $0x320] ss:$8 sps:$4 sm:$0xff]   ;;  %v5178_v62 = vld [vmem:[#allocation8 + $0x314] ss:$8 sps:$4 sm:$0xff]   ;;  %v5176_v24 = vld [vmem:[#allocation8 + $0x310] ss:$8 sps:$4 sm:$0xff]  }
 0x2e9   : > { %v6225_v7 = vadd.f32 %v2396_v10, %v6052_v26  ;;  %v2443_v21 = vpack.c.bf16 %v6219_v23, %v6228_v8  ;;  %3140 = vmatprep.subr.bf16.mxu0 %v5151_v39  ;;  %v5154_v26 = vld [vmem:[#allocation8 + $0x294] ss:$8 sps:$4 sm:$0xff]   ;;  %v5181_v31 = vld [vmem:[#allocation8 + $0x304] ss:$8 sps:$4 sm:$0xff]   ;;  %v5179_v20 = vld [vmem:[#allocation8 + $0x300] ss:$8 sps:$4 sm:$0xff]  }
 0x2ea   : > { %v5184_v6 = vld [vmem:[#allocation8 + $0x3f4] ss:$8 sps:$4 sm:$0xff]   ;;  %v5182_v16 = vld [vmem:[#allocation8 + $0x3f0] ss:$8 sps:$4 sm:$0xff]   ;;  %v5187_v14 = vld [vmem:[#allocation8 + $0x3e4] ss:$8 sps:$4 sm:$0xff]  }
 0x2eb   : > { %v2444_v33 = vpack.c.bf16 %v6225_v7, %v6222_v51  ;;  %3582 = vmatpush1.bf16.msra.mxu1 %v5164_v56  ;;  %v5185_v10 = vld [vmem:[#allocation8 + $0x3e0] ss:$8 sps:$4 sm:$0xff]  }
 0x2ec   : > { %3141 = vmatpush2.bf16.msra.mxu0 %v5149_v22  ;;  %3583 = vmatprep.subr.bf16.mxu1 %v5169_v9  ;;  %v5191_v47 = vld [vmem:[#allocation8 + $0x3c0] ss:$8 sps:$4 sm:$0xff]  }
 0x2ed   : > { %2753 = vmatprep.mubr.bf16.mxu1 %v2444_v33  ;;  %3142 = vmatprep.subr.bf16.mxu0 %v5154_v26  ;;  %v5190_v33 = vld [vmem:[#allocation8 + $0x3d4] ss:$8 sps:$4 sm:$0xff]   ;;  %v2479_v39 = vld [vmem:[#allocation10 + $0x2] sm:$0x3] }
 0x2ee   : > { %2754 = vmatmul.mubr.bf16.gmra.mxu1 %v2443_v21  ;;  %v5188_v21 = vld [vmem:[#allocation8 + $0x3d0] ss:$8 sps:$4 sm:$0xff]   ;;  %v6235_v22 = vrot.slane %v2479_v39, %v5797_v11  ;;  %v6238_v26 = vrot.slane %v2479_v39, %v5799_v13 }
 0x2ef   : > { %3584 = vmatpush1.bf16.msra.mxu1 %v5167_v19 }
 0x2f0   : > { %3143 = vmatpush2.bf16.msra.mxu0 %v5152_v63  ;;  %3585 = vmatprep.subr.bf16.mxu1 %v5172_v25 }
 0x2f1   : > { %3144 = vmatprep.subr.bf16.mxu0 %v5157_v55 }
 0x2f3   : > { %3586 = vmatpush1.bf16.msra.mxu1 %v5170_v27 }
 0x2f4   : > { %3145 = vmatpush2.bf16.msra.mxu0 %v5155_v30  ;;  %3587 = vmatprep.subr.bf16.mxu1 %v5175_v12 }
 0x2f7   : > { %3588 = vmatpush1.bf16.msra.mxu1 %v5173_v18 }
 0x2f8   : > { %3589 = vmatprep.subr.bf16.mxu1 %v5178_v62 }
 0x2fb   : > { %3590 = vmatpush1.bf16.msra.mxu1 %v5176_v24 }
 0x2fc   : > { %3591 = vmatprep.subr.bf16.mxu1 %v5181_v31 }
 0x2ff   : > { %3592 = vmatpush1.bf16.msra.mxu1 %v5179_v20 }
 0x300   : > { %3593 = vmatprep.subr.bf16.mxu1 %v5184_v6 }
 0x303   : > { %3594 = vmatpush2.bf16.msra.mxu1 %v5182_v16 }
 0x304   : > { %3595 = vmatprep.subr.bf16.mxu1 %v5187_v14 }
 0x307   : > { %3596 = vmatpush2.bf16.msra.mxu1 %v5185_v10 }
 0x308   : > { %3597 = vmatprep.subr.bf16.mxu1 %v5190_v33 }
 0x30b   : > { %3598 = vmatpush2.bf16.msra.mxu1 %v5188_v21 }
 0x30c   : > { %3599 = vmatprep.subr.bf16.mxu1 %v5193_v42 }
 0x30f   : > { %3600 = vmatpush2.bf16.msra.mxu1 %v5191_v47 }
 0x376   : > { %v2685_v63 = vpop.f32.mrf.mxu1 }
 0x377   : > { %v2686_v55 = vadd.f32 %v2685_v63, %v6235_v22 }
 0x378   : > { %v2687_v30 = vpop.f32.mrf.mxu1 }
 0x379   : > { %v2688_v36 = vadd.f32 %v2687_v30, %v6238_v26  ;;  %v2796_v50 = vmul.f32 0.01, %v2686_v55  ;;  %vm2764_vm1 = vcmp.gt.f32.partialorder %v2686_v55, 0.0 }
 0x37a   : > { %v2689_v38 = vpop.f32.mrf.mxu1 }
 0x37b   : > { %v2797_v2 = vmul.f32 0.01, %v2688_v36  ;;  %v2690_v3 = vadd.f32 %v2689_v38, %v6235_v22  ;;  %vm2765_vm0 = vcmp.gt.f32.partialorder %v2688_v36, 0.0  ;;  %v2828_v62 = vsel %vm2764_vm1, %v2686_v55, %v2796_v50 }
 0x37c   : > { %v2691_v56 = vpop.f32.mrf.mxu1  ;;  %v6256_v21 = vadd.f32 %v2828_v62, %v6084_v46 }
 0x37d   : > { %vm2766_vm2 = vcmp.gt.f32.partialorder %v2690_v3, 0.0  ;;  %v2798_v9 = vmul.f32 0.01, %v2690_v3  ;;  %v2692_v19 = vadd.f32 %v2691_v56, %v6238_v26  ;;  %v2829_v27 = vsel %vm2765_vm0, %v2688_v36, %v2797_v2 }
 0x37e   : > { %v2695_v25 = vpop.f32.mrf.mxu1  ;;  %v6250_v10 = vadd.f32 %v2829_v27, %v6078_v0 }
 0x37f   : > { %v2830_v12 = vsel %vm2766_vm2, %v2690_v3, %v2798_v9  ;;  %vm2767_vm3 = vcmp.gt.f32.partialorder %v2692_v19, 0.0  ;;  %v2799_v18 = vmul.f32 0.01, %v2692_v19  ;;  %v2696_v24 = vadd.f32 %v2695_v25, %v6235_v22 }
 0x380   : > { %v2697_v31 = vpop.f32.mrf.mxu1  ;;  %v6246_v20 = vadd.f32 %v2830_v12, %v6074_v60 }
 0x381   : > { %v2831_v6 = vsel %vm2767_vm3, %v2692_v19, %v2799_v18  ;;  %v2698_v16 = vadd.f32 %v2697_v31, %v6238_v26  ;;  %vm2768_vm4 = vcmp.gt.f32.partialorder %v2696_v24, 0.0  ;;  %v2800_v39 = vmul.f32 0.01, %v2696_v24 }
 0x382   : > { %v2699_v14 = vpop.f32.mrf.mxu1  ;;  %v6253_v33 = vadd.f32 %v2831_v6, %v6081_v32  ;;  %v2892_v0 = vpack.c.bf16 %v6246_v20, %v6256_v21 }
 0x383   : > { %v2801_v42 = vmul.f32 0.01, %v2698_v16  ;;  %v2700_v47 = vadd.f32 %v2699_v14, %v6235_v22  ;;  %vm2769_vm5 = vcmp.gt.f32.partialorder %v2698_v16, 0.0  ;;  %v2832_v2 = vsel %vm2768_vm4, %v2696_v24, %v2800_v39 }
 0x384   : > { %v2701_v60 = vpop.f32.mrf.mxu1  ;;  %v2893_v63 = vpack.c.bf16 %v6253_v33, %v6250_v10  ;;  %v6278_v24 = vadd.f32 %v2832_v2, %v6106_v1 }
 0x385   : > { %vm2770_vm6 = vcmp.gt.f32.partialorder %v2700_v47, 0.0  ;;  %v2802_v55 = vmul.f32 0.01, %v2700_v47  ;;  %v2702_v32 = vadd.f32 %v2701_v60, %v6238_v26  ;;  %v2833_v46 = vsel %vm2769_vm5, %v2698_v16, %v2801_v42 }
 0x386   : > { %v2705_v30 = vpop.f32.mrf.mxu1  ;;  %3146 = vmatprep.mubr.bf16.mxu0 %v2893_v63  ;;  %v6271_v27 = vadd.f32 %v2833_v46, %v6099_v37 }
 0x387   : > { %v2834_v36 = vsel %vm2770_vm6, %v2700_v47, %v2802_v55  ;;  %vm2771_vm7 = vcmp.gt.f32.partialorder %v2702_v32, 0.0  ;;  %v2803_v38 = vmul.f32 0.01, %v2702_v32  ;;  %3147 = vmatmul.mubr.bf16.vlgmr.msra.gmra.mxu0 %v2892_v0  ;;  %v2706_v3 = vadd.f32 %v2705_v30, %v6235_v22 }
 0x388   : > { %v2707_v50 = vpop.f32.mrf.mxu1  ;;  %v6268_v19 = vadd.f32 %v2834_v36, %v6096_v58 }
 0x389   : > { %v2835_v56 = vsel %vm2771_vm7, %v2702_v32, %v2803_v38  ;;  %v2708_v9 = vadd.f32 %v2707_v50, %v6238_v26  ;;  %vm2772_vm8 = vcmp.gt.f32.partialorder %v2706_v3, 0.0  ;;  %v2804_v31 = vmul.f32 0.01, %v2706_v3 }
 0x38a   : > { %v2709_v25 = vpop.f32.mrf.mxu1  ;;  %v6274_v12 = vadd.f32 %v2835_v56, %v6102_v4  ;;  %v2894_v4 = vpack.c.bf16 %v6268_v19, %v6278_v24 }
 0x38b   : > { %v2805_v18 = vmul.f32 0.01, %v2708_v9  ;;  %v2710_v62 = vadd.f32 %v2709_v25, %v6235_v22  ;;  %vm2773_vm9 = vcmp.gt.f32.partialorder %v2708_v9, 0.0  ;;  %v2836_v39 = vsel %vm2772_vm8, %v2706_v3, %v2804_v31 }
 0x38c   : > { %v2711_v6 = vpop.f32.mrf.mxu1  ;;  %v2895_v58 = vpack.c.bf16 %v6274_v12, %v6271_v27  ;;  %v6299_v3 = vadd.f32 %v2836_v39, %v6127_v15 }
 0x38d   : > { %vm2774_vm10 = vcmp.gt.f32.partialorder %v2710_v62, 0.0  ;;  %v2806_v16 = vmul.f32 0.01, %v2710_v62  ;;  %v2712_v37 = vadd.f32 %v2711_v6, %v6238_v26  ;;  %v2837_v42 = vsel %vm2773_vm9, %v2708_v9, %v2805_v18 }
 0x38e   : > { %v2715_v14 = vpop.f32.mrf.mxu1  ;;  %3156 = vmatprep.mubr.bf16.mxu0 %v2895_v58  ;;  %v6292_v46 = vadd.f32 %v2837_v42, %v6120_v35 }
 0x38f   : > { %v2838_v47 = vsel %vm2774_vm10, %v2710_v62, %v2806_v16  ;;  %vm2775_vm11 = vcmp.gt.f32.partialorder %v2712_v37, 0.0  ;;  %v2807_v1 = vmul.f32 0.01, %v2712_v37  ;;  %3157 = vmatmul.mubr.bf16.gmra.mxu0 %v2894_v4  ;;  %v2716_v60 = vadd.f32 %v2715_v14, %v6235_v22 }
 0x390   : > { %v2717_v63 = vpop.f32.mrf.mxu1  ;;  %v6289_v32 = vadd.f32 %v2838_v47, %v6117_v40 }
 0x391   : > { %v2839_v0 = vsel %vm2775_vm11, %v2712_v37, %v2807_v1  ;;  %v2718_v55 = vadd.f32 %v2717_v63, %v6238_v26  ;;  %vm2776_vm12 = vcmp.gt.f32.partialorder %v2716_v60, 0.0  ;;  %v2808_v50 = vmul.f32 0.01, %v2716_v60 }
 0x392   : > { %v2719_v30 = vpop.f32.mrf.mxu1  ;;  %v6295_v36 = vadd.f32 %v2839_v0, %v6123_v28  ;;  %v2896_v28 = vpack.c.bf16 %v6289_v32, %v6299_v3 }
 0x393   : > { %v2809_v38 = vmul.f32 0.01, %v2718_v55  ;;  %v2720_v2 = vadd.f32 %v2719_v30, %v6235_v22  ;;  %vm2777_vm13 = vcmp.gt.f32.partialorder %v2718_v55, 0.0  ;;  %v2840_v31 = vsel %vm2776_vm12, %v2716_v60, %v2808_v50 }
 0x394   : > { %v2721_v56 = vpop.f32.mrf.mxu1  ;;  %v2897_v40 = vpack.c.bf16 %v6295_v36, %v6292_v46  ;;  %v6320_v60 = vadd.f32 %v2840_v31, %v6148_v34 }
 0x395   : > { %vm2778_vm14 = vcmp.gt.f32.partialorder %v2720_v2, 0.0  ;;  %v2810_v9 = vmul.f32 0.01, %v2720_v2  ;;  %v2722_v35 = vadd.f32 %v2721_v56, %v6238_v26  ;;  %v2841_v18 = vsel %vm2777_vm13, %v2718_v55, %v2809_v38 }
 0x396   : > { %v2725_v25 = vpop.f32.mrf.mxu1  ;;  %3166 = vmatprep.mubr.bf16.mxu0 %v2897_v40  ;;  %v6313_v42 = vadd.f32 %v2841_v18, %v6141_v52 }
 0x397   : > { %v2842_v62 = vsel %vm2778_vm14, %v2720_v2, %v2810_v9  ;;  %vm2779_vm15 = vcmp.gt.f32.partialorder %v2722_v35, 0.0  ;;  %v2811_v15 = vmul.f32 0.01, %v2722_v35  ;;  %3167 = vmatmul.mubr.bf16.gmra.mxu0 %v2896_v28  ;;  %v2726_v6 = vadd.f32 %v2725_v25, %v6235_v22 }
 0x398   : > { %v2727_v58 = vpop.f32.mrf.mxu1  ;;  %v6310_v4 = vadd.f32 %v2842_v62, %v6138_v44 }
 0x399   : > { %v2843_v16 = vsel %vm2779_vm15, %v2722_v35, %v2811_v15  ;;  %v2728_v37 = vadd.f32 %v2727_v58, %v6238_v26  ;;  %vm2780_vm0 = vcmp.gt.f32.partialorder %v2726_v6, 0.0  ;;  %v2812_v63 = vmul.f32 0.01, %v2726_v6 }
 0x39a   : > { %v2729_v14 = vpop.f32.mrf.mxu1  ;;  %v6316_v47 = vadd.f32 %v2843_v16, %v6144_v45  ;;  %v2898_v45 = vpack.c.bf16 %v6310_v4, %v6320_v60 }
 0x39b   : > { %v2813_v1 = vmul.f32 0.01, %v2728_v37  ;;  %v2730_v39 = vadd.f32 %v2729_v14, %v6235_v22  ;;  %vm2781_vm1 = vcmp.gt.f32.partialorder %v2728_v37, 0.0  ;;  %v2844_v50 = vsel %vm2780_vm0, %v2726_v6, %v2812_v63 }
 0x39c   : > { %v2731_v0 = vpop.f32.mrf.mxu1  ;;  %v2899_v44 = vpack.c.bf16 %v6316_v47, %v6313_v42  ;;  %v6340_v15 = vadd.f32 %v2844_v50, %v6169_v17 }
 0x39d   : > { %vm2782_vm2 = vcmp.gt.f32.partialorder %v2730_v39, 0.0  ;;  %v2814_v55 = vmul.f32 0.01, %v2730_v39  ;;  %v2732_v52 = vadd.f32 %v2731_v0, %v6238_v26  ;;  %v2845_v38 = vsel %vm2781_vm1, %v2728_v37, %v2813_v1 }
 0x39e   : > { %v2735_v30 = vpop.f32.mrf.mxu1  ;;  %3176 = vmatprep.mubr.bf16.mxu0 %v2899_v44  ;;  %v6334_v18 = vadd.f32 %v2845_v38, %v6162_v41 }
 0x39f   : > { %v2846_v2 = vsel %vm2782_vm2, %v2730_v39, %v2814_v55  ;;  %vm2783_vm3 = vcmp.gt.f32.partialorder %v2732_v52, 0.0  ;;  %v2815_v34 = vmul.f32 0.01, %v2732_v52  ;;  %3177 = vmatmul.mubr.bf16.gmra.mxu0 %v2898_v45  ;;  %v2736_v56 = vadd.f32 %v2735_v30, %v6235_v22 }
 0x3a0   : > { %v2737_v40 = vpop.f32.mrf.mxu1  ;;  %v6330_v9 = vadd.f32 %v2846_v2, %v6159_v29 }
 0x3a1   : > { %v2847_v35 = vsel %vm2783_vm3, %v2732_v52, %v2815_v34  ;;  %v2738_v28 = vadd.f32 %v2737_v40, %v6238_v26  ;;  %vm2784_vm4 = vcmp.gt.f32.partialorder %v2736_v56, 0.0  ;;  %v2816_v58 = vmul.f32 0.01, %v2736_v56 }
 0x3a2   : > { %v2739_v25 = vpop.f32.mrf.mxu1  ;;  %v6337_v62 = vadd.f32 %v2847_v35, %v6165_v59  ;;  %v2900_v59 = vpack.c.bf16 %v6330_v9, %v6340_v15 }
 0x3a3   : > { %v2817_v31 = vmul.f32 0.01, %v2738_v28  ;;  %v2740_v6 = vadd.f32 %v2739_v25, %v6235_v22  ;;  %vm2785_vm5 = vcmp.gt.f32.partialorder %v2738_v28, 0.0  ;;  %v2848_v63 = vsel %vm2784_vm4, %v2736_v56, %v2816_v58 }
 0x3a4   : > { %v2741_v29 = vpop.f32.mrf.mxu1  ;;  %v2901_v16 = vpack.c.bf16 %v6337_v62, %v6334_v18  ;;  %v6361_v34 = vadd.f32 %v2848_v63, %v6190_v49 }
 0x3a5   : > { %vm2786_vm6 = vcmp.gt.f32.partialorder %v2740_v6, 0.0  ;;  %v2818_v37 = vmul.f32 0.01, %v2740_v6  ;;  %v2742_v41 = vadd.f32 %v2741_v29, %v6238_v26  ;;  %v2849_v17 = vsel %vm2785_vm5, %v2738_v28, %v2817_v31 }
 0x3a6   : > { %v2745_v14 = vpop.f32.mrf.mxu1  ;;  %3186 = vmatprep.mubr.bf16.mxu0 %v2901_v16  ;;  %v6355_v38 = vadd.f32 %v2849_v17, %v6183_v61 }
 0x3a7   : > { %v2850_v1 = vsel %vm2786_vm6, %v2740_v6, %v2818_v37  ;;  %vm2787_vm7 = vcmp.gt.f32.partialorder %v2742_v41, 0.0  ;;  %v2819_v39 = vmul.f32 0.01, %v2742_v41  ;;  %3187 = vmatmul.mubr.bf16.gmra.mxu0 %v2900_v59  ;;  %v2746_v0 = vadd.f32 %v2745_v14, %v6235_v22 }
 0x3a8   : > { %v2747_v44 = vpop.f32.mrf.mxu1  ;;  %v6351_v55 = vadd.f32 %v2850_v1, %v6180_v54 }
 0x3a9   : > { %v2851_v52 = vsel %vm2787_vm7, %v2742_v41, %v2819_v39  ;;  %v2748_v45 = vadd.f32 %v2747_v44, %v6238_v26  ;;  %vm2788_vm8 = vcmp.gt.f32.partialorder %v2746_v0, 0.0  ;;  %v2820_v40 = vmul.f32 0.01, %v2746_v0 }
 0x3aa   : > { %v2749_v30 = vpop.f32.mrf.mxu1  ;;  %v6358_v2 = vadd.f32 %v2851_v52, %v6186_v43  ;;  %v2902_v43 = vpack.c.bf16 %v6351_v55, %v6361_v34 }
 0x3ab   : > { %v2821_v50 = vmul.f32 0.01, %v2748_v45  ;;  %v2750_v56 = vadd.f32 %v2749_v30, %v6235_v22  ;;  %vm2789_vm9 = vcmp.gt.f32.partialorder %v2748_v45, 0.0  ;;  %v2852_v58 = vsel %vm2788_vm8, %v2746_v0, %v2820_v40 }
 0x3ac   : > { %v2751_v54 = vpop.f32.mrf.mxu1  ;;  %v2903_v35 = vpack.c.bf16 %v6358_v2, %v6355_v38  ;;  %v6382_v39 = vadd.f32 %v2852_v58, %v6211_v53  ;;  %v6406_v58 = vld [vmem:[#allocation11 + $0x38] sm:$0xff]  }
 0x3ad   : > { %vm2790_vm10 = vcmp.gt.f32.partialorder %v2750_v56, 0.0  ;;  %v2822_v28 = vmul.f32 0.01, %v2750_v56  ;;  %v2752_v61 = vadd.f32 %v2751_v54, %v6238_v26  ;;  %v2853_v49 = vsel %vm2789_vm9, %v2748_v45, %v2821_v50 }
 0x3ae   : > { %v2755_v25 = vpop.f32.mrf.mxu1  ;;  %3196 = vmatprep.mubr.bf16.mxu0 %v2903_v35  ;;  %v6376_v17 = vadd.f32 %v2853_v49, %v6204_v57  ;;  %v5200_v49 = vld [vmem:[#allocation8 + $0x390] ss:$8 sps:$4 sm:$0xff]  }
 0x3af   : > { %v2854_v31 = vsel %vm2790_vm10, %v2750_v56, %v2822_v28  ;;  %vm2791_vm11 = vcmp.gt.f32.partialorder %v2752_v61, 0.0  ;;  %v2823_v6 = vmul.f32 0.01, %v2752_v61  ;;  %3197 = vmatmul.mubr.bf16.gmra.mxu0 %v2902_v43  ;;  %v2756_v29 = vadd.f32 %v2755_v25, %v6235_v22  ;;  %v5194_v43 = vld [vmem:[#allocation8 + $0x3b0] ss:$8 sps:$4 sm:$0xff]  }
 0x3b0   : > { %v2757_v16 = vpop.f32.mrf.mxu1  ;;  %v6372_v37 = vadd.f32 %v2854_v31, %v6201_v48  ;;  %v5197_v25 = vld [vmem:[#allocation8 + $0x3a0] ss:$8 sps:$4 sm:$0xff]  }
 0x3b1   : > { %v2855_v41 = vsel %vm2791_vm11, %v2752_v61, %v2823_v6  ;;  %v2758_v59 = vadd.f32 %v2757_v16, %v6238_v26  ;;  %vm2792_vm12 = vcmp.gt.f32.partialorder %v2756_v29, 0.0  ;;  %v2824_v44 = vmul.f32 0.01, %v2756_v29  ;;  %v5203_v31 = vld [vmem:[#allocation8 + $0x380] ss:$8 sps:$4 sm:$0xff]   ;;  %v6411_v16 = vld [vmem:[#allocation11 + $0x30] sm:$0xff]  }
 0x3b2   : > { %v2759_v14 = vpop.f32.mrf.mxu1  ;;  %v6379_v1 = vadd.f32 %v2855_v41, %v6207_v5  ;;  %v2904_v5 = vpack.c.bf16 %v6372_v37, %v6382_v39  ;;  %v5206_v6 = vld [vmem:[#allocation11 + $0x78] sm:$0xff]   ;;  %v6414_v41 = vld [vmem:[#allocation11 + $0x68] sm:$0xff]  }
 0x3b3   : > { %v2825_v63 = vmul.f32 0.01, %v2758_v59  ;;  %v2760_v0 = vadd.f32 %v2759_v14, %v6235_v22  ;;  %vm2793_vm13 = vcmp.gt.f32.partialorder %v2758_v59, 0.0  ;;  %v2856_v22 = vsel %vm2792_vm12, %v2756_v29, %v2824_v44  ;;  %v6408_v29 = vld [vmem:[#allocation11 + $0x70] sm:$0xff]   ;;  %4565 = vmatprep.subr.bf16.mxu0 %v5206_v6  ;;  %v6420_v14 = vld [vmem:[#allocation11 + $0x60] sm:$0xff]  }
 0x3b4   : > { %v2761_v48 = vpop.f32.mrf.mxu1  ;;  %v2905_v52 = vpack.c.bf16 %v6379_v1, %v6376_v17  ;;  %4566 = vmatpush3.bf16.msra.mxu0 %v6406_v58 }
 0x3b5   : > { %vm2794_vm14 = vcmp.gt.f32.partialorder %v2760_v0, 0.0  ;;  %v2826_v45 = vmul.f32 0.01, %v2760_v0  ;;  %v2762_v57 = vadd.f32 %v2761_v48, %v6238_v26  ;;  %v2857_v53 = vsel %vm2793_vm13, %v2758_v59, %v2825_v63  ;;  %4567 = vmatprep.subr.bf16.mxu0 %v6408_v29  ;;  %v6417_v59 = vld [vmem:[#allocation11 + $0x28] sm:$0xff]   ;;  %v6423_v63 = vld [vmem:[#allocation11 + $0x20] sm:$0xff]  }
 0x3b6   : > { %3206 = vmatprep.mubr.bf16.mxu0 %v2905_v52  ;;  %v6394_v54 = vadd.f32 %v2857_v53, %v6222_v51  ;;  %v6400_v26 = vadd.f32 %v2856_v22, %v6228_v8  ;;  %v5199_v51 = vld [vmem:[#allocation8 + $0x3a4] ss:$8 sps:$4 sm:$0xff]  }
 0x3b7   : > { %v2858_v30 = vsel %vm2794_vm14, %v2760_v0, %v2826_v45  ;;  %vm2795_vm15 = vcmp.gt.f32.partialorder %v2762_v57, 0.0  ;;  %v2827_v50 = vmul.f32 0.01, %v2762_v57  ;;  %3207 = vmatmul.mubr.bf16.gmra.mxu0 %v2904_v5  ;;  %v5205_v8 = vld [vmem:[#allocation8 + $0x384] ss:$8 sps:$4 sm:$0xff]  }
 0x3b8   : > { %v6391_v56 = vadd.f32 %v2858_v30, %v6219_v23  ;;  %v5196_v23 = vld [vmem:[#allocation8 + $0x3b4] ss:$8 sps:$4 sm:$0xff]   ;;  %4568 = vmatpush3.bf16.msra.mxu0 %v6411_v16  ;;  %v2942_v0 = vld [vmem:[#allocation10 + $0x4] sm:$0x3] }
 0x3b9   : > { %v2859_v40 = vsel %vm2795_vm15, %v2762_v57, %v2827_v50  ;;  %3601 = vmatprep.subr.bf16.mxu1 %v5196_v23  ;;  %4569 = vmatprep.subr.bf16.mxu0 %v6414_v41  ;;  %v6428_v44 = vrot.slane %v2942_v0, %v5797_v11  ;;  %v6431_v48 = vrot.slane %v2942_v0, %v5799_v13 }
 0x3ba   : > { %v6397_v35 = vadd.f32 %v2859_v40, %v6225_v7  ;;  %v2906_v61 = vpack.c.bf16 %v6391_v56, %v6400_v26  ;;  %3602 = vmatpush2.bf16.msra.mxu1 %v5194_v43  ;;  %v5202_v7 = vld [vmem:[#allocation8 + $0x394] ss:$8 sps:$4 sm:$0xff]  }
 0x3bb   : > { %3603 = vmatprep.subr.bf16.mxu1 %v5199_v51 }
 0x3bc   : > { %v2907_v28 = vpack.c.bf16 %v6397_v35, %v6394_v54  ;;  %4570 = vmatpush3.bf16.msra.mxu0 %v6417_v59 }
 0x3bd   : > { %4571 = vmatprep.subr.bf16.mxu0 %v6420_v14 }
 0x3be   : > { %3216 = vmatprep.mubr.bf16.mxu0 %v2907_v28  ;;  %3604 = vmatpush2.bf16.msra.mxu1 %v5197_v25 }
 0x3bf   : > { %3217 = vmatmul.mubr.bf16.gmra.mxu0 %v2906_v61  ;;  %3605 = vmatprep.subr.bf16.mxu1 %v5202_v7 }
 0x3c0   : > { %4572 = vmatpush3.bf16.msra.mxu0 %v6423_v63 }
 0x3c2   : > { %3606 = vmatpush2.bf16.msra.mxu1 %v5200_v49 }
 0x3c3   : > { %3607 = vmatprep.subr.bf16.mxu1 %v5205_v8 }
 0x3c6   : > { %3608 = vmatpush2.bf16.msra.mxu1 %v5203_v31 }
 0x3c7   : > { %4629 = vmatprep.subr.bf16.mxu1 %v5206_v6 }
 0x447   : > { %v3148_v52 = vpop.f32.mrf.mxu0 }
 0x448   : > { %v3149_v45 = vadd.f32 %v3148_v52, %v6428_v44 }
 0x449   : > { %v3150_v57 = vpop.f32.mrf.mxu0 }
 0x44a   : > { %v3151_v5 = vadd.f32 %v3150_v57, %v6431_v48  ;;  %v3259_v22 = vmul.f32 0.01, %v3149_v45  ;;  %vm3227_vm1 = vcmp.gt.f32.partialorder %v3149_v45, 0.0 }
 0x44b   : > { %v3152_v53 = vpop.f32.mrf.mxu0 }
 0x44c   : > { %v3260_v30 = vmul.f32 0.01, %v3151_v5  ;;  %v3153_v50 = vadd.f32 %v3152_v53, %v6428_v44  ;;  %vm3228_vm0 = vcmp.gt.f32.partialorder %v3151_v5, 0.0  ;;  %v3291_v7 = vsel %vm3227_vm1, %v3149_v45, %v3259_v22 }
 0x44d   : > { %v3154_v40 = vpop.f32.mrf.mxu0 }
 0x44e   : > { %vm3229_vm2 = vcmp.gt.f32.partialorder %v3153_v50, 0.0  ;;  %v3261_v28 = vmul.f32 0.01, %v3153_v50  ;;  %v3155_v61 = vadd.f32 %v3154_v40, %v6431_v48  ;;  %v3292_v43 = vsel %vm3228_vm0, %v3151_v5, %v3260_v30 }
 0x44f   : > { %v3158_v23 = vpop.f32.mrf.mxu0  ;;  %v6443_v57 = vadd.f32 %v3292_v43, %v6250_v10  ;;  %v6449_v5 = vadd.f32 %v3291_v7, %v6256_v21 }
 0x450   : > { %v3293_v51 = vsel %vm3229_vm2, %v3153_v50, %v3261_v28  ;;  %vm3230_vm3 = vcmp.gt.f32.partialorder %v3155_v61, 0.0  ;;  %v3262_v25 = vmul.f32 0.01, %v3155_v61  ;;  %v3159_v49 = vadd.f32 %v3158_v23, %v6428_v44 }
 0x451   : > { %v3160_v8 = vpop.f32.mrf.mxu0  ;;  %v6439_v31 = vadd.f32 %v3293_v51, %v6246_v20 }
 0x452   : > { %v3294_v6 = vsel %vm3230_vm3, %v3155_v61, %v3262_v25  ;;  %v3161_v0 = vadd.f32 %v3160_v8, %v6431_v48  ;;  %vm3231_vm4 = vcmp.gt.f32.partialorder %v3159_v49, 0.0  ;;  %v3263_v50 = vmul.f32 0.01, %v3159_v49 }
 0x453   : > { %v3162_v52 = vpop.f32.mrf.mxu0  ;;  %v6446_v53 = vadd.f32 %v3294_v6, %v6253_v33  ;;  %v3355_v10 = vpack.c.bf16 %v6439_v31, %v6449_v5 }
 0x454   : > { %v3264_v45 = vmul.f32 0.01, %v3161_v0  ;;  %v3163_v30 = vadd.f32 %v3162_v52, %v6428_v44  ;;  %vm3232_vm5 = vcmp.gt.f32.partialorder %v3161_v0, 0.0  ;;  %v3295_v43 = vsel %vm3231_vm4, %v3159_v49, %v3263_v50 }
 0x455   : > { %v3164_v20 = vpop.f32.mrf.mxu0  ;;  %v3356_v22 = vpack.c.bf16 %v6446_v53, %v6443_v57 }
 0x456   : > { %vm3233_vm6 = vcmp.gt.f32.partialorder %v3163_v30, 0.0  ;;  %v3265_v40 = vmul.f32 0.01, %v3163_v30  ;;  %v3165_v33 = vadd.f32 %v3164_v20, %v6431_v48  ;;  %v3296_v21 = vsel %vm3232_vm5, %v3161_v0, %v3264_v45 }
 0x457   : > { %v3168_v28 = vpop.f32.mrf.mxu0  ;;  %3609 = vmatprep.mubr.bf16.mxu1 %v3356_v22  ;;  %v6466_v52 = vadd.f32 %v3296_v21, %v6271_v27 }
 0x458   : > { %v3297_v61 = vsel %vm3233_vm6, %v3163_v30, %v3265_v40  ;;  %vm3234_vm7 = vcmp.gt.f32.partialorder %v3165_v33, 0.0  ;;  %v3266_v23 = vmul.f32 0.01, %v3165_v33  ;;  %3610 = vmatmul.mubr.bf16.vlgmr.msra.gmra.mxu1 %v3355_v10  ;;  %v3169_v51 = vadd.f32 %v3168_v28, %v6428_v44 }
 0x459   : > { %v3170_v25 = vpop.f32.mrf.mxu0  ;;  %4637 = vmatpush3.bf16.msra.mxu1 %v6406_v58  ;;  %v6462_v6 = vadd.f32 %v3297_v61, %v6268_v19  ;;  %v6473_v58 = vadd.f32 %v3295_v43, %v6278_v24 }
 0x45a   : > { %v3298_v7 = vsel %vm3234_vm7, %v3165_v33, %v3266_v23  ;;  %v3171_v8 = vadd.f32 %v3170_v25, %v6431_v48  ;;  %4630 = vmatprep.subr.bf16.mxu1 %v6408_v29  ;;  %vm3235_vm8 = vcmp.gt.f32.partialorder %v3169_v51, 0.0  ;;  %v3267_v50 = vmul.f32 0.01, %v3169_v51 }
 0x45b   : > { %v3172_v0 = vpop.f32.mrf.mxu0  ;;  %v6469_v45 = vadd.f32 %v3298_v7, %v6274_v12  ;;  %v3357_v20 = vpack.c.bf16 %v6462_v6, %v6473_v58 }
 0x45c   : > { %v3268_v49 = vmul.f32 0.01, %v3171_v8  ;;  %v3173_v30 = vadd.f32 %v3172_v0, %v6428_v44  ;;  %vm3236_vm9 = vcmp.gt.f32.partialorder %v3171_v8, 0.0  ;;  %v3299_v33 = vsel %vm3235_vm8, %v3169_v51, %v3267_v50 }
 0x45d   : > { %v3174_v19 = vpop.f32.mrf.mxu0  ;;  %v3358_v29 = vpack.c.bf16 %v6469_v45, %v6466_v52  ;;  %4638 = vmatpush3.bf16.msra.mxu1 %v6411_v16 }
 0x45e   : > { %vm3237_vm10 = vcmp.gt.f32.partialorder %v3173_v30, 0.0  ;;  %v3269_v27 = vmul.f32 0.01, %v3173_v30  ;;  %v3175_v12 = vadd.f32 %v3174_v19, %v6431_v48  ;;  %4631 = vmatprep.subr.bf16.mxu1 %v6414_v41  ;;  %v3300_v22 = vsel %vm3236_vm9, %v3171_v8, %v3268_v49 }
 0x45f   : > { %v3178_v24 = vpop.f32.mrf.mxu0  ;;  %3619 = vmatprep.mubr.bf16.mxu1 %v3358_v29  ;;  %v6491_v43 = vadd.f32 %v3300_v22, %v6292_v46 }
 0x460   : > { %v3301_v10 = vsel %vm3237_vm10, %v3173_v30, %v3269_v27  ;;  %vm3238_vm11 = vcmp.gt.f32.partialorder %v3175_v12, 0.0  ;;  %v3270_v40 = vmul.f32 0.01, %v3175_v12  ;;  %3620 = vmatmul.mubr.bf16.gmra.mxu1 %v3357_v20  ;;  %v3179_v16 = vadd.f32 %v3178_v24, %v6428_v44 }
 0x461   : > { %v3180_v28 = vpop.f32.mrf.mxu0  ;;  %4639 = vmatpush3.bf16.msra.mxu1 %v6417_v59  ;;  %v6487_v23 = vadd.f32 %v3301_v10, %v6289_v32  ;;  %v6498_v59 = vadd.f32 %v3299_v33, %v6299_v3 }
 0x462   : > { %v3302_v21 = vsel %vm3238_vm11, %v3175_v12, %v3270_v40  ;;  %v3181_v61 = vadd.f32 %v3180_v28, %v6431_v48  ;;  %4632 = vmatprep.subr.bf16.mxu1 %v6420_v14  ;;  %vm3239_vm12 = vcmp.gt.f32.partialorder %v3179_v16, 0.0  ;;  %v3271_v8 = vmul.f32 0.01, %v3179_v16 }
 0x463   : > { %v3182_v41 = vpop.f32.mrf.mxu0  ;;  %v6494_v25 = vadd.f32 %v3302_v21, %v6295_v36  ;;  %v3359_v0 = vpack.c.bf16 %v6487_v23, %v6498_v59 }
 0x464   : > { %v3272_v51 = vmul.f32 0.01, %v3181_v61  ;;  %v3183_v7 = vadd.f32 %v3182_v41, %v6428_v44  ;;  %vm3240_vm13 = vcmp.gt.f32.partialorder %v3181_v61, 0.0  ;;  %v3303_v19 = vsel %vm3239_vm12, %v3179_v16, %v3271_v8 }
 0x465   : > { %v3184_v32 = vpop.f32.mrf.mxu0  ;;  %v3360_v14 = vpack.c.bf16 %v6494_v25, %v6491_v43  ;;  %4640 = vmatpush3.bf16.msra.mxu1 %v6423_v63  ;;  %v6520_v16 = vadd.f32 %v3303_v19, %v6320_v60 }
 0x466   : > { %vm3241_vm14 = vcmp.gt.f32.partialorder %v3183_v7, 0.0  ;;  %v3273_v46 = vmul.f32 0.01, %v3183_v7  ;;  %v3185_v36 = vadd.f32 %v3184_v32, %v6431_v48  ;;  %v3304_v3 = vsel %vm3240_vm13, %v3181_v61, %v3272_v51 }
 0x467   : > { %v3188_v49 = vpop.f32.mrf.mxu0  ;;  %3629 = vmatprep.mubr.bf16.mxu1 %v3360_v14  ;;  %v6513_v22 = vadd.f32 %v3304_v3, %v6313_v42 }
 0x468   : > { %v3305_v30 = vsel %vm3241_vm14, %v3183_v7, %v3273_v46  ;;  %vm3242_vm15 = vcmp.gt.f32.partialorder %v3185_v36, 0.0  ;;  %v3274_v50 = vmul.f32 0.01, %v3185_v36  ;;  %3630 = vmatmul.mubr.bf16.gmra.mxu1 %v3359_v0  ;;  %v3189_v29 = vadd.f32 %v3188_v49, %v6428_v44 }
 0x469   : > { %v3190_v27 = vpop.f32.mrf.mxu0  ;;  %v6510_v20 = vadd.f32 %v3305_v30, %v6310_v4 }
 0x46a   : > { %v3306_v63 = vsel %vm3242_vm15, %v3185_v36, %v3274_v50  ;;  %v3191_v12 = vadd.f32 %v3190_v27, %v6431_v48  ;;  %vm3243_vm0 = vcmp.gt.f32.partialorder %v3189_v29, 0.0  ;;  %v3275_v28 = vmul.f32 0.01, %v3189_v29 }
 0x46b   : > { %v3192_v24 = vpop.f32.mrf.mxu0  ;;  %v6516_v10 = vadd.f32 %v3306_v63, %v6316_v47  ;;  %v3361_v47 = vpack.c.bf16 %v6510_v20, %v6520_v16 }
 0x46c   : > { %v3276_v40 = vmul.f32 0.01, %v3191_v12  ;;  %v3193_v33 = vadd.f32 %v3192_v24, %v6428_v44  ;;  %vm3244_vm1 = vcmp.gt.f32.partialorder %v3191_v12, 0.0  ;;  %v3307_v8 = vsel %vm3243_vm0, %v3189_v29, %v3275_v28 }
 0x46d   : > { %v3194_v21 = vpop.f32.mrf.mxu0  ;;  %v3362_v4 = vpack.c.bf16 %v6516_v10, %v6513_v22  ;;  %v6540_v50 = vadd.f32 %v3307_v8, %v6340_v15 }
 0x46e   : > { %vm3245_vm2 = vcmp.gt.f32.partialorder %v3193_v33, 0.0  ;;  %v3277_v61 = vmul.f32 0.01, %v3193_v33  ;;  %v3195_v42 = vadd.f32 %v3194_v21, %v6431_v48  ;;  %v3308_v51 = vsel %vm3244_vm1, %v3191_v12, %v3276_v40 }
 0x46f   : > { %v3198_v41 = vpop.f32.mrf.mxu0  ;;  %3639 = vmatprep.mubr.bf16.mxu1 %v3362_v4  ;;  %v6534_v3 = vadd.f32 %v3308_v51, %v6334_v18 }
 0x470   : > { %v3309_v7 = vsel %vm3245_vm2, %v3193_v33, %v3277_v61  ;;  %vm3246_vm3 = vcmp.gt.f32.partialorder %v3195_v42, 0.0  ;;  %v3278_v60 = vmul.f32 0.01, %v3195_v42  ;;  %3640 = vmatmul.mubr.bf16.gmra.mxu1 %v3361_v47  ;;  %v3199_v32 = vadd.f32 %v3198_v41, %v6428_v44 }
 0x471   : > { %v3200_v14 = vpop.f32.mrf.mxu0  ;;  %v6530_v46 = vadd.f32 %v3309_v7, %v6330_v9 }
 0x472   : > { %v3310_v36 = vsel %vm3246_vm3, %v3195_v42, %v3278_v60  ;;  %v3201_v0 = vadd.f32 %v3200_v14, %v6431_v48  ;;  %vm3247_vm4 = vcmp.gt.f32.partialorder %v3199_v32, 0.0  ;;  %v3279_v27 = vmul.f32 0.01, %v3199_v32 }
 0x473   : > { %v3202_v49 = vpop.f32.mrf.mxu0  ;;  %v6537_v30 = vadd.f32 %v3310_v36, %v6337_v62  ;;  %v3363_v62 = vpack.c.bf16 %v6530_v46, %v6540_v50 }
 0x474   : > { %v3280_v19 = vmul.f32 0.01, %v3201_v0  ;;  %v3203_v29 = vadd.f32 %v3202_v49, %v6428_v44  ;;  %vm3248_vm5 = vcmp.gt.f32.partialorder %v3201_v0, 0.0  ;;  %v3311_v28 = vsel %vm3247_vm4, %v3199_v32, %v3279_v27 }
 0x475   : > { %v3204_v9 = vpop.f32.mrf.mxu0  ;;  %v3364_v63 = vpack.c.bf16 %v6537_v30, %v6534_v3  ;;  %v6561_v60 = vadd.f32 %v3311_v28, %v6361_v34 }
 0x476   : > { %vm3249_vm6 = vcmp.gt.f32.partialorder %v3203_v29, 0.0  ;;  %v3281_v12 = vmul.f32 0.01, %v3203_v29  ;;  %v3205_v18 = vadd.f32 %v3204_v9, %v6431_v48  ;;  %v3312_v15 = vsel %vm3248_vm5, %v3201_v0, %v3280_v19 }
 0x477   : > { %v3208_v24 = vpop.f32.mrf.mxu0  ;;  %3649 = vmatprep.mubr.bf16.mxu1 %v3364_v63  ;;  %v6555_v51 = vadd.f32 %v3312_v15, %v6355_v38 }
 0x478   : > { %v3313_v40 = vsel %vm3249_vm6, %v3203_v29, %v3281_v12  ;;  %vm3250_vm7 = vcmp.gt.f32.partialorder %v3205_v18, 0.0  ;;  %v3282_v33 = vmul.f32 0.01, %v3205_v18  ;;  %3650 = vmatmul.mubr.bf16.gmra.mxu1 %v3363_v62  ;;  %v3209_v21 = vadd.f32 %v3208_v24, %v6428_v44 }
 0x479   : > { %v3210_v4 = vpop.f32.mrf.mxu0  ;;  %v6551_v61 = vadd.f32 %v3313_v40, %v6351_v55 }
 0x47a   : > { %v3314_v42 = vsel %vm3250_vm7, %v3205_v18, %v3282_v33  ;;  %v3211_v47 = vadd.f32 %v3210_v4, %v6431_v48  ;;  %vm3251_vm8 = vcmp.gt.f32.partialorder %v3209_v21, 0.0  ;;  %v3283_v14 = vmul.f32 0.01, %v3209_v21 }
 0x47b   : > { %v3212_v41 = vpop.f32.mrf.mxu0  ;;  %v6558_v7 = vadd.f32 %v3314_v42, %v6358_v2  ;;  %v3365_v2 = vpack.c.bf16 %v6551_v61, %v6561_v60 }
 0x47c   : > { %v3284_v8 = vmul.f32 0.01, %v3211_v47  ;;  %v3213_v32 = vadd.f32 %v3212_v41, %v6428_v44  ;;  %vm3252_vm9 = vcmp.gt.f32.partialorder %v3211_v47, 0.0  ;;  %v3315_v27 = vsel %vm3251_vm8, %v3209_v21, %v3283_v14 }
 0x47d   : > { %v3214_v55 = vpop.f32.mrf.mxu0  ;;  %v3366_v36 = vpack.c.bf16 %v6558_v7, %v6555_v51  ;;  %v6582_v33 = vadd.f32 %v3315_v27, %v6382_v39 }
 0x47e   : > { %vm3253_vm10 = vcmp.gt.f32.partialorder %v3213_v32, 0.0  ;;  %v3285_v0 = vmul.f32 0.01, %v3213_v32  ;;  %v3215_v38 = vadd.f32 %v3214_v55, %v6431_v48  ;;  %v3316_v34 = vsel %vm3252_vm9, %v3211_v47, %v3284_v8 }
 0x47f   : > { %v3218_v49 = vpop.f32.mrf.mxu0  ;;  %3659 = vmatprep.mubr.bf16.mxu1 %v3366_v36  ;;  %v6576_v15 = vadd.f32 %v3316_v34, %v6376_v17  ;;  %v5220_v34 = vld [vmem:[#allocation11 + $0x40] sm:$0xff]  }
 0x480   : > { %v3317_v19 = vsel %vm3253_vm10, %v3213_v32, %v3285_v0  ;;  %vm3254_vm11 = vcmp.gt.f32.partialorder %v3215_v38, 0.0  ;;  %v3286_v29 = vmul.f32 0.01, %v3215_v38  ;;  %3660 = vmatmul.mubr.bf16.gmra.mxu1 %v3365_v2  ;;  %v3219_v9 = vadd.f32 %v3218_v49, %v6428_v44  ;;  %v5215_v2 = vld [vmem:[#allocation11 + $0x18] sm:$0xff]   ;;  %v5219_v49 = vld [vmem:[#allocation11 + $0x8] sm:$0xff]  }
 0x481   : > { %v3220_v63 = vpop.f32.mrf.mxu0  ;;  %v6572_v12 = vadd.f32 %v3317_v19, %v6372_v37  ;;  %v5221_v19 = vld [vmem:[#allocation11] sm:$0xff]  }
 0x482   : > { %v3318_v18 = vsel %vm3254_vm11, %v3215_v38, %v3286_v29  ;;  %v3221_v62 = vadd.f32 %v3220_v63, %v6431_v48  ;;  %vm3255_vm12 = vcmp.gt.f32.partialorder %v3219_v9, 0.0  ;;  %v3287_v4 = vmul.f32 0.01, %v3219_v9  ;;  %v3405_v29 = vld [vmem:[#allocation10 + $0x6] sm:$0x3] }
 0x483   : > { %v3222_v24 = vpop.f32.mrf.mxu0  ;;  %v6579_v40 = vadd.f32 %v3318_v18, %v6379_v1  ;;  %v3367_v1 = vpack.c.bf16 %v6572_v12, %v6582_v33  ;;  %v6607_v27 = vrot.slane %v3405_v29, %v5797_v11 }
 0x484   : > { %v3288_v28 = vmul.f32 0.01, %v3221_v62  ;;  %v3223_v21 = vadd.f32 %v3222_v24, %v6428_v44  ;;  %vm3256_vm13 = vcmp.gt.f32.partialorder %v3221_v62, 0.0  ;;  %v3319_v44 = vsel %vm3255_vm12, %v3219_v9, %v3287_v4 }
 0x485   : > { %v3224_v37 = vpop.f32.mrf.mxu0  ;;  %v3368_v42 = vpack.c.bf16 %v6579_v40, %v6576_v15  ;;  %v6610_v9 = vrot.slane %v3405_v29, %v5799_v13 }
 0x486   : > { %vm3257_vm14 = vcmp.gt.f32.partialorder %v3223_v21, 0.0  ;;  %v3289_v47 = vmul.f32 0.01, %v3223_v21  ;;  %v3225_v17 = vadd.f32 %v3224_v37, %v6431_v48  ;;  %v3320_v39 = vsel %vm3256_vm13, %v3221_v62, %v3288_v28 }
 0x487   : > { %3669 = vmatprep.mubr.bf16.mxu1 %v3368_v42  ;;  %v6594_v55 = vadd.f32 %v3320_v39, %v6394_v54  ;;  %v6600_v48 = vadd.f32 %v3319_v44, %v6400_v26  ;;  %v5216_v54 = vld [vmem:[#allocation11 + $0x50] sm:$0xff]   ;;  %v5218_v26 = vld [vmem:[#allocation11 + $0x48] sm:$0xff]  }
 0x488   : > { %v3321_v41 = vsel %vm3257_vm14, %v3223_v21, %v3289_v47  ;;  %vm3258_vm15 = vcmp.gt.f32.partialorder %v3225_v17, 0.0  ;;  %v3290_v8 = vmul.f32 0.01, %v3225_v17  ;;  %3670 = vmatmul.mubr.bf16.gmra.mxu1 %v3367_v1 }
 0x489   : > { %v6591_v32 = vadd.f32 %v3321_v41, %v6391_v56  ;;  %v5214_v56 = vld [vmem:[#allocation11 + $0x58] sm:$0xff]  }
 0x48a   : > { %v3322_v14 = vsel %vm3258_vm15, %v3225_v17, %v3290_v8  ;;  %4573 = vmatprep.subr.bf16.mxu0 %v5214_v56  ;;  %4633 = vmatprep.subr.bf16.mxu1 %v5214_v56 }
 0x48b   : > { %v6597_v36 = vadd.f32 %v3322_v14, %v6397_v35  ;;  %v3369_v38 = vpack.c.bf16 %v6591_v32, %v6600_v48  ;;  %4574 = vmatpush3.bf16.msra.mxu0 %v5215_v2  ;;  %4641 = vmatpush3.bf16.msra.mxu1 %v5215_v2  ;;  %v5217_v35 = vld [vmem:[#allocation11 + $0x10] sm:$0xff]  }
 0x48c   : > { %4575 = vmatprep.subr.bf16.mxu0 %v5216_v54  ;;  %4634 = vmatprep.subr.bf16.mxu1 %v5216_v54 }
 0x48d   : > { %v3370_v0 = vpack.c.bf16 %v6597_v36, %v6594_v55 }
 0x48f   : > { %3679 = vmatprep.mubr.bf16.mxu1 %v3370_v0  ;;  %4576 = vmatpush3.bf16.msra.mxu0 %v5217_v35 }
 0x490   : > { %3680 = vmatmul.mubr.bf16.gmra.mxu1 %v3369_v38  ;;  %4577 = vmatprep.subr.bf16.mxu0 %v5218_v26 }
 0x491   : > { %4642 = vmatpush3.bf16.msra.mxu1 %v5217_v35 }
 0x492   : > { %4635 = vmatprep.subr.bf16.mxu1 %v5218_v26 }
 0x493   : > { %4578 = vmatpush3.bf16.msra.mxu0 %v5219_v49 }
 0x494   : > { %4579 = vmatprep.subr.bf16.mxu0 %v5220_v34 }
 0x495   : > { %4643 = vmatpush3.bf16.msra.mxu1 %v5219_v49 }
 0x496   : > { %4636 = vmatprep.subr.bf16.mxu1 %v5220_v34 }
 0x497   : > { %4580 = vmatpush3.bf16.msra.mxu0 %v5221_v19 }
 0x499   : > { %4644 = vmatpush3.bf16.msra.mxu1 %v5221_v19 }
 0x518   : > { %v3611_v63 = vpop.f32.mrf.mxu1 }
 0x519   : > { %v3612_v18 = vadd.f32 %v3611_v63, %v6607_v27 }
 0x51a   : > { %v3613_v62 = vpop.f32.mrf.mxu1 }
 0x51b   : > { %v3614_v24 = vadd.f32 %v3613_v62, %v6610_v9  ;;  %v3722_v37 = vmul.f32 0.01, %v3612_v18  ;;  %vm3690_vm1 = vcmp.gt.f32.partialorder %v3612_v18, 0.0 }
 0x51c   : > { %v3615_v28 = vpop.f32.mrf.mxu1 }
 0x51d   : > { %v3723_v21 = vmul.f32 0.01, %v3614_v24  ;;  %v3616_v4 = vadd.f32 %v3615_v28, %v6607_v27  ;;  %vm3691_vm0 = vcmp.gt.f32.partialorder %v3614_v24, 0.0  ;;  %v3754_v41 = vsel %vm3690_vm1, %v3612_v18, %v3722_v37 }
 0x51e   : > { %v3617_v42 = vpop.f32.mrf.mxu1  ;;  %v3786_v35 = vadd.f32 %v3754_v41, %v6449_v5 }
 0x51f   : > { %vm3692_vm2 = vcmp.gt.f32.partialorder %v3616_v4, 0.0  ;;  %v3724_v11 = vmul.f32 0.01, %v3616_v4  ;;  %v3618_v47 = vadd.f32 %v3617_v42, %v6610_v9  ;;  %v3755_v17 = vsel %vm3691_vm0, %v3614_v24, %v3723_v21 }
 0x520   : > { %v3621_v13 = vpop.f32.mrf.mxu1  ;;  %v3787_v2 = vadd.f32 %v3755_v17, %v6443_v57 }
 0x521   : > { %v3756_v1 = vsel %vm3692_vm2, %v3616_v4, %v3724_v11  ;;  %vm3693_vm3 = vcmp.gt.f32.partialorder %v3618_v47, 0.0  ;;  %v3725_v39 = vmul.f32 0.01, %v3618_v47  ;;  %v3622_v8 = vadd.f32 %v3621_v13, %v6607_v27 }
 0x522   : > { %v3623_v44 = vpop.f32.mrf.mxu1  ;;  %v3788_v14 = vadd.f32 %v3756_v1, %v6439_v31 }
 0x523   : > { %v3757_v0 = vsel %vm3693_vm3, %v3618_v47, %v3725_v39  ;;  %v3624_v38 = vadd.f32 %v3623_v44, %v6610_v9  ;;  %vm3694_vm4 = vcmp.gt.f32.partialorder %v3622_v8, 0.0  ;;  %v3726_v34 = vmul.f32 0.01, %v3622_v8 }
 0x524   : > { %v3625_v56 = vpop.f32.mrf.mxu1  ;;  %v3789_v54 = vadd.f32 %v3757_v0, %v6446_v53  ;;  %v3818_v63 = vpack.c.bf16 %v3788_v14, %v3786_v35 }
 0x525   : > { %v3727_v26 = vmul.f32 0.01, %v3624_v38  ;;  %v3626_v49 = vadd.f32 %v3625_v56, %v6607_v27  ;;  %vm3695_vm5 = vcmp.gt.f32.partialorder %v3624_v38, 0.0  ;;  %v3758_v5 = vsel %vm3694_vm4, %v3622_v8, %v3726_v34 }
 0x526   : > { %v3627_v19 = vpop.f32.mrf.mxu1  ;;  %v3819_v29 = vpack.c.bf16 %v3789_v54, %v3787_v2  ;;  %v3790_v17 = vadd.f32 %v3758_v5, %v6473_v58 }
 0x527   : > { %vm3696_vm6 = vcmp.gt.f32.partialorder %v3626_v49, 0.0  ;;  %v3728_v31 = vmul.f32 0.01, %v3626_v49  ;;  %v3628_v18 = vadd.f32 %v3627_v19, %v6610_v9  ;;  %v3759_v57 = vsel %vm3695_vm5, %v3624_v38, %v3727_v26 }
 0x528   : > { %v3631_v62 = vpop.f32.mrf.mxu1  ;;  %4001 = vmatprep.mubr.bf16.mxu0 %v3819_v29  ;;  %v3791_v47 = vadd.f32 %v3759_v57, %v6466_v52 }
 0x529   : > { %v3760_v24 = vsel %vm3696_vm6, %v3626_v49, %v3728_v31  ;;  %vm3697_vm7 = vcmp.gt.f32.partialorder %v3628_v18, 0.0  ;;  %v3729_v53 = vmul.f32 0.01, %v3628_v18  ;;  %4002 = vmatmul.mubr.bf16.vlgmr.msra.gmra.mxu0 %v3818_v63  ;;  %v3632_v28 = vadd.f32 %v3631_v62, %v6607_v27 }
 0x52a   : > { %v3633_v21 = vpop.f32.mrf.mxu1  ;;  %v3792_v4 = vadd.f32 %v3760_v24, %v6462_v6 }
 0x52b   : > { %v3761_v37 = vsel %vm3697_vm7, %v3628_v18, %v3729_v53  ;;  %v3634_v42 = vadd.f32 %v3633_v21, %v6610_v9  ;;  %vm3698_vm8 = vcmp.gt.f32.partialorder %v3632_v28, 0.0  ;;  %v3730_v41 = vmul.f32 0.01, %v3632_v28 }
 0x52c   : > { %v3635_v11 = vpop.f32.mrf.mxu1  ;;  %v3793_v13 = vadd.f32 %v3761_v37, %v6469_v45  ;;  %v3820_v0 = vpack.c.bf16 %v3792_v4, %v3790_v17 }
 0x52d   : > { %v3731_v1 = vmul.f32 0.01, %v3634_v42  ;;  %v3636_v39 = vadd.f32 %v3635_v11, %v6607_v27  ;;  %vm3699_vm9 = vcmp.gt.f32.partialorder %v3634_v42, 0.0  ;;  %v3762_v58 = vsel %vm3698_vm8, %v3632_v28, %v3730_v41 }
 0x52e   : > { %v3637_v8 = vpop.f32.mrf.mxu1  ;;  %v3821_v44 = vpack.c.bf16 %v3793_v13, %v3791_v47  ;;  %v3794_v63 = vadd.f32 %v3762_v58, %v6498_v59 }
 0x52f   : > { %vm3700_vm10 = vcmp.gt.f32.partialorder %v3636_v39, 0.0  ;;  %v3732_v6 = vmul.f32 0.01, %v3636_v39  ;;  %v3638_v14 = vadd.f32 %v3637_v8, %v6610_v9  ;;  %v3763_v52 = vsel %vm3699_vm9, %v3634_v42, %v3731_v1 }
 0x530   : > { %v3641_v38 = vpop.f32.mrf.mxu1  ;;  %4009 = vmatprep.mubr.bf16.mxu0 %v3821_v44  ;;  %v3795_v19 = vadd.f32 %v3763_v52, %v6491_v43 }
 0x531   : > { %v3764_v56 = vsel %vm3700_vm10, %v3636_v39, %v3732_v6  ;;  %vm3701_vm11 = vcmp.gt.f32.partialorder %v3638_v14, 0.0  ;;  %v3733_v45 = vmul.f32 0.01, %v3638_v14  ;;  %4010 = vmatmul.mubr.bf16.gmra.mxu0 %v3820_v0  ;;  %v3642_v2 = vadd.f32 %v3641_v38, %v6607_v27 }
 0x532   : > { %v3643_v54 = vpop.f32.mrf.mxu1  ;;  %v3796_v35 = vadd.f32 %v3764_v56, %v6487_v23 }
 0x533   : > { %v3765_v26 = vsel %vm3701_vm11, %v3638_v14, %v3733_v45  ;;  %v3644_v49 = vadd.f32 %v3643_v54, %v6610_v9  ;;  %vm3702_vm12 = vcmp.gt.f32.partialorder %v3642_v2, 0.0  ;;  %v3734_v62 = vmul.f32 0.01, %v3642_v2 }
 0x534   : > { %v3645_v34 = vpop.f32.mrf.mxu1  ;;  %v3797_v29 = vadd.f32 %v3765_v26, %v6494_v25  ;;  %v3822_v5 = vpack.c.bf16 %v3796_v35, %v3794_v63 }
 0x535   : > { %v3735_v31 = vmul.f32 0.01, %v3644_v49  ;;  %v3646_v18 = vadd.f32 %v3645_v34, %v6607_v27  ;;  %vm3703_vm13 = vcmp.gt.f32.partialorder %v3644_v49, 0.0  ;;  %v3766_v59 = vsel %vm3702_vm12, %v3642_v2, %v3734_v62 }
 0x536   : > { %v3647_v57 = vpop.f32.mrf.mxu1  ;;  %v3823_v24 = vpack.c.bf16 %v3797_v29, %v3795_v19  ;;  %v3798_v39 = vadd.f32 %v3766_v59, %v6520_v16 }
 0x537   : > { %vm3704_vm14 = vcmp.gt.f32.partialorder %v3646_v18, 0.0  ;;  %v3736_v23 = vmul.f32 0.01, %v3646_v18  ;;  %v3648_v53 = vadd.f32 %v3647_v57, %v6610_v9  ;;  %v3767_v43 = vsel %vm3703_vm13, %v3644_v49, %v3735_v31 }
 0x538   : > { %v3651_v28 = vpop.f32.mrf.mxu1  ;;  %4017 = vmatprep.mubr.bf16.mxu0 %v3823_v24  ;;  %v3799_v17 = vadd.f32 %v3767_v43, %v6513_v22 }
 0x539   : > { %v3768_v21 = vsel %vm3704_vm14, %v3646_v18, %v3736_v23  ;;  %vm3705_vm15 = vcmp.gt.f32.partialorder %v3648_v53, 0.0  ;;  %v3737_v25 = vmul.f32 0.01, %v3648_v53  ;;  %4018 = vmatmul.mubr.bf16.gmra.mxu0 %v3822_v5  ;;  %v3652_v4 = vadd.f32 %v3651_v28, %v6607_v27 }
 0x53a   : > { %v3653_v37 = vpop.f32.mrf.mxu1  ;;  %v3800_v42 = vadd.f32 %v3768_v21, %v6510_v20 }
 0x53b   : > { %v3769_v11 = vsel %vm3705_vm15, %v3648_v53, %v3737_v25  ;;  %v3654_v47 = vadd.f32 %v3653_v37, %v6610_v9  ;;  %vm3706_vm0 = vcmp.gt.f32.partialorder %v3652_v4, 0.0  ;;  %v3738_v44 = vmul.f32 0.01, %v3652_v4 }
 0x53c   : > { %v3655_v13 = vpop.f32.mrf.mxu1  ;;  %v3801_v1 = vadd.f32 %v3769_v11, %v6516_v10  ;;  %v3824_v38 = vpack.c.bf16 %v3800_v42, %v3798_v39 }
 0x53d   : > { %v3739_v41 = vmul.f32 0.01, %v3654_v47  ;;  %v3656_v8 = vadd.f32 %v3655_v13, %v6607_v27  ;;  %vm3707_vm1 = vcmp.gt.f32.partialorder %v3654_v47, 0.0  ;;  %v3770_v16 = vsel %vm3706_vm0, %v3652_v4, %v3738_v44 }
 0x53e   : > { %v3657_v6 = vpop.f32.mrf.mxu1  ;;  %v3825_v14 = vpack.c.bf16 %v3801_v1, %v3799_v17  ;;  %v3802_v19 = vadd.f32 %v3770_v16, %v6540_v50 }
 0x53f   : > { %vm3708_vm2 = vcmp.gt.f32.partialorder %v3656_v8, 0.0  ;;  %v3740_v20 = vmul.f32 0.01, %v3656_v8  ;;  %v3658_v0 = vadd.f32 %v3657_v6, %v6610_v9  ;;  %v3771_v22 = vsel %vm3707_vm1, %v3654_v47, %v3739_v41 }
 0x540   : > { %v3661_v52 = vpop.f32.mrf.mxu1  ;;  %4025 = vmatprep.mubr.bf16.mxu0 %v3825_v14  ;;  %v3803_v49 = vadd.f32 %v3771_v22, %v6534_v3 }
 0x541   : > { %v3772_v56 = vsel %vm3708_vm2, %v3656_v8, %v3740_v20  ;;  %vm3709_vm3 = vcmp.gt.f32.partialorder %v3658_v0, 0.0  ;;  %v3741_v10 = vmul.f32 0.01, %v3658_v0  ;;  %4026 = vmatmul.mubr.bf16.gmra.mxu0 %v3824_v38  ;;  %v3662_v45 = vadd.f32 %v3661_v52, %v6607_v27 }
 0x542   : > { %v3663_v58 = vpop.f32.mrf.mxu1  ;;  %v3804_v2 = vadd.f32 %v3772_v56, %v6530_v46 }
 0x543   : > { %v3773_v54 = vsel %vm3709_vm3, %v3658_v0, %v3741_v10  ;;  %v3664_v35 = vadd.f32 %v3663_v58, %v6610_v9  ;;  %vm3710_vm4 = vcmp.gt.f32.partialorder %v3662_v45, 0.0  ;;  %v3742_v31 = vmul.f32 0.01, %v3662_v45 }
 0x544   : > { %v3665_v26 = vpop.f32.mrf.mxu1  ;;  %v3805_v34 = vadd.f32 %v3773_v54, %v6537_v30  ;;  %v3826_v57 = vpack.c.bf16 %v3804_v2, %v3802_v19 }
 0x545   : > { %v3743_v29 = vmul.f32 0.01, %v3664_v35  ;;  %v3666_v63 = vadd.f32 %v3665_v26, %v6607_v27  ;;  %vm3711_vm5 = vcmp.gt.f32.partialorder %v3664_v35, 0.0  ;;  %v3774_v50 = vsel %vm3710_vm4, %v3662_v45, %v3742_v31 }
 0x546   : > { %v3667_v18 = vpop.f32.mrf.mxu1  ;;  %v3827_v62 = vpack.c.bf16 %v3805_v34, %v3803_v49  ;;  %v3806_v42 = vadd.f32 %v3774_v50, %v6561_v60 }
 0x547   : > { %vm3712_vm6 = vcmp.gt.f32.partialorder %v3666_v63, 0.0  ;;  %v3744_v46 = vmul.f32 0.01, %v3666_v63  ;;  %v3668_v24 = vadd.f32 %v3667_v18, %v6610_v9  ;;  %v3775_v3 = vsel %vm3711_vm5, %v3664_v35, %v3743_v29 }
 0x548   : > { %v3671_v23 = vpop.f32.mrf.mxu1  ;;  %4033 = vmatprep.mubr.bf16.mxu1 %v3827_v62  ;;  %v3807_v4 = vadd.f32 %v3775_v3, %v6555_v51  ;;  %v6683_v62 = vld [vmem:[#allocation13] ss:$0 sm:$0xff] }
 0x549   : > { %v3776_v53 = vsel %vm3712_vm6, %v3666_v63, %v3744_v46  ;;  %vm3713_vm7 = vcmp.gt.f32.partialorder %v3668_v24, 0.0  ;;  %v3745_v30 = vmul.f32 0.01, %v3668_v24  ;;  %4034 = vmatmul.mubr.bf16.vlgmr.msra.gmra.mxu1 %v3826_v57  ;;  %v3672_v5 = vadd.f32 %v3671_v23, %v6607_v27 }
 0x54a   : > { %v3673_v28 = vpop.f32.mrf.mxu1  ;;  %v3808_v43 = vadd.f32 %v3776_v53, %v6551_v61 }
 0x54b   : > { %v3777_v21 = vsel %vm3713_vm7, %v3668_v24, %v3745_v30  ;;  %v3674_v25 = vadd.f32 %v3673_v28, %v6610_v9  ;;  %vm3714_vm8 = vcmp.gt.f32.partialorder %v3672_v5, 0.0  ;;  %v3746_v13 = vmul.f32 0.01, %v3672_v5 }
 0x54c   : > { %v3675_v59 = vpop.f32.mrf.mxu1  ;;  %v3809_v37 = vadd.f32 %v3777_v21, %v6558_v7  ;;  %v3828_v41 = vpack.c.bf16 %v3808_v43, %v3806_v42 }
 0x54d   : > { %v3747_v11 = vmul.f32 0.01, %v3674_v25  ;;  %v3676_v47 = vadd.f32 %v3675_v59, %v6607_v27  ;;  %vm3715_vm9 = vcmp.gt.f32.partialorder %v3674_v25, 0.0  ;;  %v3778_v60 = vsel %vm3714_vm8, %v3672_v5, %v3746_v13 }
 0x54e   : > { %v3677_v17 = vpop.f32.mrf.mxu1  ;;  %v3829_v1 = vpack.c.bf16 %v3809_v37, %v3807_v4  ;;  %v3810_v10 = vadd.f32 %v3778_v60, %v6582_v33 }
 0x54f   : > { %vm3716_vm10 = vcmp.gt.f32.partialorder %v3676_v47, 0.0  ;;  %v3748_v61 = vmul.f32 0.01, %v3676_v47  ;;  %v3678_v39 = vadd.f32 %v3677_v17, %v6610_v9  ;;  %v3779_v51 = vsel %vm3715_vm9, %v3674_v25, %v3747_v11 }
 0x550   : > { %v3681_v8 = vpop.f32.mrf.mxu1  ;;  %4041 = vmatprep.mubr.bf16.mxu1 %v3829_v1  ;;  %v3811_v22 = vadd.f32 %v3779_v51, %v6576_v15 }
 0x551   : > { %v3780_v44 = vsel %vm3716_vm10, %v3676_v47, %v3748_v61  ;;  %vm3717_vm11 = vcmp.gt.f32.partialorder %v3678_v39, 0.0  ;;  %v3749_v7 = vmul.f32 0.01, %v3678_v39  ;;  %4042 = vmatmul.mubr.bf16.gmra.mxu1 %v3828_v41  ;;  %v3682_v6 = vadd.f32 %v3681_v8, %v6607_v27 }
 0x552   : > { %v3683_v14 = vpop.f32.mrf.mxu1  ;;  %v3812_v20 = vadd.f32 %v3780_v44, %v6572_v12 }
 0x553   : > { %v3781_v0 = vsel %vm3717_vm11, %v3678_v39, %v3749_v7  ;;  %v3684_v38 = vadd.f32 %v3683_v14, %v6610_v9  ;;  %vm3718_vm12 = vcmp.gt.f32.partialorder %v3682_v6, 0.0  ;;  %v3750_v58 = vmul.f32 0.01, %v3682_v6 }
 0x554   : > { %v3685_v52 = vpop.f32.mrf.mxu1  ;;  %v3813_v56 = vadd.f32 %v3781_v0, %v6579_v40  ;;  %v3830_v26 = vpack.c.bf16 %v3812_v20, %v3810_v10 }
 0x555   : > { %v3751_v16 = vmul.f32 0.01, %v3684_v38  ;;  %v3686_v45 = vadd.f32 %v3685_v52, %v6607_v27  ;;  %vm3719_vm13 = vcmp.gt.f32.partialorder %v3684_v38, 0.0  ;;  %v3782_v33 = vsel %vm3718_vm12, %v3682_v6, %v3750_v58 }
 0x556   : > { %v3687_v2 = vpop.f32.mrf.mxu1  ;;  %v3831_v54 = vpack.c.bf16 %v3813_v56, %v3811_v22  ;;  %v3814_v63 = vadd.f32 %v3782_v33, %v6600_v48 }
 0x557   : > { %vm3720_vm14 = vcmp.gt.f32.partialorder %v3686_v45, 0.0  ;;  %v3752_v12 = vmul.f32 0.01, %v3686_v45  ;;  %v3688_v35 = vadd.f32 %v3687_v2, %v6610_v9  ;;  %v3783_v49 = vsel %vm3719_vm13, %v3684_v38, %v3751_v16 }
 0x558   : > { %4049 = vmatprep.mubr.bf16.mxu1 %v3831_v54  ;;  %v3815_v19 = vadd.f32 %v3783_v49, %v6594_v55 }
 0x559   : > { %v3784_v15 = vsel %vm3720_vm14, %v3686_v45, %v3752_v12  ;;  %vm3721_vm15 = vcmp.gt.f32.partialorder %v3688_v35, 0.0  ;;  %v3753_v40 = vmul.f32 0.01, %v3688_v35  ;;  %4050 = vmatmul.mubr.bf16.gmra.mxu1 %v3830_v26 }
 0x55a   : > { %v3816_v27 = vadd.f32 %v3784_v15, %v6591_v32 }
 0x55b   : > { %v3785_v34 = vsel %vm3721_vm15, %v3688_v35, %v3753_v40 }
 0x55c   : > { %v3817_v29 = vadd.f32 %v3785_v34, %v6597_v36  ;;  %v3832_v9 = vpack.c.bf16 %v3816_v27, %v3814_v63 }
 0x55e   : > { %v3833_v31 = vpack.c.bf16 %v3817_v29, %v3815_v19 }
 0x560   : > { %4057 = vmatprep.mubr.bf16.mxu1 %v3833_v31 }
 0x561   : > { %4058 = vmatmul.mubr.bf16.gmra.mxu1 %v3832_v9 }
 0x5e9   : > { %v4581_v18 = vpop.f32.mrf.mxu0 }
 0x5eb   : > { %v4582_v57 = vpop.f32.mrf.mxu0 }
 0x5ec   : > { %v4583_v46 = vadd.f32 %v4582_v57, %v4581_v18 }
 0x5ed   : > { %v4584_v24 = vpop.f32.mrf.mxu0 }
 0x5ee   : > { %v4004_v32 = vadd.f32 %v4583_v46, %v6683_v62 }
 0x5ef   : > { %v4585_v23 = vpop.f32.mrf.mxu0 }
 0x5f0   : > { %4066 = vst [vmem:[%s6686_s20] sm:$0xff] %v4004_v32  ;;  %v4586_v55 = vadd.f32 %v4585_v23, %v4584_v24 }
 0x5f1   : > { %v4587_v36 = vpop.f32.mrf.mxu0 }
 0x5f2   : > { %v4007_v48 = vadd.f32 %v4586_v55, %v6683_v62 }
 0x5f3   : > { %v4588_v3 = vpop.f32.mrf.mxu0 }
 0x5f4   : > { %4067 = vst [vmem:[%s6686_s20 + $0x8] sm:$0xff] %v4007_v48  ;;  %v4589_v53 = vadd.f32 %v4588_v3, %v4587_v36 }
 0x5f5   : > { %v4590_v30 = vpop.f32.mrf.mxu0 }
 0x5f6   : > { %v4012_v50 = vadd.f32 %v4589_v53, %v6683_v62 }
 0x5f7   : > { %v4591_v5 = vpop.f32.mrf.mxu0 }
 0x5f8   : > { %4068 = vst [vmem:[%s6686_s20 + $0x10] sm:$0xff] %v4012_v50  ;;  %v4592_v28 = vadd.f32 %v4591_v5, %v4590_v30 }
 0x5f9   : > { %v4593_v43 = vpop.f32.mrf.mxu0 }
 0x5fa   : > { %v4015_v21 = vadd.f32 %v4592_v28, %v6683_v62 }
 0x5fb   : > { %v4594_v25 = vpop.f32.mrf.mxu0 }
 0x5fc   : > { %4069 = vst [vmem:[%s6686_s20 + $0x18] sm:$0xff] %v4015_v21  ;;  %v4595_v59 = vadd.f32 %v4594_v25, %v4593_v43 }
 0x5fd   : > { %v4596_v4 = vpop.f32.mrf.mxu0 }
 0x5fe   : > { %v4020_v37 = vadd.f32 %v4595_v59, %v6683_v62 }
 0x5ff   : > { %v4597_v42 = vpop.f32.mrf.mxu0 }
 0x600   : > { %4070 = vst [vmem:[%s6686_s20 + $0x20] sm:$0xff] %v4020_v37  ;;  %v4598_v11 = vadd.f32 %v4597_v42, %v4596_v4 }
 0x601   : > { %v4599_v47 = vpop.f32.mrf.mxu0 }
 0x602   : > { %v4023_v13 = vadd.f32 %v4598_v11, %v6683_v62 }
 0x603   : > { %v4600_v17 = vpop.f32.mrf.mxu0 }
 0x604   : > { %4071 = vst [vmem:[%s6686_s20 + $0x28] sm:$0xff] %v4023_v13  ;;  %v4601_v1 = vadd.f32 %v4600_v17, %v4599_v47 }
 0x605   : > { %v4602_v61 = vpop.f32.mrf.mxu0 }
 0x606   : > { %v4028_v39 = vadd.f32 %v4601_v1, %v6683_v62 }
 0x607   : > { %v4603_v41 = vpop.f32.mrf.mxu0 }
 0x608   : > { %4072 = vst [vmem:[%s6686_s20 + $0x30] sm:$0xff] %v4028_v39  ;;  %v4604_v8 = vadd.f32 %v4603_v41, %v4602_v61 }
 0x609   : > { %v4605_v51 = vpop.f32.mrf.mxu1 }
 0x60a   : > { %v4031_v44 = vadd.f32 %v4604_v8, %v6683_v62 }
 0x60b   : > { %v4606_v7 = vpop.f32.mrf.mxu1 }
 0x60c   : > { %4073 = vst [vmem:[%s6686_s20 + $0x38] sm:$0xff] %v4031_v44  ;;  %v4607_v60 = vadd.f32 %v4606_v7, %v4605_v51 }
 0x60d   : > { %v4608_v6 = vpop.f32.mrf.mxu1 }
 0x60e   : > { %v4036_v14 = vadd.f32 %v4607_v60, %v6683_v62 }
 0x60f   : > { %v4609_v20 = vpop.f32.mrf.mxu1 }
 0x610   : > { %4074 = vst [vmem:[%s6686_s20 + $0x40] sm:$0xff] %v4036_v14  ;;  %v4610_v0 = vadd.f32 %v4609_v20, %v4608_v6 }
 0x611   : > { %v4611_v38 = vpop.f32.mrf.mxu1 }
 0x612   : > { %v4039_v52 = vadd.f32 %v4610_v0, %v6683_v62 }
 0x613   : > { %v4612_v22 = vpop.f32.mrf.mxu1 }
 0x614   : > { %4075 = vst [vmem:[%s6686_s20 + $0x48] sm:$0xff] %v4039_v52  ;;  %v4613_v56 = vadd.f32 %v4612_v22, %v4611_v38 }
 0x615   : > { %v4614_v10 = vpop.f32.mrf.mxu1 }
 0x616   : > { %v4044_v16 = vadd.f32 %v4613_v56, %v6683_v62 }
 0x617   : > { %v4615_v45 = vpop.f32.mrf.mxu1 }
 0x618   : > { %4076 = vst [vmem:[%s6686_s20 + $0x50] sm:$0xff] %v4044_v16  ;;  %v4616_v58 = vadd.f32 %v4615_v45, %v4614_v10 }
 0x619   : > { %v4617_v2 = vpop.f32.mrf.mxu1 }
 0x61a   : > { %v4047_v54 = vadd.f32 %v4616_v58, %v6683_v62 }
 0x61b   : > { %v4618_v12 = vpop.f32.mrf.mxu1 }
 0x61c   : > { %4077 = vst [vmem:[%s6686_s20 + $0x58] sm:$0xff] %v4047_v54  ;;  %v4619_v35 = vadd.f32 %v4618_v12, %v4617_v2 }
 0x61d   : > { %v4620_v26 = vpop.f32.mrf.mxu1 }
 0x61e   : > { %v4052_v49 = vadd.f32 %v4619_v35, %v6683_v62 }
 0x61f   : > { %v4621_v15 = vpop.f32.mrf.mxu1 }
 0x620   : > { %4078 = vst [vmem:[%s6686_s20 + $0x60] sm:$0xff] %v4052_v49  ;;  %v4622_v40 = vadd.f32 %v4621_v15, %v4620_v26 }
 0x621   : > { %v4623_v33 = vpop.f32.mrf.mxu1 }
 0x622   : > { %v4055_v27 = vadd.f32 %v4622_v40, %v6683_v62 }
 0x623   : > { %v4624_v34 = vpop.f32.mrf.mxu1 }
 0x624   : > { %4079 = vst [vmem:[%s6686_s20 + $0x68] sm:$0xff] %v4055_v27  ;;  %v4625_v19 = vadd.f32 %v4624_v34, %v4623_v33 }
 0x625   : > { %v4626_v29 = vpop.f32.mrf.mxu1 }
 0x626   : > { %v4060_v63 = vadd.f32 %v4625_v19, %v6683_v62 }
 0x627   : > { %v4627_v31 = vpop.f32.mrf.mxu1 }
 0x628   : > { %4080 = vst [vmem:[%s6686_s20 + $0x70] sm:$0xff] %v4060_v63  ;;  %v4628_v9 = vadd.f32 %v4627_v31, %v4626_v29 }
 0x62a   : > { %v4063_v18 = vadd.f32 %v4628_v9, %v6683_v62 }
 0x62c   : > { %4081 = vst [vmem:[%s6686_s20 + $0x78] sm:$0xff] %v4063_v18 }
 0x62d   : > { %5419 = shalt.err (!%p5416_p10)
}
 0x62e   : > { %s5420_s28 = scalar_lea.hbm %s6722_s23, 2048  ;;  %s5424_s8 = scalar_lea.hbm %s6775_s7, 16384 }
 0x62f   : > { %p5421_p1 = scmp.ne.s32.totalorder %s6722_s23, %s5420_s28  ;;  %p5425_p4 = scmp.lt.s32.totalorder %s6722_s23, %s6775_s7 }
 0x630   : > { %p5426_p7 = scmp.lt.s32.totalorder %s5424_s8, %s5420_s28 }
 0x631   : > { %p5422_p3 = pnand %p5421_p1, %p6798_p5 }
 0x632   : > { %p5427_p8 = por %p5426_p7, %p5425_p4 }
 0x633   : > { %p5423_p13 = pneg %p5422_p3 }
 0x635   : > { %p5428_p9 = pnand %p5427_p8, %p5423_p13 }
 0x637   : > { %5431 = shalt.err (!%p5428_p9)
}
 0x638   : > { %s5501_s16 = smov 128   ;;  %s5502_s14 = smov 8  }
 0x639   : > { %4674 = dma.vmem_to_hbm [thread:$0]  (%p6798_p5), %s6724_s10, 2048, %s6722_s23, %s4083_s15, %s5501_s16, %s5501_s16, %s5502_s14  }
 0x63a PF: > { %p4716_p11 = scmp.ge.s32.totalorder %s5482_s27, 2  ;;  %s4111_s18 = sand.u32 1, %s5470_s24  }
 0x63b   : > { %p6799_p12 = scmp.ne.s32.totalorder %s6788_s22, 0  ;;  %s4112_s30 = scalar_lea.sflag [#allocation4], %s4111_s18 }
 0x63d   : > { %p4700_p0 = pnand %p4716_p11, %p6799_p12 }
 0x63f   : > { %p4701_p2 = pneg %p4700_p0 }
 0x641   : > { %5465 = dma.done.wait (%p4701_p2), %s4112_s30, 2048  }
 0x642   : > { %5467 = vsyncadd (%p4701_p2), %s4112_s30, 4294965248  ;;  %p23_p6 = scmp.ge.s32.totalorder %s5645_s11, 10   ;;  %s6800_s24 = smov %s5474_s25 }
 0x643   : > { %s6801_s25 = smov %s5478_s26  ;;  %s6802_s26 = smov %s5656_s19 }
 0x644   : > { %s6803_s27 = smov %s5645_s11  ;;  %25 = sbr.rel (!%p23_p6) target bundleno = 10 (0xa), region = 123 }
 0x649   :  { %4117 = vsyncpa [#allocation3], 1 }
 0x64a   :  { %4119 = vsyncpa [#allocation3 + $0x1], 1 }
 0x64b   :  { %4120 = vsyncpa [#allocation6], 1 }
 0x64c   :  { %4121 = vsyncpa [#allocation9], 1 }
 0x64d   :  { %4122 = vsyncpa [#allocation12], 1 }
 0x64e   :  { %4123 = vsyncpa [#allocation4], 1 }
 0x64f   :  { %4125 = vsyncpa [#allocation4 + $0x1], 1 }

</bundles_post_ra>
